<compile_context>
chip_gen: v7x
topology: tpu7x:2x2x1
jax: 0.10.0
libtpu: 0.0.40
codegen_flags: <defaults>
</compile_context>

<pallas_src>
import jax
import jax.numpy as jnp
from jax.experimental import pallas as pl
from jax.experimental.pallas import tpu as pltpu

# ----------------------------- config (small) --------------------------------
EMBED_DIM = 32
N_HEADS = 4
N_QUERIES = 8
N_LAYERS = 2
N_MAPS = 3
N_CLASSES = 5
MLP_RATIO = 4
BATCH = 2
FEAT_HW = 8        # all feature maps and mask_features are 8x8 -> resize is identity
CLS_PAD = 128      # class logits padded to a full 128-lane store, sliced outside
HIDDEN = MLP_RATIO * EMBED_DIM   # 128 -> lane-dense MLP weights


# ----------------------------- in-kernel math helpers -------------------------
def _erf(x):
    # Abramowitz & Stegun 7.1.26 (|err| < 1.5e-7): exact-GELU erf built from
    # exp/mul/add only, so we never rely on an erf primitive lowering in Mosaic.
    a1, a2, a3, a4, a5 = 0.254829592, -0.284496736, 1.421413741, -1.453152027, 1.061405429
    p = 0.3275911
    ax = jnp.abs(x)
    t = 1.0 / (1.0 + p * ax)
    poly = t * (a1 + t * (a2 + t * (a3 + t * (a4 + t * a5))))
    y = 1.0 - poly * jnp.exp(-ax * ax)
    return jnp.where(x < 0, -y, y)


def _gelu_erf(x):
    return 0.5 * x * (1.0 + _erf(x * (2.0 ** -0.5)))


# ----------------------------- fully fused forward kernel ---------------------
def _decoder_forward_kernel(qfeat_ref, qpos_ref, mem_ref, posk_ref, mf_ref,
                            ca_w_ref, ca_b_ref, sa_w_ref, sa_b_ref,
                            ng_ref, nb_ref, w1_ref, b1_ref, w2_ref, b2_ref,
                            dng_ref, dnb_ref, clsw_ref, clsb_ref, mmw_ref, mmb_ref,
                            cls_ref, mpred_ref):
    f32 = jnp.float32
    c = EMBED_DIM
    hd = c // N_HEADS
    scale = float(hd) ** -0.5

    qpos = qpos_ref[...].astype(f32)            # (Q, C)   shared across batch
    mf = mf_ref[0].astype(f32)                  # (C, HW)  this batch element
    dng = dng_ref[...]
    dnb = dnb_ref[...]
    clsw = clsw_ref[...]                        # (C, 128) lane-dense padded
    clsb = clsb_ref[...]
    mmw = mmw_ref[...]                          # (3, C, C)
    mmb = mmb_ref[...]                          # (3, C)

    def layer_norm(x, g, b):
        mu = jnp.mean(x, axis=-1, keepdims=True)
        var = jnp.mean(jnp.square(x - mu), axis=-1, keepdims=True)
        return (x - mu) * jax.lax.rsqrt(var + 1e-5) * g + b

    def softmax(s):
        s = s - jnp.max(s, axis=-1, keepdims=True)
        p = jnp.exp(s)
        return p * pl.reciprocal(jnp.sum(p, axis=-1, keepdims=True), approx=True)

    def attend(qp, kp, vp, bias):
        # qp (Lq, C), kp/vp (Lk, C) -> concat of per-head outputs (Lq, C).
        heads = []
        for h in range(N_HEADS):                # static unroll (4 heads)
            lo = h * hd
            sc = jax.lax.dot_general(qp[:, lo:lo + hd] * scale, kp[:, lo:lo + hd],
                                     (((1,), (1,)), ((), ())),
                                     preferred_element_type=f32)        # (Lq, Lk)
            if bias is not None:
                sc = sc + bias
            heads.append(jnp.dot(softmax(sc), vp[:, lo:lo + hd],
                                 preferred_element_type=f32))
        return jnp.concatenate(heads, axis=-1)   # single Wo matmul outside

    def prediction_head(x, e):
        # decoder_norm -> class logits (128-lane padded) + 3-layer mask MLP +
        # per-batch bmm with mask features; returns the cross-attn bias for the
        # NEXT layer, computed in-register (no amask tensor, no sigmoid).
        xn = layer_norm(x, dng, dnb)
        cls_ref[0, e] = (jnp.dot(xn, clsw, preferred_element_type=f32)
                         + clsb).astype(cls_ref.dtype)
        h1 = jnp.maximum(jnp.dot(xn, mmw[0], preferred_element_type=f32) + mmb[0:1, :], 0.0)
        h2 = jnp.maximum(jnp.dot(h1, mmw[1], preferred_element_type=f32) + mmb[1:2, :], 0.0)
        emb = jnp.dot(h2, mmw[2], preferred_element_type=f32) + mmb[2:3, :]      # (Q, C)
        mpred = jnp.dot(emb, mf, preferred_element_type=f32)                     # (Q, HW)
        mpred_ref[0, e] = mpred.astype(mpred_ref.dtype)
        # sigmoid(mpred) < 0.5  <=>  mpred < 0  (masked position);
        # fully-masked rows are left un-masked (Mask2Former guard).
        keep_row = jnp.max(mpred, axis=-1, keepdims=True) >= 0.0
        return jnp.where(jnp.logical_and(mpred < 0.0, keep_row), -1e30, 0.0)

    # initial queries (nn.Embedding weight, shared across batch)
    x = qfeat_ref[...].astype(f32)              # (Q, C)
    attn_bias = prediction_head(x, 0)

    for l in range(N_LAYERS):                   # static unroll over layers
        lvl = l % N_MAPS
        mem = mem_ref[0, lvl].astype(f32)       # (S, C)  memory for this level
        posk = posk_ref[l]                      # (S, C)  pos @ Wk, hoisted to init
        caw, cab = ca_w_ref[l], ca_b_ref[l]     # (C, 4C) [Wq|Wk|Wv|Wo], (4, C)
        saw, sab = sa_w_ref[l], sa_b_ref[l]
        ng, nb = ng_ref[l], nb_ref[l]           # (3, C)

        # ---- masked cross-attention: q = x+qpos, k = mem+pos, v = mem --------
        qp = jnp.dot(x + qpos, caw[:, 0:c], preferred_element_type=f32) + cab[0:1, :]
        mkv = jnp.dot(mem, caw[:, c:3 * c], preferred_element_type=f32)   # fused K|V
        kp = mkv[:, 0:c] + posk + cab[1:2, :]
        vp = mkv[:, c:2 * c] + cab[2:3, :]
        att = attend(qp, kp, vp, attn_bias)
        att = jnp.dot(att, caw[:, 3 * c:4 * c], preferred_element_type=f32) + cab[3:4, :]
        x = layer_norm(x + att, ng[0:1, :], nb[0:1, :])

        # ---- self-attention: q = k = x+qpos, v = x ----------------------------
        qk = jnp.dot(x + qpos, saw[:, 0:2 * c], preferred_element_type=f32)   # fused Q|K
        qp = qk[:, 0:c] + sab[0:1, :]
        kp = qk[:, c:2 * c] + sab[1:2, :]
        vp = jnp.dot(x, saw[:, 2 * c:3 * c], preferred_element_type=f32) + sab[2:3, :]
        att = attend(qp, kp, vp, None)
        att = jnp.dot(att, saw[:, 3 * c:4 * c], preferred_element_type=f32) + sab[3:4, :]
        x = layer_norm(x + att, ng[1:2, :], nb[1:2, :])

        # ---- MLP with exact-erf GELU ------------------------------------------
        hmid = jnp.dot(x, w1_ref[l], preferred_element_type=f32) + b1_ref[l]
        hmid = _gelu_erf(hmid)
        hmid = jnp.dot(hmid, w2_ref[l], preferred_element_type=f32) + b2_ref[l]
        x = layer_norm(x + hmid, ng[2:3, :], nb[2:3, :])

        # prediction head after this layer (also produces next layer's bias)
        attn_bias = prediction_head(x, l + 1)


def fused_decoder_forward(params, mem_stack, mf_flat):
    b = mem_stack.shape[0]
    s = mem_stack.shape[2]
    hw = mf_flat.shape[-1]
    c = EMBED_DIM
    q_len = N_QUERIES
    n_eval = N_LAYERS + 1

    cls_all, mpred_all = pl.pallas_call(
        _decoder_forward_kernel,
        out_shape=(jax.ShapeDtypeStruct((b, n_eval, q_len, CLS_PAD), jnp.float32),
                   jax.ShapeDtypeStruct((b, n_eval, q_len, hw), jnp.float32)),
        grid=(b,),
        in_specs=[
            pl.BlockSpec((q_len, c), lambda i: (0, 0)),               # query_feat
            pl.BlockSpec((q_len, c), lambda i: (0, 0)),               # query_pos
            pl.BlockSpec((1, N_MAPS, s, c), lambda i: (i, 0, 0, 0)),  # memory (all levels)
            pl.BlockSpec((N_LAYERS, s, c), lambda i: (0, 0, 0)),      # pos @ Wk per layer
            pl.BlockSpec((1, c, hw), lambda i: (i, 0, 0)),            # mask features (C, HW)
            pl.BlockSpec((N_LAYERS, c, 4 * c), lambda i: (0, 0, 0)),  # cross-attn W (packed)
            pl.BlockSpec((N_LAYERS, 4, c), lambda i: (0, 0, 0)),      # cross-attn b
            pl.BlockSpec((N_LAYERS, c, 4 * c), lambda i: (0, 0, 0)),  # self-attn W (packed)
            pl.BlockSpec((N_LAYERS, 4, c), lambda i: (0, 0, 0)),      # self-attn b
            pl.BlockSpec((N_LAYERS, 3, c), lambda i: (0, 0, 0)),      # norm gammas
            pl.BlockSpec((N_LAYERS, 3, c), lambda i: (0, 0, 0)),      # norm betas
            pl.BlockSpec((N_LAYERS, c, HIDDEN), lambda i: (0, 0, 0)), # mlp W1
            pl.BlockSpec((N_LAYERS, 1, HIDDEN), lambda i: (0, 0, 0)), # mlp b1
            pl.BlockSpec((N_LAYERS, HIDDEN, c), lambda i: (0, 0, 0)), # mlp W2
            pl.BlockSpec((N_LAYERS, 1, c), lambda i: (0, 0, 0)),      # mlp b2
            pl.BlockSpec((1, c), lambda i: (0, 0)),                   # decoder_norm gamma
            pl.BlockSpec((1, c), lambda i: (0, 0)),                   # decoder_norm beta
            pl.BlockSpec((c, CLS_PAD), lambda i: (0, 0)),             # class W (128-padded)
            pl.BlockSpec((1, CLS_PAD), lambda i: (0, 0)),             # class b (128-padded)
            pl.BlockSpec((3, c, c), lambda i: (0, 0, 0)),             # mask MLP W
            pl.BlockSpec((3, c), lambda i: (0, 0)),                   # mask MLP b
        ],
        out_specs=(pl.BlockSpec((1, n_eval, q_len, CLS_PAD), lambda i: (i, 0, 0, 0)),
                   pl.BlockSpec((1, n_eval, q_len, hw), lambda i: (i, 0, 0, 0))),
        compiler_params=pltpu.CompilerParams(dimension_semantics=("parallel",)),
    )(params["query_feat"], params["query_pos"], mem_stack, params["pos_k"], mf_flat,
      params["ca_w"], params["ca_b"], params["sa_w"], params["sa_b"],
      params["norm_g"], params["norm_b"],
      params["mlp_w1"], params["mlp_b1"], params["mlp_w2"], params["mlp_b2"],
      params["decoder_norm_g"], params["decoder_norm_b"],
      params["class_w_pad"], params["class_b_pad"],
      params["mask_mlp_w"], params["mask_mlp_b"])
    return cls_all, mpred_all


# ----------------------------- plain-JAX glue ---------------------------------
def transformer_decoder_forward(params, features, mask_features):
    b = features[0].shape[0]
    c = EMBED_DIM

    # NCHW -> (B, HW, C) once, plus level embedding; stacked over levels.
    mems = []
    for i, feat in enumerate(features):
        _, _, hf, wf = feat.shape
        m = feat.reshape(b, c, hf * wf) + params["level_embed"][i][None, :, None]
        mems.append(jnp.transpose(m, (0, 2, 1)))
    mem_stack = jnp.stack(mems, axis=1)                       # (B, L_maps, HW, C)

    hm, wm = mask_features.shape[-2:]
    mf_flat = mask_features.reshape(b, c, hm * wm)            # (B, C, HW)

    # TODO(synk): if a level's (H, W) differed from mask_features', the attention
    # mask would need a bilinear resize of mpred; all maps are 8x8 so it is identity.
    cls_all, mpred_all = fused_decoder_forward(params, mem_stack, mf_flat)

    pred_logits = cls_all[:, -1, :, :N_CLASSES]
    pred_masks = mpred_all[:, -1].reshape(b, N_QUERIES, hm, wm)
    aux_class = [cls_all[:, i, :, :N_CLASSES] for i in range(N_LAYERS)]
    aux_mask = [mpred_all[:, i].reshape(b, N_QUERIES, hm, wm) for i in range(N_LAYERS)]
    return pred_logits, pred_masks, aux_class, aux_mask


# ----------------------------- parameter init --------------------------------
def position_embedding_hwc(h, w, embed_dim, temperature):
    # Sinusoidal embedding returned directly in (HW, C) layout; depends only on
    # shapes + a Python-float temperature, so it is a trace-time constant.
    half = embed_dim // 2
    dim_t = jnp.arange(half, dtype=jnp.float32)
    dim_t = temperature ** (2.0 * jnp.floor(dim_t / 2.0) / half)
    y_embed = jnp.broadcast_to(jnp.arange(h, dtype=jnp.float32)[:, None] / h, (h, w))
    x_embed = jnp.broadcast_to(jnp.arange(w, dtype=jnp.float32)[None, :] / w, (h, w))
    pos_x = x_embed.reshape(-1, 1) / dim_t
    pos_y = y_embed.reshape(-1, 1) / dim_t
    pos_x = jnp.stack([jnp.sin(pos_x[:, 0::2]), jnp.cos(pos_x[:, 1::2])], axis=2).reshape(h * w, -1)
    pos_y = jnp.stack([jnp.sin(pos_y[:, 0::2]), jnp.cos(pos_y[:, 1::2])], axis=2).reshape(h * w, -1)
    return jnp.concatenate([pos_y, pos_x], axis=1)            # (HW, C)


def init_params(key):
    keys = iter(jax.random.split(key, 64))

    def nrm(shape, scale=0.02):
        return (scale * jax.random.normal(next(keys), shape)).astype(jnp.float32)

    c = EMBED_DIM
    pos_hwc = [position_embedding_hwc(FEAT_HW, FEAT_HW, c, 10000.0) for _ in range(N_MAPS)]

    ca_w, ca_b, sa_w, sa_b = [], [], [], []
    norm_g, norm_b = [], []
    w1, b1, w2, b2 = [], [], [], []
    pos_k = []
    for l in range(N_LAYERS):
        ca = [nrm((c, c)) for _ in range(4)]                  # Wq, Wk, Wv, Wo (in, out)
        sa = [nrm((c, c)) for _ in range(4)]
        ca_w.append(jnp.concatenate(ca, axis=1))              # (C, 4C) lane-dense
        sa_w.append(jnp.concatenate(sa, axis=1))
        ca_b.append(jnp.zeros((4, c), jnp.float32))
        sa_b.append(jnp.zeros((4, c), jnp.float32))
        norm_g.append(jnp.ones((3, c), jnp.float32))
        norm_b.append(jnp.zeros((3, c), jnp.float32))
        w1.append(nrm((c, HIDDEN)))
        b1.append(jnp.zeros((1, HIDDEN), jnp.float32))
        w2.append(nrm((HIDDEN, c)))
        b2.append(jnp.zeros((1, c), jnp.float32))
        # Hoisted constant: (pos @ Wk) for this layer's source feature level.
        pos_k.append(jnp.dot(pos_hwc[l % N_MAPS], ca[1]))

    class_w = nrm((c, N_CLASSES))
    params = {
        "query_feat": nrm((N_QUERIES, c), 1.0),               # nn.Embedding ~ N(0,1)
        "query_pos": nrm((N_QUERIES, c), 1.0),
        "level_embed": nrm((N_MAPS, c), 1.0),
        "pos_k": jnp.stack(pos_k),                            # (L, HW, C)
        "ca_w": jnp.stack(ca_w), "ca_b": jnp.stack(ca_b),
        "sa_w": jnp.stack(sa_w), "sa_b": jnp.stack(sa_b),
        "norm_g": jnp.stack(norm_g), "norm_b": jnp.stack(norm_b),
        "mlp_w1": jnp.stack(w1), "mlp_b1": jnp.stack(b1),
        "mlp_w2": jnp.stack(w2), "mlp_b2": jnp.stack(b2),
        "decoder_norm_g": jnp.ones((1, c), jnp.float32),
        "decoder_norm_b": jnp.zeros((1, c), jnp.float32),
        # class head padded to 128 lanes for full-width stores; sliced outside.
        "class_w_pad": jnp.zeros((c, CLS_PAD), jnp.float32).at[:, :N_CLASSES].set(class_w),
        "class_b_pad": jnp.zeros((1, CLS_PAD), jnp.float32),
        "mask_mlp_w": jnp.stack([nrm((c, c)) for _ in range(3)]),   # (3, C, C)
        "mask_mlp_b": jnp.zeros((3, c), jnp.float32),
    }
    return params


# ----------------------------- main -------------------------------------------
if __name__ == "__main__":
    key = jax.random.PRNGKey(0)
    pkey, fkey = jax.random.split(key)
    params = init_params(pkey)
    fkeys = jax.random.split(fkey, N_MAPS + 1)
    features = [jax.random.normal(fkeys[i], (BATCH, EMBED_DIM, FEAT_HW, FEAT_HW), jnp.float32)
                for i in range(N_MAPS)]
    mask_features = jax.random.normal(fkeys[N_MAPS], (BATCH, EMBED_DIM, FEAT_HW, FEAT_HW),
                                      jnp.float32)

    fwd = jax.jit(transformer_decoder_forward)
    pred_logits, pred_masks, aux_class, aux_mask = fwd(params, features, mask_features)
    jax.block_until_ready((pred_logits, pred_masks, aux_class, aux_mask))

    assert pred_logits.shape == (BATCH, N_QUERIES, N_CLASSES)
    assert pred_masks.shape == (BATCH, N_QUERIES, FEAT_HW, FEAT_HW)
    assert len(aux_class) == N_LAYERS and len(aux_mask) == N_LAYERS
    assert all(a.shape == (BATCH, N_QUERIES, N_CLASSES) for a in aux_class)
    assert all(a.shape == (BATCH, N_QUERIES, FEAT_HW, FEAT_HW) for a in aux_mask)
    assert bool(jnp.all(jnp.isfinite(pred_logits))) and bool(jnp.all(jnp.isfinite(pred_masks)))
    print("KERNEL_OK")
</pallas_src>

<mosaic_0001>
module attributes {stable_mosaic.version = 11 : i64} {
  func.func @_decoder_forward_kernel(%arg0: i32, %arg1: memref<8x32xf32, #tpu.memory_space<vmem>>, %arg2: memref<8x32xf32, #tpu.memory_space<vmem>>, %arg3: memref<1x3x64x32xf32, #tpu.memory_space<vmem>>, %arg4: memref<2x64x32xf32, #tpu.memory_space<vmem>>, %arg5: memref<1x32x64xf32, #tpu.memory_space<vmem>>, %arg6: memref<2x32x128xf32, #tpu.memory_space<vmem>>, %arg7: memref<2x4x32xf32, #tpu.memory_space<vmem>>, %arg8: memref<2x32x128xf32, #tpu.memory_space<vmem>>, %arg9: memref<2x4x32xf32, #tpu.memory_space<vmem>>, %arg10: memref<2x3x32xf32, #tpu.memory_space<vmem>>, %arg11: memref<2x3x32xf32, #tpu.memory_space<vmem>>, %arg12: memref<2x32x128xf32, #tpu.memory_space<vmem>>, %arg13: memref<2x1x128xf32, #tpu.memory_space<vmem>>, %arg14: memref<2x128x32xf32, #tpu.memory_space<vmem>>, %arg15: memref<2x1x32xf32, #tpu.memory_space<vmem>>, %arg16: memref<1x32xf32, #tpu.memory_space<vmem>>, %arg17: memref<1x32xf32, #tpu.memory_space<vmem>>, %arg18: memref<32x128xf32, #tpu.memory_space<vmem>>, %arg19: memref<1x128xf32, #tpu.memory_space<vmem>>, %arg20: memref<3x32x32xf32, #tpu.memory_space<vmem>>, %arg21: memref<3x32xf32, #tpu.memory_space<vmem>>, %arg22: memref<1x3x8x128xf32, #tpu.memory_space<vmem>>, %arg23: memref<1x3x8x64xf32, #tpu.memory_space<vmem>>) attributes {dimension_semantics = [#tpu.dimension_semantics<parallel>], iteration_bounds = array<i64: 2>, scalar_prefetch = 0 : i64, scratch_operands = 0 : i64, tpu.core_type = #tpu.core_type<tc>, window_params = [{pipeline_mode = #tpu.pipeline_mode<synchronous>, transform_indices = @transform_0, window_bounds = array<i64: 8, 32>}, {pipeline_mode = #tpu.pipeline_mode<synchronous>, transform_indices = @transform_1, window_bounds = array<i64: 8, 32>}, {transform_indices = @transform_2, window_bounds = array<i64: 1, 3, 64, 32>}, {pipeline_mode = #tpu.pipeline_mode<synchronous>, transform_indices = @transform_3, window_bounds = array<i64: 2, 64, 32>}, {transform_indices = @transform_4, window_bounds = array<i64: 1, 32, 64>}, {pipeline_mode = #tpu.pipeline_mode<synchronous>, transform_indices = @transform_5, window_bounds = array<i64: 2, 32, 128>}, {pipeline_mode = #tpu.pipeline_mode<synchronous>, transform_indices = @transform_6, window_bounds = array<i64: 2, 4, 32>}, {pipeline_mode = #tpu.pipeline_mode<synchronous>, transform_indices = @transform_7, window_bounds = array<i64: 2, 32, 128>}, {pipeline_mode = #tpu.pipeline_mode<synchronous>, transform_indices = @transform_8, window_bounds = array<i64: 2, 4, 32>}, {pipeline_mode = #tpu.pipeline_mode<synchronous>, transform_indices = @transform_9, window_bounds = array<i64: 2, 3, 32>}, {pipeline_mode = #tpu.pipeline_mode<synchronous>, transform_indices = @transform_10, window_bounds = array<i64: 2, 3, 32>}, {pipeline_mode = #tpu.pipeline_mode<synchronous>, transform_indices = @transform_11, window_bounds = array<i64: 2, 32, 128>}, {pipeline_mode = #tpu.pipeline_mode<synchronous>, transform_indices = @transform_12, window_bounds = array<i64: 2, 1, 128>}, {pipeline_mode = #tpu.pipeline_mode<synchronous>, transform_indices = @transform_13, window_bounds = array<i64: 2, 128, 32>}, {pipeline_mode = #tpu.pipeline_mode<synchronous>, transform_indices = @transform_14, window_bounds = array<i64: 2, 1, 32>}, {pipeline_mode = #tpu.pipeline_mode<synchronous>, transform_indices = @transform_15, window_bounds = array<i64: 1, 32>}, {pipeline_mode = #tpu.pipeline_mode<synchronous>, transform_indices = @transform_16, window_bounds = array<i64: 1, 32>}, {pipeline_mode = #tpu.pipeline_mode<synchronous>, transform_indices = @transform_17, window_bounds = array<i64: 32, 128>}, {pipeline_mode = #tpu.pipeline_mode<synchronous>, transform_indices = @transform_18, window_bounds = array<i64: 1, 128>}, {pipeline_mode = #tpu.pipeline_mode<synchronous>, transform_indices = @transform_19, window_bounds = array<i64: 3, 32, 32>}, {pipeline_mode = #tpu.pipeline_mode<synchronous>, transform_indices = @transform_20, window_bounds = array<i64: 3, 32>}, {transform_indices = @transform_21, window_bounds = array<i64: 1, 3, 8, 128>}, {transform_indices = @transform_22, window_bounds = array<i64: 1, 3, 8, 64>}]} {
    %c0 = arith.constant 0 : index
    %c0_0 = arith.constant 0 : index
    %0 = vector.load %arg2[%c0, %c0_0] : memref<8x32xf32, #tpu.memory_space<vmem>>, vector<8x32xf32>
    %c0_1 = arith.constant 0 : index
    %c0_2 = arith.constant 0 : index
    %c0_3 = arith.constant 0 : index
    %1 = vector.load %arg5[%c0_1, %c0_2, %c0_3] : memref<1x32x64xf32, #tpu.memory_space<vmem>>, vector<1x32x64xf32>
    %2 = vector.shape_cast %1 : vector<1x32x64xf32> to vector<32x64xf32>
    %c0_4 = arith.constant 0 : index
    %c0_5 = arith.constant 0 : index
    %3 = vector.load %arg16[%c0_4, %c0_5] : memref<1x32xf32, #tpu.memory_space<vmem>>, vector<1x32xf32>
    %c0_6 = arith.constant 0 : index
    %c0_7 = arith.constant 0 : index
    %4 = vector.load %arg17[%c0_6, %c0_7] : memref<1x32xf32, #tpu.memory_space<vmem>>, vector<1x32xf32>
    %c0_8 = arith.constant 0 : index
    %c0_9 = arith.constant 0 : index
    %5 = vector.load %arg18[%c0_8, %c0_9] : memref<32x128xf32, #tpu.memory_space<vmem>>, vector<32x128xf32>
    %c0_10 = arith.constant 0 : index
    %c0_11 = arith.constant 0 : index
    %6 = vector.load %arg19[%c0_10, %c0_11] : memref<1x128xf32, #tpu.memory_space<vmem>>, vector<1x128xf32>
    %c0_12 = arith.constant 0 : index
    %c0_13 = arith.constant 0 : index
    %c0_14 = arith.constant 0 : index
    %7 = vector.load %arg20[%c0_12, %c0_13, %c0_14] : memref<3x32x32xf32, #tpu.memory_space<vmem>>, vector<3x32x32xf32>
    %c0_15 = arith.constant 0 : index
    %c0_16 = arith.constant 0 : index
    %8 = vector.load %arg21[%c0_15, %c0_16] : memref<3x32xf32, #tpu.memory_space<vmem>>, vector<3x32xf32>
    %c0_17 = arith.constant 0 : index
    %c0_18 = arith.constant 0 : index
    %9 = vector.load %arg1[%c0_17, %c0_18] : memref<8x32xf32, #tpu.memory_space<vmem>>, vector<8x32xf32>
    %cst = arith.constant dense<0.000000e+00> : vector<8xf32>
    %10 = vector.multi_reduction <add>, %9, %cst [1] : vector<8x32xf32> to vector<8xf32>
    %11 = vector.shape_cast %10 : vector<8xf32> to vector<8x1xf32>
    %cst_19 = arith.constant 3.200000e+01 : f32
    %12 = vector.broadcast %cst_19 : f32 to vector<8x1xf32>
    %13 = arith.divf %11, %12 : vector<8x1xf32>
    %14 = vector.broadcast %13 : vector<8x1xf32> to vector<8x32xf32>
    %15 = arith.subf %9, %14 : vector<8x32xf32>
    %16 = arith.mulf %15, %15 : vector<8x32xf32>
    %cst_20 = arith.constant dense<0.000000e+00> : vector<8xf32>
    %17 = vector.multi_reduction <add>, %16, %cst_20 [1] : vector<8x32xf32> to vector<8xf32>
    %18 = vector.shape_cast %17 : vector<8xf32> to vector<8x1xf32>
    %cst_21 = arith.constant 3.200000e+01 : f32
    %19 = vector.broadcast %cst_21 : f32 to vector<8x1xf32>
    %20 = arith.divf %18, %19 : vector<8x1xf32>
    %21 = vector.broadcast %13 : vector<8x1xf32> to vector<8x32xf32>
    %22 = arith.subf %9, %21 : vector<8x32xf32>
    %cst_22 = arith.constant 9.99999974E-6 : f32
    %23 = vector.broadcast %cst_22 : f32 to vector<8x1xf32>
    %24 = arith.addf %20, %23 : vector<8x1xf32>
    %25 = math.rsqrt %24 : vector<8x1xf32>
    %26 = vector.broadcast %25 : vector<8x1xf32> to vector<8x32xf32>
    %27 = arith.mulf %22, %26 : vector<8x32xf32>
    %28 = vector.broadcast %3 : vector<1x32xf32> to vector<8x32xf32>
    %29 = arith.mulf %27, %28 : vector<8x32xf32>
    %30 = vector.broadcast %4 : vector<1x32xf32> to vector<8x32xf32>
    %31 = arith.addf %29, %30 : vector<8x32xf32>
    %cst_23 = arith.constant dense<0.000000e+00> : vector<8x128xf32>
    %32 = tpu.matmul %31, %5, %cst_23 {dimension_numbers = #tpu.dot_dimension_numbers<[1], [0], [0], [1], [0, 0, 1, 1], [], []>} : vector<8x32xf32>, vector<32x128xf32>, vector<8x128xf32> -> vector<8x128xf32>
    %33 = vector.broadcast %6 : vector<1x128xf32> to vector<8x128xf32>
    %34 = arith.addf %32, %33 : vector<8x128xf32>
    %c0_24 = arith.constant 0 : index
    %c0_25 = arith.constant 0 : index
    %c0_26 = arith.constant 0 : index
    %c0_27 = arith.constant 0 : index
    %35 = vector.load %arg22[%c0_24, %c0_25, %c0_26, %c0_27] : memref<1x3x8x128xf32, #tpu.memory_space<vmem>>, vector<1x1x8x128xf32>
    %36 = vector.shape_cast %35 : vector<1x1x8x128xf32> to vector<8x128xf32>
    %37 = vector.shape_cast %34 : vector<8x128xf32> to vector<1x1x8x128xf32>
    tpu.vector_store %arg22[%c0_24, %c0_25, %c0_26, %c0_27], %37 {strides = array<i32>} : memref<1x3x8x128xf32, #tpu.memory_space<vmem>>, vector<1x1x8x128xf32>,
    %38 = vector.extract_strided_slice %7 {offsets = [0, 0, 0], sizes = [1, 32, 32], strides = [1, 1, 1]} : vector<3x32x32xf32> to vector<1x32x32xf32>
    %39 = vector.shape_cast %38 : vector<1x32x32xf32> to vector<32x32xf32>
    %cst_28 = arith.constant dense<0.000000e+00> : vector<8x32xf32>
    %40 = tpu.matmul %31, %39, %cst_28 {dimension_numbers = #tpu.dot_dimension_numbers<[1], [0], [0], [1], [0, 0, 1, 1], [], []>} : vector<8x32xf32>, vector<32x32xf32>, vector<8x32xf32> -> vector<8x32xf32>
    %41 = vector.extract_strided_slice %8 {offsets = [0, 0], sizes = [1, 32], strides = [1, 1]} : vector<3x32xf32> to vector<1x32xf32>
    %42 = vector.broadcast %41 : vector<1x32xf32> to vector<8x32xf32>
    %43 = arith.addf %40, %42 : vector<8x32xf32>
    %cst_29 = arith.constant 0.000000e+00 : f32
    %44 = vector.broadcast %cst_29 : f32 to vector<8x32xf32>
    %45 = arith.maximumf %43, %44 : vector<8x32xf32>
    %46 = vector.extract_strided_slice %7 {offsets = [1, 0, 0], sizes = [1, 32, 32], strides = [1, 1, 1]} : vector<3x32x32xf32> to vector<1x32x32xf32>
    %47 = vector.shape_cast %46 : vector<1x32x32xf32> to vector<32x32xf32>
    %cst_30 = arith.constant dense<0.000000e+00> : vector<8x32xf32>
    %48 = tpu.matmul %45, %47, %cst_30 {dimension_numbers = #tpu.dot_dimension_numbers<[1], [0], [0], [1], [0, 0, 1, 1], [], []>} : vector<8x32xf32>, vector<32x32xf32>, vector<8x32xf32> -> vector<8x32xf32>
    %49 = vector.extract_strided_slice %8 {offsets = [1, 0], sizes = [1, 32], strides = [1, 1]} : vector<3x32xf32> to vector<1x32xf32>
    %50 = vector.broadcast %49 : vector<1x32xf32> to vector<8x32xf32>
    %51 = arith.addf %48, %50 : vector<8x32xf32>
    %cst_31 = arith.constant 0.000000e+00 : f32
    %52 = vector.broadcast %cst_31 : f32 to vector<8x32xf32>
    %53 = arith.maximumf %51, %52 : vector<8x32xf32>
    %54 = vector.extract_strided_slice %7 {offsets = [2, 0, 0], sizes = [1, 32, 32], strides = [1, 1, 1]} : vector<3x32x32xf32> to vector<1x32x32xf32>
    %55 = vector.shape_cast %54 : vector<1x32x32xf32> to vector<32x32xf32>
    %cst_32 = arith.constant dense<0.000000e+00> : vector<8x32xf32>
    %56 = tpu.matmul %53, %55, %cst_32 {dimension_numbers = #tpu.dot_dimension_numbers<[1], [0], [0], [1], [0, 0, 1, 1], [], []>} : vector<8x32xf32>, vector<32x32xf32>, vector<8x32xf32> -> vector<8x32xf32>
    %57 = vector.extract_strided_slice %8 {offsets = [2, 0], sizes = [1, 32], strides = [1, 1]} : vector<3x32xf32> to vector<1x32xf32>
    %58 = vector.broadcast %57 : vector<1x32xf32> to vector<8x32xf32>
    %59 = arith.addf %56, %58 : vector<8x32xf32>
    %cst_33 = arith.constant dense<0.000000e+00> : vector<8x64xf32>
    %60 = tpu.matmul %59, %2, %cst_33 {dimension_numbers = #tpu.dot_dimension_numbers<[1], [0], [0], [1], [0, 0, 1, 1], [], []>} : vector<8x32xf32>, vector<32x64xf32>, vector<8x64xf32> -> vector<8x64xf32>
    %c0_34 = arith.constant 0 : index
    %c0_35 = arith.constant 0 : index
    %c0_36 = arith.constant 0 : index
    %c0_37 = arith.constant 0 : index
    %61 = vector.load %arg23[%c0_34, %c0_35, %c0_36, %c0_37] : memref<1x3x8x64xf32, #tpu.memory_space<vmem>>, vector<1x1x8x64xf32>
    %62 = vector.shape_cast %61 : vector<1x1x8x64xf32> to vector<8x64xf32>
    %63 = vector.shape_cast %60 : vector<8x64xf32> to vector<1x1x8x64xf32>
    tpu.vector_store %arg23[%c0_34, %c0_35, %c0_36, %c0_37], %63 {strides = array<i32>} : memref<1x3x8x64xf32, #tpu.memory_space<vmem>>, vector<1x1x8x64xf32>,
    %cst_38 = arith.constant dense<0xFF800000> : vector<8xf32>
    %64 = vector.multi_reduction <maximumf>, %60, %cst_38 [1] : vector<8x64xf32> to vector<8xf32>
    %65 = vector.shape_cast %64 : vector<8xf32> to vector<8x1xf32>
    %cst_39 = arith.constant 0.000000e+00 : f32
    %66 = vector.broadcast %cst_39 : f32 to vector<8x1xf32>
    %67 = arith.cmpf oge, %65, %66 : vector<8x1xf32>
    %cst_40 = arith.constant 0.000000e+00 : f32
    %68 = vector.broadcast %cst_40 : f32 to vector<8x64xf32>
    %69 = arith.cmpf olt, %60, %68 : vector<8x64xf32>
    %70 = vector.broadcast %67 : vector<8x1xi1> to vector<8x64xi1>
    %71 = arith.andi %69, %70 : vector<8x64xi1>
    %cst_41 = arith.constant -1.000000e+30 : f32
    %cst_42 = arith.constant 0.000000e+00 : f32
    %72 = vector.broadcast %cst_41 : f32 to vector<8x64xf32>
    %73 = vector.broadcast %cst_42 : f32 to vector<8x64xf32>
    %74 = arith.select %71, %72, %73 : vector<8x64xi1>, vector<8x64xf32>
    %c0_43 = arith.constant 0 : index
    %c0_44 = arith.constant 0 : index
    %c0_45 = arith.constant 0 : index
    %c0_46 = arith.constant 0 : index
    %75 = vector.load %arg3[%c0_43, %c0_44, %c0_45, %c0_46] : memref<1x3x64x32xf32, #tpu.memory_space<vmem>>, vector<1x1x64x32xf32>
    %76 = vector.shape_cast %75 : vector<1x1x64x32xf32> to vector<64x32xf32>
    %c0_47 = arith.constant 0 : index
    %c0_48 = arith.constant 0 : index
    %c0_49 = arith.constant 0 : index
    %77 = vector.load %arg4[%c0_47, %c0_48, %c0_49] : memref<2x64x32xf32, #tpu.memory_space<vmem>>, vector<1x64x32xf32>
    %78 = vector.shape_cast %77 : vector<1x64x32xf32> to vector<64x32xf32>
    %c0_50 = arith.constant 0 : index
    %c0_51 = arith.constant 0 : index
    %c0_52 = arith.constant 0 : index
    %79 = vector.load %arg6[%c0_50, %c0_51, %c0_52] : memref<2x32x128xf32, #tpu.memory_space<vmem>>, vector<1x32x128xf32>
    %80 = vector.shape_cast %79 : vector<1x32x128xf32> to vector<32x128xf32>
    %c0_53 = arith.constant 0 : index
    %c0_54 = arith.constant 0 : index
    %c0_55 = arith.constant 0 : index
    %81 = vector.load %arg7[%c0_53, %c0_54, %c0_55] : memref<2x4x32xf32, #tpu.memory_space<vmem>>, vector<1x4x32xf32>
    %82 = vector.shape_cast %81 : vector<1x4x32xf32> to vector<4x32xf32>
    %c0_56 = arith.constant 0 : index
    %c0_57 = arith.constant 0 : index
    %c0_58 = arith.constant 0 : index
    %83 = vector.load %arg8[%c0_56, %c0_57, %c0_58] : memref<2x32x128xf32, #tpu.memory_space<vmem>>, vector<1x32x128xf32>
    %84 = vector.shape_cast %83 : vector<1x32x128xf32> to vector<32x128xf32>
    %c0_59 = arith.constant 0 : index
    %c0_60 = arith.constant 0 : index
    %c0_61 = arith.constant 0 : index
    %85 = vector.load %arg9[%c0_59, %c0_60, %c0_61] : memref<2x4x32xf32, #tpu.memory_space<vmem>>, vector<1x4x32xf32>
    %86 = vector.shape_cast %85 : vector<1x4x32xf32> to vector<4x32xf32>
    %c0_62 = arith.constant 0 : index
    %c0_63 = arith.constant 0 : index
    %c0_64 = arith.constant 0 : index
    %87 = vector.load %arg10[%c0_62, %c0_63, %c0_64] : memref<2x3x32xf32, #tpu.memory_space<vmem>>, vector<1x3x32xf32>
    %88 = vector.shape_cast %87 : vector<1x3x32xf32> to vector<3x32xf32>
    %c0_65 = arith.constant 0 : index
    %c0_66 = arith.constant 0 : index
    %c0_67 = arith.constant 0 : index
    %89 = vector.load %arg11[%c0_65, %c0_66, %c0_67] : memref<2x3x32xf32, #tpu.memory_space<vmem>>, vector<1x3x32xf32>
    %90 = vector.shape_cast %89 : vector<1x3x32xf32> to vector<3x32xf32>
    %91 = arith.addf %9, %0 : vector<8x32xf32>
    %92 = vector.extract_strided_slice %80 {offsets = [0, 0], sizes = [32, 32], strides = [1, 1]} : vector<32x128xf32> to vector<32x32xf32>
    %cst_68 = arith.constant dense<0.000000e+00> : vector<8x32xf32>
    %93 = tpu.matmul %91, %92, %cst_68 {dimension_numbers = #tpu.dot_dimension_numbers<[1], [0], [0], [1], [0, 0, 1, 1], [], []>} : vector<8x32xf32>, vector<32x32xf32>, vector<8x32xf32> -> vector<8x32xf32>
    %94 = vector.extract_strided_slice %82 {offsets = [0, 0], sizes = [1, 32], strides = [1, 1]} : vector<4x32xf32> to vector<1x32xf32>
    %95 = vector.broadcast %94 : vector<1x32xf32> to vector<8x32xf32>
    %96 = arith.addf %93, %95 : vector<8x32xf32>
    %97 = vector.extract_strided_slice %80 {offsets = [0, 32], sizes = [32, 64], strides = [1, 1]} : vector<32x128xf32> to vector<32x64xf32>
    %cst_69 = arith.constant dense<0.000000e+00> : vector<64x64xf32>
    %98 = tpu.matmul %76, %97, %cst_69 {dimension_numbers = #tpu.dot_dimension_numbers<[1], [0], [0], [1], [0, 0, 1, 1], [], []>} : vector<64x32xf32>, vector<32x64xf32>, vector<64x64xf32> -> vector<64x64xf32>
    %99 = vector.extract_strided_slice %98 {offsets = [0, 0], sizes = [64, 32], strides = [1, 1]} : vector<64x64xf32> to vector<64x32xf32>
    %100 = arith.addf %99, %78 : vector<64x32xf32>
    %101 = vector.extract_strided_slice %82 {offsets = [1, 0], sizes = [1, 32], strides = [1, 1]} : vector<4x32xf32> to vector<1x32xf32>
    %102 = vector.broadcast %101 : vector<1x32xf32> to vector<64x32xf32>
    %103 = arith.addf %100, %102 : vector<64x32xf32>
    %104 = vector.extract_strided_slice %98 {offsets = [0, 32], sizes = [64, 32], strides = [1, 1]} : vector<64x64xf32> to vector<64x32xf32>
    %105 = vector.extract_strided_slice %82 {offsets = [2, 0], sizes = [1, 32], strides = [1, 1]} : vector<4x32xf32> to vector<1x32xf32>
    %106 = vector.broadcast %105 : vector<1x32xf32> to vector<64x32xf32>
    %107 = arith.addf %104, %106 : vector<64x32xf32>
    %108 = vector.extract_strided_slice %96 {offsets = [0, 0], sizes = [8, 8], strides = [1, 1]} : vector<8x32xf32> to vector<8x8xf32>
    %cst_70 = arith.constant 0.353553385 : f32
    %109 = vector.broadcast %cst_70 : f32 to vector<8x8xf32>
    %110 = arith.mulf %108, %109 : vector<8x8xf32>
    %111 = vector.extract_strided_slice %103 {offsets = [0, 0], sizes = [64, 8], strides = [1, 1]} : vector<64x32xf32> to vector<64x8xf32>
    %cst_71 = arith.constant dense<0.000000e+00> : vector<8x64xf32>
    %112 = tpu.matmul %110, %111, %cst_71 {dimension_numbers = #tpu.dot_dimension_numbers<[1], [1], [0], [0], [0, 0, 1, 0], [], []>} : vector<8x8xf32>, vector<64x8xf32>, vector<8x64xf32> -> vector<8x64xf32>
    %113 = arith.addf %112, %74 : vector<8x64xf32>
    %cst_72 = arith.constant dense<0xFF800000> : vector<8xf32>
    %114 = vector.multi_reduction <maximumf>, %113, %cst_72 [1] : vector<8x64xf32> to vector<8xf32>
    %115 = vector.shape_cast %114 : vector<8xf32> to vector<8x1xf32>
    %116 = vector.broadcast %115 : vector<8x1xf32> to vector<8x64xf32>
    %117 = arith.subf %113, %116 : vector<8x64xf32>
    %118 = math.exp %117 : vector<8x64xf32>
    %cst_73 = arith.constant dense<0.000000e+00> : vector<8xf32>
    %119 = vector.multi_reduction <add>, %118, %cst_73 [1] : vector<8x64xf32> to vector<8xf32>
    %120 = vector.shape_cast %119 : vector<8xf32> to vector<8x1xf32>
    %121 = tpu.reciprocal %120 {approx = true} : vector<8x1xf32> -> vector<8x1xf32>
    %122 = vector.broadcast %121 : vector<8x1xf32> to vector<8x64xf32>
    %123 = arith.mulf %118, %122 : vector<8x64xf32>
    %124 = vector.extract_strided_slice %107 {offsets = [0, 0], sizes = [64, 8], strides = [1, 1]} : vector<64x32xf32> to vector<64x8xf32>
    %cst_74 = arith.constant dense<0.000000e+00> : vector<8x8xf32>
    %125 = tpu.matmul %123, %124, %cst_74 {dimension_numbers = #tpu.dot_dimension_numbers<[1], [0], [0], [1], [0, 0, 1, 1], [], []>} : vector<8x64xf32>, vector<64x8xf32>, vector<8x8xf32> -> vector<8x8xf32>
    %126 = vector.extract_strided_slice %96 {offsets = [0, 8], sizes = [8, 8], strides = [1, 1]} : vector<8x32xf32> to vector<8x8xf32>
    %cst_75 = arith.constant 0.353553385 : f32
    %127 = vector.broadcast %cst_75 : f32 to vector<8x8xf32>
    %128 = arith.mulf %126, %127 : vector<8x8xf32>
    %129 = vector.extract_strided_slice %103 {offsets = [0, 8], sizes = [64, 8], strides = [1, 1]} : vector<64x32xf32> to vector<64x8xf32>
    %cst_76 = arith.constant dense<0.000000e+00> : vector<8x64xf32>
    %130 = tpu.matmul %128, %129, %cst_76 {dimension_numbers = #tpu.dot_dimension_numbers<[1], [1], [0], [0], [0, 0, 1, 0], [], []>} : vector<8x8xf32>, vector<64x8xf32>, vector<8x64xf32> -> vector<8x64xf32>
    %131 = arith.addf %130, %74 : vector<8x64xf32>
    %cst_77 = arith.constant dense<0xFF800000> : vector<8xf32>
    %132 = vector.multi_reduction <maximumf>, %131, %cst_77 [1] : vector<8x64xf32> to vector<8xf32>
    %133 = vector.shape_cast %132 : vector<8xf32> to vector<8x1xf32>
    %134 = vector.broadcast %133 : vector<8x1xf32> to vector<8x64xf32>
    %135 = arith.subf %131, %134 : vector<8x64xf32>
    %136 = math.exp %135 : vector<8x64xf32>
    %cst_78 = arith.constant dense<0.000000e+00> : vector<8xf32>
    %137 = vector.multi_reduction <add>, %136, %cst_78 [1] : vector<8x64xf32> to vector<8xf32>
    %138 = vector.shape_cast %137 : vector<8xf32> to vector<8x1xf32>
    %139 = tpu.reciprocal %138 {approx = true} : vector<8x1xf32> -> vector<8x1xf32>
    %140 = vector.broadcast %139 : vector<8x1xf32> to vector<8x64xf32>
    %141 = arith.mulf %136, %140 : vector<8x64xf32>
    %142 = vector.extract_strided_slice %107 {offsets = [0, 8], sizes = [64, 8], strides = [1, 1]} : vector<64x32xf32> to vector<64x8xf32>
    %cst_79 = arith.constant dense<0.000000e+00> : vector<8x8xf32>
    %143 = tpu.matmul %141, %142, %cst_79 {dimension_numbers = #tpu.dot_dimension_numbers<[1], [0], [0], [1], [0, 0, 1, 1], [], []>} : vector<8x64xf32>, vector<64x8xf32>, vector<8x8xf32> -> vector<8x8xf32>
    %144 = vector.extract_strided_slice %96 {offsets = [0, 16], sizes = [8, 8], strides = [1, 1]} : vector<8x32xf32> to vector<8x8xf32>
    %cst_80 = arith.constant 0.353553385 : f32
    %145 = vector.broadcast %cst_80 : f32 to vector<8x8xf32>
    %146 = arith.mulf %144, %145 : vector<8x8xf32>
    %147 = vector.extract_strided_slice %103 {offsets = [0, 16], sizes = [64, 8], strides = [1, 1]} : vector<64x32xf32> to vector<64x8xf32>
    %cst_81 = arith.constant dense<0.000000e+00> : vector<8x64xf32>
    %148 = tpu.matmul %146, %147, %cst_81 {dimension_numbers = #tpu.dot_dimension_numbers<[1], [1], [0], [0], [0, 0, 1, 0], [], []>} : vector<8x8xf32>, vector<64x8xf32>, vector<8x64xf32> -> vector<8x64xf32>
    %149 = arith.addf %148, %74 : vector<8x64xf32>
    %cst_82 = arith.constant dense<0xFF800000> : vector<8xf32>
    %150 = vector.multi_reduction <maximumf>, %149, %cst_82 [1] : vector<8x64xf32> to vector<8xf32>
    %151 = vector.shape_cast %150 : vector<8xf32> to vector<8x1xf32>
    %152 = vector.broadcast %151 : vector<8x1xf32> to vector<8x64xf32>
    %153 = arith.subf %149, %152 : vector<8x64xf32>
    %154 = math.exp %153 : vector<8x64xf32>
    %cst_83 = arith.constant dense<0.000000e+00> : vector<8xf32>
    %155 = vector.multi_reduction <add>, %154, %cst_83 [1] : vector<8x64xf32> to vector<8xf32>
    %156 = vector.shape_cast %155 : vector<8xf32> to vector<8x1xf32>
    %157 = tpu.reciprocal %156 {approx = true} : vector<8x1xf32> -> vector<8x1xf32>
    %158 = vector.broadcast %157 : vector<8x1xf32> to vector<8x64xf32>
    %159 = arith.mulf %154, %158 : vector<8x64xf32>
    %160 = vector.extract_strided_slice %107 {offsets = [0, 16], sizes = [64, 8], strides = [1, 1]} : vector<64x32xf32> to vector<64x8xf32>
    %cst_84 = arith.constant dense<0.000000e+00> : vector<8x8xf32>
    %161 = tpu.matmul %159, %160, %cst_84 {dimension_numbers = #tpu.dot_dimension_numbers<[1], [0], [0], [1], [0, 0, 1, 1], [], []>} : vector<8x64xf32>, vector<64x8xf32>, vector<8x8xf32> -> vector<8x8xf32>
    %162 = vector.extract_strided_slice %96 {offsets = [0, 24], sizes = [8, 8], strides = [1, 1]} : vector<8x32xf32> to vector<8x8xf32>
    %cst_85 = arith.constant 0.353553385 : f32
    %163 = vector.broadcast %cst_85 : f32 to vector<8x8xf32>
    %164 = arith.mulf %162, %163 : vector<8x8xf32>
    %165 = vector.extract_strided_slice %103 {offsets = [0, 24], sizes = [64, 8], strides = [1, 1]} : vector<64x32xf32> to vector<64x8xf32>
    %cst_86 = arith.constant dense<0.000000e+00> : vector<8x64xf32>
    %166 = tpu.matmul %164, %165, %cst_86 {dimension_numbers = #tpu.dot_dimension_numbers<[1], [1], [0], [0], [0, 0, 1, 0], [], []>} : vector<8x8xf32>, vector<64x8xf32>, vector<8x64xf32> -> vector<8x64xf32>
    %167 = arith.addf %166, %74 : vector<8x64xf32>
    %cst_87 = arith.constant dense<0xFF800000> : vector<8xf32>
    %168 = vector.multi_reduction <maximumf>, %167, %cst_87 [1] : vector<8x64xf32> to vector<8xf32>
    %169 = vector.shape_cast %168 : vector<8xf32> to vector<8x1xf32>
    %170 = vector.broadcast %169 : vector<8x1xf32> to vector<8x64xf32>
    %171 = arith.subf %167, %170 : vector<8x64xf32>
    %172 = math.exp %171 : vector<8x64xf32>
    %cst_88 = arith.constant dense<0.000000e+00> : vector<8xf32>
    %173 = vector.multi_reduction <add>, %172, %cst_88 [1] : vector<8x64xf32> to vector<8xf32>
    %174 = vector.shape_cast %173 : vector<8xf32> to vector<8x1xf32>
    %175 = tpu.reciprocal %174 {approx = true} : vector<8x1xf32> -> vector<8x1xf32>
    %176 = vector.broadcast %175 : vector<8x1xf32> to vector<8x64xf32>
    %177 = arith.mulf %172, %176 : vector<8x64xf32>
    %178 = vector.extract_strided_slice %107 {offsets = [0, 24], sizes = [64, 8], strides = [1, 1]} : vector<64x32xf32> to vector<64x8xf32>
    %cst_89 = arith.constant dense<0.000000e+00> : vector<8x8xf32>
    %179 = tpu.matmul %177, %178, %cst_89 {dimension_numbers = #tpu.dot_dimension_numbers<[1], [0], [0], [1], [0, 0, 1, 1], [], []>} : vector<8x64xf32>, vector<64x8xf32>, vector<8x8xf32> -> vector<8x8xf32>
    %180 = tpu.concatenate %125, %143, %161, %179 in 1 : vector<8x8xf32>, vector<8x8xf32>, vector<8x8xf32>, vector<8x8xf32> -> vector<8x32xf32>
    %181 = vector.extract_strided_slice %80 {offsets = [0, 96], sizes = [32, 32], strides = [1, 1]} : vector<32x128xf32> to vector<32x32xf32>
    %cst_90 = arith.constant dense<0.000000e+00> : vector<8x32xf32>
    %182 = tpu.matmul %180, %181, %cst_90 {dimension_numbers = #tpu.dot_dimension_numbers<[1], [0], [0], [1], [0, 0, 1, 1], [], []>} : vector<8x32xf32>, vector<32x32xf32>, vector<8x32xf32> -> vector<8x32xf32>
    %183 = vector.extract_strided_slice %82 {offsets = [3, 0], sizes = [1, 32], strides = [1, 1]} : vector<4x32xf32> to vector<1x32xf32>
    %184 = vector.broadcast %183 : vector<1x32xf32> to vector<8x32xf32>
    %185 = arith.addf %182, %184 : vector<8x32xf32>
    %186 = arith.addf %9, %185 : vector<8x32xf32>
    %187 = vector.extract_strided_slice %88 {offsets = [0, 0], sizes = [1, 32], strides = [1, 1]} : vector<3x32xf32> to vector<1x32xf32>
    %188 = vector.extract_strided_slice %90 {offsets = [0, 0], sizes = [1, 32], strides = [1, 1]} : vector<3x32xf32> to vector<1x32xf32>
    %cst_91 = arith.constant dense<0.000000e+00> : vector<8xf32>
    %189 = vector.multi_reduction <add>, %186, %cst_91 [1] : vector<8x32xf32> to vector<8xf32>
    %190 = vector.shape_cast %189 : vector<8xf32> to vector<8x1xf32>
    %cst_92 = arith.constant 3.200000e+01 : f32
    %191 = vector.broadcast %cst_92 : f32 to vector<8x1xf32>
    %192 = arith.divf %190, %191 : vector<8x1xf32>
    %193 = vector.broadcast %192 : vector<8x1xf32> to vector<8x32xf32>
    %194 = arith.subf %186, %193 : vector<8x32xf32>
    %195 = arith.mulf %194, %194 : vector<8x32xf32>
    %cst_93 = arith.constant dense<0.000000e+00> : vector<8xf32>
    %196 = vector.multi_reduction <add>, %195, %cst_93 [1] : vector<8x32xf32> to vector<8xf32>
    %197 = vector.shape_cast %196 : vector<8xf32> to vector<8x1xf32>
    %cst_94 = arith.constant 3.200000e+01 : f32
    %198 = vector.broadcast %cst_94 : f32 to vector<8x1xf32>
    %199 = arith.divf %197, %198 : vector<8x1xf32>
    %200 = vector.broadcast %192 : vector<8x1xf32> to vector<8x32xf32>
    %201 = arith.subf %186, %200 : vector<8x32xf32>
    %cst_95 = arith.constant 9.99999974E-6 : f32
    %202 = vector.broadcast %cst_95 : f32 to vector<8x1xf32>
    %203 = arith.addf %199, %202 : vector<8x1xf32>
    %204 = math.rsqrt %203 : vector<8x1xf32>
    %205 = vector.broadcast %204 : vector<8x1xf32> to vector<8x32xf32>
    %206 = arith.mulf %201, %205 : vector<8x32xf32>
    %207 = vector.broadcast %187 : vector<1x32xf32> to vector<8x32xf32>
    %208 = arith.mulf %206, %207 : vector<8x32xf32>
    %209 = vector.broadcast %188 : vector<1x32xf32> to vector<8x32xf32>
    %210 = arith.addf %208, %209 : vector<8x32xf32>
    %211 = arith.addf %210, %0 : vector<8x32xf32>
    %212 = vector.extract_strided_slice %84 {offsets = [0, 0], sizes = [32, 64], strides = [1, 1]} : vector<32x128xf32> to vector<32x64xf32>
    %cst_96 = arith.constant dense<0.000000e+00> : vector<8x64xf32>
    %213 = tpu.matmul %211, %212, %cst_96 {dimension_numbers = #tpu.dot_dimension_numbers<[1], [0], [0], [1], [0, 0, 1, 1], [], []>} : vector<8x32xf32>, vector<32x64xf32>, vector<8x64xf32> -> vector<8x64xf32>
    %214 = vector.extract_strided_slice %213 {offsets = [0, 0], sizes = [8, 32], strides = [1, 1]} : vector<8x64xf32> to vector<8x32xf32>
    %215 = vector.extract_strided_slice %86 {offsets = [0, 0], sizes = [1, 32], strides = [1, 1]} : vector<4x32xf32> to vector<1x32xf32>
    %216 = vector.broadcast %215 : vector<1x32xf32> to vector<8x32xf32>
    %217 = arith.addf %214, %216 : vector<8x32xf32>
    %218 = vector.extract_strided_slice %213 {offsets = [0, 32], sizes = [8, 32], strides = [1, 1]} : vector<8x64xf32> to vector<8x32xf32>
    %219 = vector.extract_strided_slice %86 {offsets = [1, 0], sizes = [1, 32], strides = [1, 1]} : vector<4x32xf32> to vector<1x32xf32>
    %220 = vector.broadcast %219 : vector<1x32xf32> to vector<8x32xf32>
    %221 = arith.addf %218, %220 : vector<8x32xf32>
    %222 = vector.extract_strided_slice %84 {offsets = [0, 64], sizes = [32, 32], strides = [1, 1]} : vector<32x128xf32> to vector<32x32xf32>
    %cst_97 = arith.constant dense<0.000000e+00> : vector<8x32xf32>
    %223 = tpu.matmul %210, %222, %cst_97 {dimension_numbers = #tpu.dot_dimension_numbers<[1], [0], [0], [1], [0, 0, 1, 1], [], []>} : vector<8x32xf32>, vector<32x32xf32>, vector<8x32xf32> -> vector<8x32xf32>
    %224 = vector.extract_strided_slice %86 {offsets = [2, 0], sizes = [1, 32], strides = [1, 1]} : vector<4x32xf32> to vector<1x32xf32>
    %225 = vector.broadcast %224 : vector<1x32xf32> to vector<8x32xf32>
    %226 = arith.addf %223, %225 : vector<8x32xf32>
    %227 = vector.extract_strided_slice %217 {offsets = [0, 0], sizes = [8, 8], strides = [1, 1]} : vector<8x32xf32> to vector<8x8xf32>
    %cst_98 = arith.constant 0.353553385 : f32
    %228 = vector.broadcast %cst_98 : f32 to vector<8x8xf32>
    %229 = arith.mulf %227, %228 : vector<8x8xf32>
    %230 = vector.extract_strided_slice %221 {offsets = [0, 0], sizes = [8, 8], strides = [1, 1]} : vector<8x32xf32> to vector<8x8xf32>
    %cst_99 = arith.constant dense<0.000000e+00> : vector<8x8xf32>
    %231 = tpu.matmul %229, %230, %cst_99 {dimension_numbers = #tpu.dot_dimension_numbers<[1], [1], [0], [0], [0, 0, 1, 0], [], []>} : vector<8x8xf32>, vector<8x8xf32>, vector<8x8xf32> -> vector<8x8xf32>
    %cst_100 = arith.constant dense<0xFF800000> : vector<8xf32>
    %232 = vector.multi_reduction <maximumf>, %231, %cst_100 [1] : vector<8x8xf32> to vector<8xf32>
    %233 = vector.shape_cast %232 : vector<8xf32> to vector<8x1xf32>
    %234 = vector.broadcast %233 : vector<8x1xf32> to vector<8x8xf32>
    %235 = arith.subf %231, %234 : vector<8x8xf32>
    %236 = math.exp %235 : vector<8x8xf32>
    %cst_101 = arith.constant dense<0.000000e+00> : vector<8xf32>
    %237 = vector.multi_reduction <add>, %236, %cst_101 [1] : vector<8x8xf32> to vector<8xf32>
    %238 = vector.shape_cast %237 : vector<8xf32> to vector<8x1xf32>
    %239 = tpu.reciprocal %238 {approx = true} : vector<8x1xf32> -> vector<8x1xf32>
    %240 = vector.broadcast %239 : vector<8x1xf32> to vector<8x8xf32>
    %241 = arith.mulf %236, %240 : vector<8x8xf32>
    %242 = vector.extract_strided_slice %226 {offsets = [0, 0], sizes = [8, 8], strides = [1, 1]} : vector<8x32xf32> to vector<8x8xf32>
    %cst_102 = arith.constant dense<0.000000e+00> : vector<8x8xf32>
    %243 = tpu.matmul %241, %242, %cst_102 {dimension_numbers = #tpu.dot_dimension_numbers<[1], [0], [0], [1], [0, 0, 1, 1], [], []>} : vector<8x8xf32>, vector<8x8xf32>, vector<8x8xf32> -> vector<8x8xf32>
    %244 = vector.extract_strided_slice %217 {offsets = [0, 8], sizes = [8, 8], strides = [1, 1]} : vector<8x32xf32> to vector<8x8xf32>
    %cst_103 = arith.constant 0.353553385 : f32
    %245 = vector.broadcast %cst_103 : f32 to vector<8x8xf32>
    %246 = arith.mulf %244, %245 : vector<8x8xf32>
    %247 = vector.extract_strided_slice %221 {offsets = [0, 8], sizes = [8, 8], strides = [1, 1]} : vector<8x32xf32> to vector<8x8xf32>
    %cst_104 = arith.constant dense<0.000000e+00> : vector<8x8xf32>
    %248 = tpu.matmul %246, %247, %cst_104 {dimension_numbers = #tpu.dot_dimension_numbers<[1], [1], [0], [0], [0, 0, 1, 0], [], []>} : vector<8x8xf32>, vector<8x8xf32>, vector<8x8xf32> -> vector<8x8xf32>
    %cst_105 = arith.constant dense<0xFF800000> : vector<8xf32>
    %249 = vector.multi_reduction <maximumf>, %248, %cst_105 [1] : vector<8x8xf32> to vector<8xf32>
    %250 = vector.shape_cast %249 : vector<8xf32> to vector<8x1xf32>
    %251 = vector.broadcast %250 : vector<8x1xf32> to vector<8x8xf32>
    %252 = arith.subf %248, %251 : vector<8x8xf32>
    %253 = math.exp %252 : vector<8x8xf32>
    %cst_106 = arith.constant dense<0.000000e+00> : vector<8xf32>
    %254 = vector.multi_reduction <add>, %253, %cst_106 [1] : vector<8x8xf32> to vector<8xf32>
    %255 = vector.shape_cast %254 : vector<8xf32> to vector<8x1xf32>
    %256 = tpu.reciprocal %255 {approx = true} : vector<8x1xf32> -> vector<8x1xf32>
    %257 = vector.broadcast %256 : vector<8x1xf32> to vector<8x8xf32>
    %258 = arith.mulf %253, %257 : vector<8x8xf32>
    %259 = vector.extract_strided_slice %226 {offsets = [0, 8], sizes = [8, 8], strides = [1, 1]} : vector<8x32xf32> to vector<8x8xf32>
    %cst_107 = arith.constant dense<0.000000e+00> : vector<8x8xf32>
    %260 = tpu.matmul %258, %259, %cst_107 {dimension_numbers = #tpu.dot_dimension_numbers<[1], [0], [0], [1], [0, 0, 1, 1], [], []>} : vector<8x8xf32>, vector<8x8xf32>, vector<8x8xf32> -> vector<8x8xf32>
    %261 = vector.extract_strided_slice %217 {offsets = [0, 16], sizes = [8, 8], strides = [1, 1]} : vector<8x32xf32> to vector<8x8xf32>
    %cst_108 = arith.constant 0.353553385 : f32
    %262 = vector.broadcast %cst_108 : f32 to vector<8x8xf32>
    %263 = arith.mulf %261, %262 : vector<8x8xf32>
    %264 = vector.extract_strided_slice %221 {offsets = [0, 16], sizes = [8, 8], strides = [1, 1]} : vector<8x32xf32> to vector<8x8xf32>
    %cst_109 = arith.constant dense<0.000000e+00> : vector<8x8xf32>
    %265 = tpu.matmul %263, %264, %cst_109 {dimension_numbers = #tpu.dot_dimension_numbers<[1], [1], [0], [0], [0, 0, 1, 0], [], []>} : vector<8x8xf32>, vector<8x8xf32>, vector<8x8xf32> -> vector<8x8xf32>
    %cst_110 = arith.constant dense<0xFF800000> : vector<8xf32>
    %266 = vector.multi_reduction <maximumf>, %265, %cst_110 [1] : vector<8x8xf32> to vector<8xf32>
    %267 = vector.shape_cast %266 : vector<8xf32> to vector<8x1xf32>
    %268 = vector.broadcast %267 : vector<8x1xf32> to vector<8x8xf32>
    %269 = arith.subf %265, %268 : vector<8x8xf32>
    %270 = math.exp %269 : vector<8x8xf32>
    %cst_111 = arith.constant dense<0.000000e+00> : vector<8xf32>
    %271 = vector.multi_reduction <add>, %270, %cst_111 [1] : vector<8x8xf32> to vector<8xf32>
    %272 = vector.shape_cast %271 : vector<8xf32> to vector<8x1xf32>
    %273 = tpu.reciprocal %272 {approx = true} : vector<8x1xf32> -> vector<8x1xf32>
    %274 = vector.broadcast %273 : vector<8x1xf32> to vector<8x8xf32>
    %275 = arith.mulf %270, %274 : vector<8x8xf32>
    %276 = vector.extract_strided_slice %226 {offsets = [0, 16], sizes = [8, 8], strides = [1, 1]} : vector<8x32xf32> to vector<8x8xf32>
    %cst_112 = arith.constant dense<0.000000e+00> : vector<8x8xf32>
    %277 = tpu.matmul %275, %276, %cst_112 {dimension_numbers = #tpu.dot_dimension_numbers<[1], [0], [0], [1], [0, 0, 1, 1], [], []>} : vector<8x8xf32>, vector<8x8xf32>, vector<8x8xf32> -> vector<8x8xf32>
    %278 = vector.extract_strided_slice %217 {offsets = [0, 24], sizes = [8, 8], strides = [1, 1]} : vector<8x32xf32> to vector<8x8xf32>
    %cst_113 = arith.constant 0.353553385 : f32
    %279 = vector.broadcast %cst_113 : f32 to vector<8x8xf32>
    %280 = arith.mulf %278, %279 : vector<8x8xf32>
    %281 = vector.extract_strided_slice %221 {offsets = [0, 24], sizes = [8, 8], strides = [1, 1]} : vector<8x32xf32> to vector<8x8xf32>
    %cst_114 = arith.constant dense<0.000000e+00> : vector<8x8xf32>
    %282 = tpu.matmul %280, %281, %cst_114 {dimension_numbers = #tpu.dot_dimension_numbers<[1], [1], [0], [0], [0, 0, 1, 0], [], []>} : vector<8x8xf32>, vector<8x8xf32>, vector<8x8xf32> -> vector<8x8xf32>
    %cst_115 = arith.constant dense<0xFF800000> : vector<8xf32>
    %283 = vector.multi_reduction <maximumf>, %282, %cst_115 [1] : vector<8x8xf32> to vector<8xf32>
    %284 = vector.shape_cast %283 : vector<8xf32> to vector<8x1xf32>
    %285 = vector.broadcast %284 : vector<8x1xf32> to vector<8x8xf32>
    %286 = arith.subf %282, %285 : vector<8x8xf32>
    %287 = math.exp %286 : vector<8x8xf32>
    %cst_116 = arith.constant dense<0.000000e+00> : vector<8xf32>
    %288 = vector.multi_reduction <add>, %287, %cst_116 [1] : vector<8x8xf32> to vector<8xf32>
    %289 = vector.shape_cast %288 : vector<8xf32> to vector<8x1xf32>
    %290 = tpu.reciprocal %289 {approx = true} : vector<8x1xf32> -> vector<8x1xf32>
    %291 = vector.broadcast %290 : vector<8x1xf32> to vector<8x8xf32>
    %292 = arith.mulf %287, %291 : vector<8x8xf32>
    %293 = vector.extract_strided_slice %226 {offsets = [0, 24], sizes = [8, 8], strides = [1, 1]} : vector<8x32xf32> to vector<8x8xf32>
    %cst_117 = arith.constant dense<0.000000e+00> : vector<8x8xf32>
    %294 = tpu.matmul %292, %293, %cst_117 {dimension_numbers = #tpu.dot_dimension_numbers<[1], [0], [0], [1], [0, 0, 1, 1], [], []>} : vector<8x8xf32>, vector<8x8xf32>, vector<8x8xf32> -> vector<8x8xf32>
    %295 = tpu.concatenate %243, %260, %277, %294 in 1 : vector<8x8xf32>, vector<8x8xf32>, vector<8x8xf32>, vector<8x8xf32> -> vector<8x32xf32>
    %296 = vector.extract_strided_slice %84 {offsets = [0, 96], sizes = [32, 32], strides = [1, 1]} : vector<32x128xf32> to vector<32x32xf32>
    %cst_118 = arith.constant dense<0.000000e+00> : vector<8x32xf32>
    %297 = tpu.matmul %295, %296, %cst_118 {dimension_numbers = #tpu.dot_dimension_numbers<[1], [0], [0], [1], [0, 0, 1, 1], [], []>} : vector<8x32xf32>, vector<32x32xf32>, vector<8x32xf32> -> vector<8x32xf32>
    %298 = vector.extract_strided_slice %86 {offsets = [3, 0], sizes = [1, 32], strides = [1, 1]} : vector<4x32xf32> to vector<1x32xf32>
    %299 = vector.broadcast %298 : vector<1x32xf32> to vector<8x32xf32>
    %300 = arith.addf %297, %299 : vector<8x32xf32>
    %301 = arith.addf %210, %300 : vector<8x32xf32>
    %302 = vector.extract_strided_slice %88 {offsets = [1, 0], sizes = [1, 32], strides = [1, 1]} : vector<3x32xf32> to vector<1x32xf32>
    %303 = vector.extract_strided_slice %90 {offsets = [1, 0], sizes = [1, 32], strides = [1, 1]} : vector<3x32xf32> to vector<1x32xf32>
    %cst_119 = arith.constant dense<0.000000e+00> : vector<8xf32>
    %304 = vector.multi_reduction <add>, %301, %cst_119 [1] : vector<8x32xf32> to vector<8xf32>
    %305 = vector.shape_cast %304 : vector<8xf32> to vector<8x1xf32>
    %cst_120 = arith.constant 3.200000e+01 : f32
    %306 = vector.broadcast %cst_120 : f32 to vector<8x1xf32>
    %307 = arith.divf %305, %306 : vector<8x1xf32>
    %308 = vector.broadcast %307 : vector<8x1xf32> to vector<8x32xf32>
    %309 = arith.subf %301, %308 : vector<8x32xf32>
    %310 = arith.mulf %309, %309 : vector<8x32xf32>
    %cst_121 = arith.constant dense<0.000000e+00> : vector<8xf32>
    %311 = vector.multi_reduction <add>, %310, %cst_121 [1] : vector<8x32xf32> to vector<8xf32>
    %312 = vector.shape_cast %311 : vector<8xf32> to vector<8x1xf32>
    %cst_122 = arith.constant 3.200000e+01 : f32
    %313 = vector.broadcast %cst_122 : f32 to vector<8x1xf32>
    %314 = arith.divf %312, %313 : vector<8x1xf32>
    %315 = vector.broadcast %307 : vector<8x1xf32> to vector<8x32xf32>
    %316 = arith.subf %301, %315 : vector<8x32xf32>
    %cst_123 = arith.constant 9.99999974E-6 : f32
    %317 = vector.broadcast %cst_123 : f32 to vector<8x1xf32>
    %318 = arith.addf %314, %317 : vector<8x1xf32>
    %319 = math.rsqrt %318 : vector<8x1xf32>
    %320 = vector.broadcast %319 : vector<8x1xf32> to vector<8x32xf32>
    %321 = arith.mulf %316, %320 : vector<8x32xf32>
    %322 = vector.broadcast %302 : vector<1x32xf32> to vector<8x32xf32>
    %323 = arith.mulf %321, %322 : vector<8x32xf32>
    %324 = vector.broadcast %303 : vector<1x32xf32> to vector<8x32xf32>
    %325 = arith.addf %323, %324 : vector<8x32xf32>
    %c0_124 = arith.constant 0 : index
    %c0_125 = arith.constant 0 : index
    %c0_126 = arith.constant 0 : index
    %326 = vector.load %arg12[%c0_124, %c0_125, %c0_126] : memref<2x32x128xf32, #tpu.memory_space<vmem>>, vector<1x32x128xf32>
    %327 = vector.shape_cast %326 : vector<1x32x128xf32> to vector<32x128xf32>
    %cst_127 = arith.constant dense<0.000000e+00> : vector<8x128xf32>
    %328 = tpu.matmul %325, %327, %cst_127 {dimension_numbers = #tpu.dot_dimension_numbers<[1], [0], [0], [1], [0, 0, 1, 1], [], []>} : vector<8x32xf32>, vector<32x128xf32>, vector<8x128xf32> -> vector<8x128xf32>
    %c0_128 = arith.constant 0 : index
    %c0_129 = arith.constant 0 : index
    %c0_130 = arith.constant 0 : index
    %329 = vector.load %arg13[%c0_128, %c0_129, %c0_130] : memref<2x1x128xf32, #tpu.memory_space<vmem>>, vector<1x1x128xf32>
    %330 = vector.shape_cast %329 : vector<1x1x128xf32> to vector<1x128xf32>
    %331 = vector.broadcast %330 : vector<1x128xf32> to vector<8x128xf32>
    %332 = arith.addf %328, %331 : vector<8x128xf32>
    %cst_131 = arith.constant 5.000000e-01 : f32
    %333 = vector.broadcast %cst_131 : f32 to vector<8x128xf32>
    %334 = arith.mulf %333, %332 : vector<8x128xf32>
    %cst_132 = arith.constant 0.707106769 : f32
    %335 = vector.broadcast %cst_132 : f32 to vector<8x128xf32>
    %336 = arith.mulf %332, %335 : vector<8x128xf32>
    %337 = math.absf %336 : vector<8x128xf32>
    %cst_133 = arith.constant 0.327591091 : f32
    %338 = vector.broadcast %cst_133 : f32 to vector<8x128xf32>
    %339 = arith.mulf %338, %337 : vector<8x128xf32>
    %cst_134 = arith.constant 1.000000e+00 : f32
    %340 = vector.broadcast %cst_134 : f32 to vector<8x128xf32>
    %341 = arith.addf %340, %339 : vector<8x128xf32>
    %cst_135 = arith.constant 1.000000e+00 : f32
    %342 = vector.broadcast %cst_135 : f32 to vector<8x128xf32>
    %343 = arith.divf %342, %341 : vector<8x128xf32>
    %cst_136 = arith.constant 1.06140542 : f32
    %344 = vector.broadcast %cst_136 : f32 to vector<8x128xf32>
    %345 = arith.mulf %343, %344 : vector<8x128xf32>
    %cst_137 = arith.constant -1.45315206 : f32
    %346 = vector.broadcast %cst_137 : f32 to vector<8x128xf32>
    %347 = arith.addf %346, %345 : vector<8x128xf32>
    %348 = arith.mulf %343, %347 : vector<8x128xf32>
    %cst_138 = arith.constant 1.42141378 : f32
    %349 = vector.broadcast %cst_138 : f32 to vector<8x128xf32>
    %350 = arith.addf %349, %348 : vector<8x128xf32>
    %351 = arith.mulf %343, %350 : vector<8x128xf32>
    %cst_139 = arith.constant -0.284496725 : f32
    %352 = vector.broadcast %cst_139 : f32 to vector<8x128xf32>
    %353 = arith.addf %352, %351 : vector<8x128xf32>
    %354 = arith.mulf %343, %353 : vector<8x128xf32>
    %cst_140 = arith.constant 0.254829586 : f32
    %355 = vector.broadcast %cst_140 : f32 to vector<8x128xf32>
    %356 = arith.addf %355, %354 : vector<8x128xf32>
    %357 = arith.mulf %343, %356 : vector<8x128xf32>
    %cst_141 = arith.constant 0.000000e+00 : f32
    %358 = vector.broadcast %cst_141 : f32 to vector<8x128xf32>
    %359 = arith.subf %358, %337 : vector<8x128xf32>
    %360 = arith.mulf %359, %337 : vector<8x128xf32>
    %361 = math.exp %360 : vector<8x128xf32>
    %362 = arith.mulf %357, %361 : vector<8x128xf32>
    %cst_142 = arith.constant 1.000000e+00 : f32
    %363 = vector.broadcast %cst_142 : f32 to vector<8x128xf32>
    %364 = arith.subf %363, %362 : vector<8x128xf32>
    %cst_143 = arith.constant 0.000000e+00 : f32
    %365 = vector.broadcast %cst_143 : f32 to vector<8x128xf32>
    %366 = arith.cmpf olt, %336, %365 : vector<8x128xf32>
    %cst_144 = arith.constant 0.000000e+00 : f32
    %367 = vector.broadcast %cst_144 : f32 to vector<8x128xf32>
    %368 = arith.subf %367, %364 : vector<8x128xf32>
    %369 = arith.select %366, %368, %364 : vector<8x128xi1>, vector<8x128xf32>
    %cst_145 = arith.constant 1.000000e+00 : f32
    %370 = vector.broadcast %cst_145 : f32 to vector<8x128xf32>
    %371 = arith.addf %370, %369 : vector<8x128xf32>
    %372 = arith.mulf %334, %371 : vector<8x128xf32>
    %c0_146 = arith.constant 0 : index
    %c0_147 = arith.constant 0 : index
    %c0_148 = arith.constant 0 : index
    %373 = vector.load %arg14[%c0_146, %c0_147, %c0_148] : memref<2x128x32xf32, #tpu.memory_space<vmem>>, vector<1x128x32xf32>
    %374 = vector.shape_cast %373 : vector<1x128x32xf32> to vector<128x32xf32>
    %cst_149 = arith.constant dense<0.000000e+00> : vector<8x32xf32>
    %375 = tpu.matmul %372, %374, %cst_149 {dimension_numbers = #tpu.dot_dimension_numbers<[1], [0], [0], [1], [0, 0, 1, 1], [], []>} : vector<8x128xf32>, vector<128x32xf32>, vector<8x32xf32> -> vector<8x32xf32>
    %c0_150 = arith.constant 0 : index
    %c0_151 = arith.constant 0 : index
    %c0_152 = arith.constant 0 : index
    %376 = vector.load %arg15[%c0_150, %c0_151, %c0_152] : memref<2x1x32xf32, #tpu.memory_space<vmem>>, vector<1x1x32xf32>
    %377 = vector.shape_cast %376 : vector<1x1x32xf32> to vector<1x32xf32>
    %378 = vector.broadcast %377 : vector<1x32xf32> to vector<8x32xf32>
    %379 = arith.addf %375, %378 : vector<8x32xf32>
    %380 = arith.addf %325, %379 : vector<8x32xf32>
    %381 = vector.extract_strided_slice %88 {offsets = [2, 0], sizes = [1, 32], strides = [1, 1]} : vector<3x32xf32> to vector<1x32xf32>
    %382 = vector.extract_strided_slice %90 {offsets = [2, 0], sizes = [1, 32], strides = [1, 1]} : vector<3x32xf32> to vector<1x32xf32>
    %cst_153 = arith.constant dense<0.000000e+00> : vector<8xf32>
    %383 = vector.multi_reduction <add>, %380, %cst_153 [1] : vector<8x32xf32> to vector<8xf32>
    %384 = vector.shape_cast %383 : vector<8xf32> to vector<8x1xf32>
    %cst_154 = arith.constant 3.200000e+01 : f32
    %385 = vector.broadcast %cst_154 : f32 to vector<8x1xf32>
    %386 = arith.divf %384, %385 : vector<8x1xf32>
    %387 = vector.broadcast %386 : vector<8x1xf32> to vector<8x32xf32>
    %388 = arith.subf %380, %387 : vector<8x32xf32>
    %389 = arith.mulf %388, %388 : vector<8x32xf32>
    %cst_155 = arith.constant dense<0.000000e+00> : vector<8xf32>
    %390 = vector.multi_reduction <add>, %389, %cst_155 [1] : vector<8x32xf32> to vector<8xf32>
    %391 = vector.shape_cast %390 : vector<8xf32> to vector<8x1xf32>
    %cst_156 = arith.constant 3.200000e+01 : f32
    %392 = vector.broadcast %cst_156 : f32 to vector<8x1xf32>
    %393 = arith.divf %391, %392 : vector<8x1xf32>
    %394 = vector.broadcast %386 : vector<8x1xf32> to vector<8x32xf32>
    %395 = arith.subf %380, %394 : vector<8x32xf32>
    %cst_157 = arith.constant 9.99999974E-6 : f32
    %396 = vector.broadcast %cst_157 : f32 to vector<8x1xf32>
    %397 = arith.addf %393, %396 : vector<8x1xf32>
    %398 = math.rsqrt %397 : vector<8x1xf32>
    %399 = vector.broadcast %398 : vector<8x1xf32> to vector<8x32xf32>
    %400 = arith.mulf %395, %399 : vector<8x32xf32>
    %401 = vector.broadcast %381 : vector<1x32xf32> to vector<8x32xf32>
    %402 = arith.mulf %400, %401 : vector<8x32xf32>
    %403 = vector.broadcast %382 : vector<1x32xf32> to vector<8x32xf32>
    %404 = arith.addf %402, %403 : vector<8x32xf32>
    %cst_158 = arith.constant dense<0.000000e+00> : vector<8xf32>
    %405 = vector.multi_reduction <add>, %404, %cst_158 [1] : vector<8x32xf32> to vector<8xf32>
    %406 = vector.shape_cast %405 : vector<8xf32> to vector<8x1xf32>
    %cst_159 = arith.constant 3.200000e+01 : f32
    %407 = vector.broadcast %cst_159 : f32 to vector<8x1xf32>
    %408 = arith.divf %406, %407 : vector<8x1xf32>
    %409 = vector.broadcast %408 : vector<8x1xf32> to vector<8x32xf32>
    %410 = arith.subf %404, %409 : vector<8x32xf32>
    %411 = arith.mulf %410, %410 : vector<8x32xf32>
    %cst_160 = arith.constant dense<0.000000e+00> : vector<8xf32>
    %412 = vector.multi_reduction <add>, %411, %cst_160 [1] : vector<8x32xf32> to vector<8xf32>
    %413 = vector.shape_cast %412 : vector<8xf32> to vector<8x1xf32>
    %cst_161 = arith.constant 3.200000e+01 : f32
    %414 = vector.broadcast %cst_161 : f32 to vector<8x1xf32>
    %415 = arith.divf %413, %414 : vector<8x1xf32>
    %416 = vector.broadcast %408 : vector<8x1xf32> to vector<8x32xf32>
    %417 = arith.subf %404, %416 : vector<8x32xf32>
    %cst_162 = arith.constant 9.99999974E-6 : f32
    %418 = vector.broadcast %cst_162 : f32 to vector<8x1xf32>
    %419 = arith.addf %415, %418 : vector<8x1xf32>
    %420 = math.rsqrt %419 : vector<8x1xf32>
    %421 = vector.broadcast %420 : vector<8x1xf32> to vector<8x32xf32>
    %422 = arith.mulf %417, %421 : vector<8x32xf32>
    %423 = vector.broadcast %3 : vector<1x32xf32> to vector<8x32xf32>
    %424 = arith.mulf %422, %423 : vector<8x32xf32>
    %425 = vector.broadcast %4 : vector<1x32xf32> to vector<8x32xf32>
    %426 = arith.addf %424, %425 : vector<8x32xf32>
    %cst_163 = arith.constant dense<0.000000e+00> : vector<8x128xf32>
    %427 = tpu.matmul %426, %5, %cst_163 {dimension_numbers = #tpu.dot_dimension_numbers<[1], [0], [0], [1], [0, 0, 1, 1], [], []>} : vector<8x32xf32>, vector<32x128xf32>, vector<8x128xf32> -> vector<8x128xf32>
    %428 = vector.broadcast %6 : vector<1x128xf32> to vector<8x128xf32>
    %429 = arith.addf %427, %428 : vector<8x128xf32>
    %c0_164 = arith.constant 0 : index
    %c1 = arith.constant 1 : index
    %c0_165 = arith.constant 0 : index
    %c0_166 = arith.constant 0 : index
    %430 = vector.load %arg22[%c0_164, %c1, %c0_165, %c0_166] : memref<1x3x8x128xf32, #tpu.memory_space<vmem>>, vector<1x1x8x128xf32>
    %431 = vector.shape_cast %430 : vector<1x1x8x128xf32> to vector<8x128xf32>
    %432 = vector.shape_cast %429 : vector<8x128xf32> to vector<1x1x8x128xf32>
    tpu.vector_store %arg22[%c0_164, %c1, %c0_165, %c0_166], %432 {strides = array<i32>} : memref<1x3x8x128xf32, #tpu.memory_space<vmem>>, vector<1x1x8x128xf32>,
    %433 = vector.extract_strided_slice %7 {offsets = [0, 0, 0], sizes = [1, 32, 32], strides = [1, 1, 1]} : vector<3x32x32xf32> to vector<1x32x32xf32>
    %434 = vector.shape_cast %433 : vector<1x32x32xf32> to vector<32x32xf32>
    %cst_167 = arith.constant dense<0.000000e+00> : vector<8x32xf32>
    %435 = tpu.matmul %426, %434, %cst_167 {dimension_numbers = #tpu.dot_dimension_numbers<[1], [0], [0], [1], [0, 0, 1, 1], [], []>} : vector<8x32xf32>, vector<32x32xf32>, vector<8x32xf32> -> vector<8x32xf32>
    %436 = vector.extract_strided_slice %8 {offsets = [0, 0], sizes = [1, 32], strides = [1, 1]} : vector<3x32xf32> to vector<1x32xf32>
    %437 = vector.broadcast %436 : vector<1x32xf32> to vector<8x32xf32>
    %438 = arith.addf %435, %437 : vector<8x32xf32>
    %cst_168 = arith.constant 0.000000e+00 : f32
    %439 = vector.broadcast %cst_168 : f32 to vector<8x32xf32>
    %440 = arith.maximumf %438, %439 : vector<8x32xf32>
    %441 = vector.extract_strided_slice %7 {offsets = [1, 0, 0], sizes = [1, 32, 32], strides = [1, 1, 1]} : vector<3x32x32xf32> to vector<1x32x32xf32>
    %442 = vector.shape_cast %441 : vector<1x32x32xf32> to vector<32x32xf32>
    %cst_169 = arith.constant dense<0.000000e+00> : vector<8x32xf32>
    %443 = tpu.matmul %440, %442, %cst_169 {dimension_numbers = #tpu.dot_dimension_numbers<[1], [0], [0], [1], [0, 0, 1, 1], [], []>} : vector<8x32xf32>, vector<32x32xf32>, vector<8x32xf32> -> vector<8x32xf32>
    %444 = vector.extract_strided_slice %8 {offsets = [1, 0], sizes = [1, 32], strides = [1, 1]} : vector<3x32xf32> to vector<1x32xf32>
    %445 = vector.broadcast %444 : vector<1x32xf32> to vector<8x32xf32>
    %446 = arith.addf %443, %445 : vector<8x32xf32>
    %cst_170 = arith.constant 0.000000e+00 : f32
    %447 = vector.broadcast %cst_170 : f32 to vector<8x32xf32>
    %448 = arith.maximumf %446, %447 : vector<8x32xf32>
    %449 = vector.extract_strided_slice %7 {offsets = [2, 0, 0], sizes = [1, 32, 32], strides = [1, 1, 1]} : vector<3x32x32xf32> to vector<1x32x32xf32>
    %450 = vector.shape_cast %449 : vector<1x32x32xf32> to vector<32x32xf32>
    %cst_171 = arith.constant dense<0.000000e+00> : vector<8x32xf32>
    %451 = tpu.matmul %448, %450, %cst_171 {dimension_numbers = #tpu.dot_dimension_numbers<[1], [0], [0], [1], [0, 0, 1, 1], [], []>} : vector<8x32xf32>, vector<32x32xf32>, vector<8x32xf32> -> vector<8x32xf32>
    %452 = vector.extract_strided_slice %8 {offsets = [2, 0], sizes = [1, 32], strides = [1, 1]} : vector<3x32xf32> to vector<1x32xf32>
    %453 = vector.broadcast %452 : vector<1x32xf32> to vector<8x32xf32>
    %454 = arith.addf %451, %453 : vector<8x32xf32>
    %cst_172 = arith.constant dense<0.000000e+00> : vector<8x64xf32>
    %455 = tpu.matmul %454, %2, %cst_172 {dimension_numbers = #tpu.dot_dimension_numbers<[1], [0], [0], [1], [0, 0, 1, 1], [], []>} : vector<8x32xf32>, vector<32x64xf32>, vector<8x64xf32> -> vector<8x64xf32>
    %c0_173 = arith.constant 0 : index
    %c1_174 = arith.constant 1 : index
    %c0_175 = arith.constant 0 : index
    %c0_176 = arith.constant 0 : index
    %456 = vector.load %arg23[%c0_173, %c1_174, %c0_175, %c0_176] : memref<1x3x8x64xf32, #tpu.memory_space<vmem>>, vector<1x1x8x64xf32>
    %457 = vector.shape_cast %456 : vector<1x1x8x64xf32> to vector<8x64xf32>
    %458 = vector.shape_cast %455 : vector<8x64xf32> to vector<1x1x8x64xf32>
    tpu.vector_store %arg23[%c0_173, %c1_174, %c0_175, %c0_176], %458 {strides = array<i32>} : memref<1x3x8x64xf32, #tpu.memory_space<vmem>>, vector<1x1x8x64xf32>,
    %cst_177 = arith.constant dense<0xFF800000> : vector<8xf32>
    %459 = vector.multi_reduction <maximumf>, %455, %cst_177 [1] : vector<8x64xf32> to vector<8xf32>
    %460 = vector.shape_cast %459 : vector<8xf32> to vector<8x1xf32>
    %cst_178 = arith.constant 0.000000e+00 : f32
    %461 = vector.broadcast %cst_178 : f32 to vector<8x1xf32>
    %462 = arith.cmpf oge, %460, %461 : vector<8x1xf32>
    %cst_179 = arith.constant 0.000000e+00 : f32
    %463 = vector.broadcast %cst_179 : f32 to vector<8x64xf32>
    %464 = arith.cmpf olt, %455, %463 : vector<8x64xf32>
    %465 = vector.broadcast %462 : vector<8x1xi1> to vector<8x64xi1>
    %466 = arith.andi %464, %465 : vector<8x64xi1>
    %cst_180 = arith.constant -1.000000e+30 : f32
    %cst_181 = arith.constant 0.000000e+00 : f32
    %467 = vector.broadcast %cst_180 : f32 to vector<8x64xf32>
    %468 = vector.broadcast %cst_181 : f32 to vector<8x64xf32>
    %469 = arith.select %466, %467, %468 : vector<8x64xi1>, vector<8x64xf32>
    %c0_182 = arith.constant 0 : index
    %c1_183 = arith.constant 1 : index
    %c0_184 = arith.constant 0 : index
    %c0_185 = arith.constant 0 : index
    %470 = vector.load %arg3[%c0_182, %c1_183, %c0_184, %c0_185] : memref<1x3x64x32xf32, #tpu.memory_space<vmem>>, vector<1x1x64x32xf32>
    %471 = vector.shape_cast %470 : vector<1x1x64x32xf32> to vector<64x32xf32>
    %c1_186 = arith.constant 1 : index
    %c0_187 = arith.constant 0 : index
    %c0_188 = arith.constant 0 : index
    %472 = vector.load %arg4[%c1_186, %c0_187, %c0_188] : memref<2x64x32xf32, #tpu.memory_space<vmem>>, vector<1x64x32xf32>
    %473 = vector.shape_cast %472 : vector<1x64x32xf32> to vector<64x32xf32>
    %c1_189 = arith.constant 1 : index
    %c0_190 = arith.constant 0 : index
    %c0_191 = arith.constant 0 : index
    %474 = vector.load %arg6[%c1_189, %c0_190, %c0_191] : memref<2x32x128xf32, #tpu.memory_space<vmem>>, vector<1x32x128xf32>
    %475 = vector.shape_cast %474 : vector<1x32x128xf32> to vector<32x128xf32>
    %c1_192 = arith.constant 1 : index
    %c0_193 = arith.constant 0 : index
    %c0_194 = arith.constant 0 : index
    %476 = vector.load %arg7[%c1_192, %c0_193, %c0_194] : memref<2x4x32xf32, #tpu.memory_space<vmem>>, vector<1x4x32xf32>
    %477 = vector.shape_cast %476 : vector<1x4x32xf32> to vector<4x32xf32>
    %c1_195 = arith.constant 1 : index
    %c0_196 = arith.constant 0 : index
    %c0_197 = arith.constant 0 : index
    %478 = vector.load %arg8[%c1_195, %c0_196, %c0_197] : memref<2x32x128xf32, #tpu.memory_space<vmem>>, vector<1x32x128xf32>
    %479 = vector.shape_cast %478 : vector<1x32x128xf32> to vector<32x128xf32>
    %c1_198 = arith.constant 1 : index
    %c0_199 = arith.constant 0 : index
    %c0_200 = arith.constant 0 : index
    %480 = vector.load %arg9[%c1_198, %c0_199, %c0_200] : memref<2x4x32xf32, #tpu.memory_space<vmem>>, vector<1x4x32xf32>
    %481 = vector.shape_cast %480 : vector<1x4x32xf32> to vector<4x32xf32>
    %c1_201 = arith.constant 1 : index
    %c0_202 = arith.constant 0 : index
    %c0_203 = arith.constant 0 : index
    %482 = vector.load %arg10[%c1_201, %c0_202, %c0_203] : memref<2x3x32xf32, #tpu.memory_space<vmem>>, vector<1x3x32xf32>
    %483 = vector.shape_cast %482 : vector<1x3x32xf32> to vector<3x32xf32>
    %c1_204 = arith.constant 1 : index
    %c0_205 = arith.constant 0 : index
    %c0_206 = arith.constant 0 : index
    %484 = vector.load %arg11[%c1_204, %c0_205, %c0_206] : memref<2x3x32xf32, #tpu.memory_space<vmem>>, vector<1x3x32xf32>
    %485 = vector.shape_cast %484 : vector<1x3x32xf32> to vector<3x32xf32>
    %486 = arith.addf %404, %0 : vector<8x32xf32>
    %487 = vector.extract_strided_slice %475 {offsets = [0, 0], sizes = [32, 32], strides = [1, 1]} : vector<32x128xf32> to vector<32x32xf32>
    %cst_207 = arith.constant dense<0.000000e+00> : vector<8x32xf32>
    %488 = tpu.matmul %486, %487, %cst_207 {dimension_numbers = #tpu.dot_dimension_numbers<[1], [0], [0], [1], [0, 0, 1, 1], [], []>} : vector<8x32xf32>, vector<32x32xf32>, vector<8x32xf32> -> vector<8x32xf32>
    %489 = vector.extract_strided_slice %477 {offsets = [0, 0], sizes = [1, 32], strides = [1, 1]} : vector<4x32xf32> to vector<1x32xf32>
    %490 = vector.broadcast %489 : vector<1x32xf32> to vector<8x32xf32>
    %491 = arith.addf %488, %490 : vector<8x32xf32>
    %492 = vector.extract_strided_slice %475 {offsets = [0, 32], sizes = [32, 64], strides = [1, 1]} : vector<32x128xf32> to vector<32x64xf32>
    %cst_208 = arith.constant dense<0.000000e+00> : vector<64x64xf32>
    %493 = tpu.matmul %471, %492, %cst_208 {dimension_numbers = #tpu.dot_dimension_numbers<[1], [0], [0], [1], [0, 0, 1, 1], [], []>} : vector<64x32xf32>, vector<32x64xf32>, vector<64x64xf32> -> vector<64x64xf32>
    %494 = vector.extract_strided_slice %493 {offsets = [0, 0], sizes = [64, 32], strides = [1, 1]} : vector<64x64xf32> to vector<64x32xf32>
    %495 = arith.addf %494, %473 : vector<64x32xf32>
    %496 = vector.extract_strided_slice %477 {offsets = [1, 0], sizes = [1, 32], strides = [1, 1]} : vector<4x32xf32> to vector<1x32xf32>
    %497 = vector.broadcast %496 : vector<1x32xf32> to vector<64x32xf32>
    %498 = arith.addf %495, %497 : vector<64x32xf32>
    %499 = vector.extract_strided_slice %493 {offsets = [0, 32], sizes = [64, 32], strides = [1, 1]} : vector<64x64xf32> to vector<64x32xf32>
    %500 = vector.extract_strided_slice %477 {offsets = [2, 0], sizes = [1, 32], strides = [1, 1]} : vector<4x32xf32> to vector<1x32xf32>
    %501 = vector.broadcast %500 : vector<1x32xf32> to vector<64x32xf32>
    %502 = arith.addf %499, %501 : vector<64x32xf32>
    %503 = vector.extract_strided_slice %491 {offsets = [0, 0], sizes = [8, 8], strides = [1, 1]} : vector<8x32xf32> to vector<8x8xf32>
    %cst_209 = arith.constant 0.353553385 : f32
    %504 = vector.broadcast %cst_209 : f32 to vector<8x8xf32>
    %505 = arith.mulf %503, %504 : vector<8x8xf32>
    %506 = vector.extract_strided_slice %498 {offsets = [0, 0], sizes = [64, 8], strides = [1, 1]} : vector<64x32xf32> to vector<64x8xf32>
    %cst_210 = arith.constant dense<0.000000e+00> : vector<8x64xf32>
    %507 = tpu.matmul %505, %506, %cst_210 {dimension_numbers = #tpu.dot_dimension_numbers<[1], [1], [0], [0], [0, 0, 1, 0], [], []>} : vector<8x8xf32>, vector<64x8xf32>, vector<8x64xf32> -> vector<8x64xf32>
    %508 = arith.addf %507, %469 : vector<8x64xf32>
    %cst_211 = arith.constant dense<0xFF800000> : vector<8xf32>
    %509 = vector.multi_reduction <maximumf>, %508, %cst_211 [1] : vector<8x64xf32> to vector<8xf32>
    %510 = vector.shape_cast %509 : vector<8xf32> to vector<8x1xf32>
    %511 = vector.broadcast %510 : vector<8x1xf32> to vector<8x64xf32>
    %512 = arith.subf %508, %511 : vector<8x64xf32>
    %513 = math.exp %512 : vector<8x64xf32>
    %cst_212 = arith.constant dense<0.000000e+00> : vector<8xf32>
    %514 = vector.multi_reduction <add>, %513, %cst_212 [1] : vector<8x64xf32> to vector<8xf32>
    %515 = vector.shape_cast %514 : vector<8xf32> to vector<8x1xf32>
    %516 = tpu.reciprocal %515 {approx = true} : vector<8x1xf32> -> vector<8x1xf32>
    %517 = vector.broadcast %516 : vector<8x1xf32> to vector<8x64xf32>
    %518 = arith.mulf %513, %517 : vector<8x64xf32>
    %519 = vector.extract_strided_slice %502 {offsets = [0, 0], sizes = [64, 8], strides = [1, 1]} : vector<64x32xf32> to vector<64x8xf32>
    %cst_213 = arith.constant dense<0.000000e+00> : vector<8x8xf32>
    %520 = tpu.matmul %518, %519, %cst_213 {dimension_numbers = #tpu.dot_dimension_numbers<[1], [0], [0], [1], [0, 0, 1, 1], [], []>} : vector<8x64xf32>, vector<64x8xf32>, vector<8x8xf32> -> vector<8x8xf32>
    %521 = vector.extract_strided_slice %491 {offsets = [0, 8], sizes = [8, 8], strides = [1, 1]} : vector<8x32xf32> to vector<8x8xf32>
    %cst_214 = arith.constant 0.353553385 : f32
    %522 = vector.broadcast %cst_214 : f32 to vector<8x8xf32>
    %523 = arith.mulf %521, %522 : vector<8x8xf32>
    %524 = vector.extract_strided_slice %498 {offsets = [0, 8], sizes = [64, 8], strides = [1, 1]} : vector<64x32xf32> to vector<64x8xf32>
    %cst_215 = arith.constant dense<0.000000e+00> : vector<8x64xf32>
    %525 = tpu.matmul %523, %524, %cst_215 {dimension_numbers = #tpu.dot_dimension_numbers<[1], [1], [0], [0], [0, 0, 1, 0], [], []>} : vector<8x8xf32>, vector<64x8xf32>, vector<8x64xf32> -> vector<8x64xf32>
    %526 = arith.addf %525, %469 : vector<8x64xf32>
    %cst_216 = arith.constant dense<0xFF800000> : vector<8xf32>
    %527 = vector.multi_reduction <maximumf>, %526, %cst_216 [1] : vector<8x64xf32> to vector<8xf32>
    %528 = vector.shape_cast %527 : vector<8xf32> to vector<8x1xf32>
    %529 = vector.broadcast %528 : vector<8x1xf32> to vector<8x64xf32>
    %530 = arith.subf %526, %529 : vector<8x64xf32>
    %531 = math.exp %530 : vector<8x64xf32>
    %cst_217 = arith.constant dense<0.000000e+00> : vector<8xf32>
    %532 = vector.multi_reduction <add>, %531, %cst_217 [1] : vector<8x64xf32> to vector<8xf32>
    %533 = vector.shape_cast %532 : vector<8xf32> to vector<8x1xf32>
    %534 = tpu.reciprocal %533 {approx = true} : vector<8x1xf32> -> vector<8x1xf32>
    %535 = vector.broadcast %534 : vector<8x1xf32> to vector<8x64xf32>
    %536 = arith.mulf %531, %535 : vector<8x64xf32>
    %537 = vector.extract_strided_slice %502 {offsets = [0, 8], sizes = [64, 8], strides = [1, 1]} : vector<64x32xf32> to vector<64x8xf32>
    %cst_218 = arith.constant dense<0.000000e+00> : vector<8x8xf32>
    %538 = tpu.matmul %536, %537, %cst_218 {dimension_numbers = #tpu.dot_dimension_numbers<[1], [0], [0], [1], [0, 0, 1, 1], [], []>} : vector<8x64xf32>, vector<64x8xf32>, vector<8x8xf32> -> vector<8x8xf32>
    %539 = vector.extract_strided_slice %491 {offsets = [0, 16], sizes = [8, 8], strides = [1, 1]} : vector<8x32xf32> to vector<8x8xf32>
    %cst_219 = arith.constant 0.353553385 : f32
    %540 = vector.broadcast %cst_219 : f32 to vector<8x8xf32>
    %541 = arith.mulf %539, %540 : vector<8x8xf32>
    %542 = vector.extract_strided_slice %498 {offsets = [0, 16], sizes = [64, 8], strides = [1, 1]} : vector<64x32xf32> to vector<64x8xf32>
    %cst_220 = arith.constant dense<0.000000e+00> : vector<8x64xf32>
    %543 = tpu.matmul %541, %542, %cst_220 {dimension_numbers = #tpu.dot_dimension_numbers<[1], [1], [0], [0], [0, 0, 1, 0], [], []>} : vector<8x8xf32>, vector<64x8xf32>, vector<8x64xf32> -> vector<8x64xf32>
    %544 = arith.addf %543, %469 : vector<8x64xf32>
    %cst_221 = arith.constant dense<0xFF800000> : vector<8xf32>
    %545 = vector.multi_reduction <maximumf>, %544, %cst_221 [1] : vector<8x64xf32> to vector<8xf32>
    %546 = vector.shape_cast %545 : vector<8xf32> to vector<8x1xf32>
    %547 = vector.broadcast %546 : vector<8x1xf32> to vector<8x64xf32>
    %548 = arith.subf %544, %547 : vector<8x64xf32>
    %549 = math.exp %548 : vector<8x64xf32>
    %cst_222 = arith.constant dense<0.000000e+00> : vector<8xf32>
    %550 = vector.multi_reduction <add>, %549, %cst_222 [1] : vector<8x64xf32> to vector<8xf32>
    %551 = vector.shape_cast %550 : vector<8xf32> to vector<8x1xf32>
    %552 = tpu.reciprocal %551 {approx = true} : vector<8x1xf32> -> vector<8x1xf32>
    %553 = vector.broadcast %552 : vector<8x1xf32> to vector<8x64xf32>
    %554 = arith.mulf %549, %553 : vector<8x64xf32>
    %555 = vector.extract_strided_slice %502 {offsets = [0, 16], sizes = [64, 8], strides = [1, 1]} : vector<64x32xf32> to vector<64x8xf32>
    %cst_223 = arith.constant dense<0.000000e+00> : vector<8x8xf32>
    %556 = tpu.matmul %554, %555, %cst_223 {dimension_numbers = #tpu.dot_dimension_numbers<[1], [0], [0], [1], [0, 0, 1, 1], [], []>} : vector<8x64xf32>, vector<64x8xf32>, vector<8x8xf32> -> vector<8x8xf32>
    %557 = vector.extract_strided_slice %491 {offsets = [0, 24], sizes = [8, 8], strides = [1, 1]} : vector<8x32xf32> to vector<8x8xf32>
    %cst_224 = arith.constant 0.353553385 : f32
    %558 = vector.broadcast %cst_224 : f32 to vector<8x8xf32>
    %559 = arith.mulf %557, %558 : vector<8x8xf32>
    %560 = vector.extract_strided_slice %498 {offsets = [0, 24], sizes = [64, 8], strides = [1, 1]} : vector<64x32xf32> to vector<64x8xf32>
    %cst_225 = arith.constant dense<0.000000e+00> : vector<8x64xf32>
    %561 = tpu.matmul %559, %560, %cst_225 {dimension_numbers = #tpu.dot_dimension_numbers<[1], [1], [0], [0], [0, 0, 1, 0], [], []>} : vector<8x8xf32>, vector<64x8xf32>, vector<8x64xf32> -> vector<8x64xf32>
    %562 = arith.addf %561, %469 : vector<8x64xf32>
    %cst_226 = arith.constant dense<0xFF800000> : vector<8xf32>
    %563 = vector.multi_reduction <maximumf>, %562, %cst_226 [1] : vector<8x64xf32> to vector<8xf32>
    %564 = vector.shape_cast %563 : vector<8xf32> to vector<8x1xf32>
    %565 = vector.broadcast %564 : vector<8x1xf32> to vector<8x64xf32>
    %566 = arith.subf %562, %565 : vector<8x64xf32>
    %567 = math.exp %566 : vector<8x64xf32>
    %cst_227 = arith.constant dense<0.000000e+00> : vector<8xf32>
    %568 = vector.multi_reduction <add>, %567, %cst_227 [1] : vector<8x64xf32> to vector<8xf32>
    %569 = vector.shape_cast %568 : vector<8xf32> to vector<8x1xf32>
    %570 = tpu.reciprocal %569 {approx = true} : vector<8x1xf32> -> vector<8x1xf32>
    %571 = vector.broadcast %570 : vector<8x1xf32> to vector<8x64xf32>
    %572 = arith.mulf %567, %571 : vector<8x64xf32>
    %573 = vector.extract_strided_slice %502 {offsets = [0, 24], sizes = [64, 8], strides = [1, 1]} : vector<64x32xf32> to vector<64x8xf32>
    %cst_228 = arith.constant dense<0.000000e+00> : vector<8x8xf32>
    %574 = tpu.matmul %572, %573, %cst_228 {dimension_numbers = #tpu.dot_dimension_numbers<[1], [0], [0], [1], [0, 0, 1, 1], [], []>} : vector<8x64xf32>, vector<64x8xf32>, vector<8x8xf32> -> vector<8x8xf32>
    %575 = tpu.concatenate %520, %538, %556, %574 in 1 : vector<8x8xf32>, vector<8x8xf32>, vector<8x8xf32>, vector<8x8xf32> -> vector<8x32xf32>
    %576 = vector.extract_strided_slice %475 {offsets = [0, 96], sizes = [32, 32], strides = [1, 1]} : vector<32x128xf32> to vector<32x32xf32>
    %cst_229 = arith.constant dense<0.000000e+00> : vector<8x32xf32>
    %577 = tpu.matmul %575, %576, %cst_229 {dimension_numbers = #tpu.dot_dimension_numbers<[1], [0], [0], [1], [0, 0, 1, 1], [], []>} : vector<8x32xf32>, vector<32x32xf32>, vector<8x32xf32> -> vector<8x32xf32>
    %578 = vector.extract_strided_slice %477 {offsets = [3, 0], sizes = [1, 32], strides = [1, 1]} : vector<4x32xf32> to vector<1x32xf32>
    %579 = vector.broadcast %578 : vector<1x32xf32> to vector<8x32xf32>
    %580 = arith.addf %577, %579 : vector<8x32xf32>
    %581 = arith.addf %404, %580 : vector<8x32xf32>
    %582 = vector.extract_strided_slice %483 {offsets = [0, 0], sizes = [1, 32], strides = [1, 1]} : vector<3x32xf32> to vector<1x32xf32>
    %583 = vector.extract_strided_slice %485 {offsets = [0, 0], sizes = [1, 32], strides = [1, 1]} : vector<3x32xf32> to vector<1x32xf32>
    %cst_230 = arith.constant dense<0.000000e+00> : vector<8xf32>
    %584 = vector.multi_reduction <add>, %581, %cst_230 [1] : vector<8x32xf32> to vector<8xf32>
    %585 = vector.shape_cast %584 : vector<8xf32> to vector<8x1xf32>
    %cst_231 = arith.constant 3.200000e+01 : f32
    %586 = vector.broadcast %cst_231 : f32 to vector<8x1xf32>
    %587 = arith.divf %585, %586 : vector<8x1xf32>
    %588 = vector.broadcast %587 : vector<8x1xf32> to vector<8x32xf32>
    %589 = arith.subf %581, %588 : vector<8x32xf32>
    %590 = arith.mulf %589, %589 : vector<8x32xf32>
    %cst_232 = arith.constant dense<0.000000e+00> : vector<8xf32>
    %591 = vector.multi_reduction <add>, %590, %cst_232 [1] : vector<8x32xf32> to vector<8xf32>
    %592 = vector.shape_cast %591 : vector<8xf32> to vector<8x1xf32>
    %cst_233 = arith.constant 3.200000e+01 : f32
    %593 = vector.broadcast %cst_233 : f32 to vector<8x1xf32>
    %594 = arith.divf %592, %593 : vector<8x1xf32>
    %595 = vector.broadcast %587 : vector<8x1xf32> to vector<8x32xf32>
    %596 = arith.subf %581, %595 : vector<8x32xf32>
    %cst_234 = arith.constant 9.99999974E-6 : f32
    %597 = vector.broadcast %cst_234 : f32 to vector<8x1xf32>
    %598 = arith.addf %594, %597 : vector<8x1xf32>
    %599 = math.rsqrt %598 : vector<8x1xf32>
    %600 = vector.broadcast %599 : vector<8x1xf32> to vector<8x32xf32>
    %601 = arith.mulf %596, %600 : vector<8x32xf32>
    %602 = vector.broadcast %582 : vector<1x32xf32> to vector<8x32xf32>
    %603 = arith.mulf %601, %602 : vector<8x32xf32>
    %604 = vector.broadcast %583 : vector<1x32xf32> to vector<8x32xf32>
    %605 = arith.addf %603, %604 : vector<8x32xf32>
    %606 = arith.addf %605, %0 : vector<8x32xf32>
    %607 = vector.extract_strided_slice %479 {offsets = [0, 0], sizes = [32, 64], strides = [1, 1]} : vector<32x128xf32> to vector<32x64xf32>
    %cst_235 = arith.constant dense<0.000000e+00> : vector<8x64xf32>
    %608 = tpu.matmul %606, %607, %cst_235 {dimension_numbers = #tpu.dot_dimension_numbers<[1], [0], [0], [1], [0, 0, 1, 1], [], []>} : vector<8x32xf32>, vector<32x64xf32>, vector<8x64xf32> -> vector<8x64xf32>
    %609 = vector.extract_strided_slice %608 {offsets = [0, 0], sizes = [8, 32], strides = [1, 1]} : vector<8x64xf32> to vector<8x32xf32>
    %610 = vector.extract_strided_slice %481 {offsets = [0, 0], sizes = [1, 32], strides = [1, 1]} : vector<4x32xf32> to vector<1x32xf32>
    %611 = vector.broadcast %610 : vector<1x32xf32> to vector<8x32xf32>
    %612 = arith.addf %609, %611 : vector<8x32xf32>
    %613 = vector.extract_strided_slice %608 {offsets = [0, 32], sizes = [8, 32], strides = [1, 1]} : vector<8x64xf32> to vector<8x32xf32>
    %614 = vector.extract_strided_slice %481 {offsets = [1, 0], sizes = [1, 32], strides = [1, 1]} : vector<4x32xf32> to vector<1x32xf32>
    %615 = vector.broadcast %614 : vector<1x32xf32> to vector<8x32xf32>
    %616 = arith.addf %613, %615 : vector<8x32xf32>
    %617 = vector.extract_strided_slice %479 {offsets = [0, 64], sizes = [32, 32], strides = [1, 1]} : vector<32x128xf32> to vector<32x32xf32>
    %cst_236 = arith.constant dense<0.000000e+00> : vector<8x32xf32>
    %618 = tpu.matmul %605, %617, %cst_236 {dimension_numbers = #tpu.dot_dimension_numbers<[1], [0], [0], [1], [0, 0, 1, 1], [], []>} : vector<8x32xf32>, vector<32x32xf32>, vector<8x32xf32> -> vector<8x32xf32>
    %619 = vector.extract_strided_slice %481 {offsets = [2, 0], sizes = [1, 32], strides = [1, 1]} : vector<4x32xf32> to vector<1x32xf32>
    %620 = vector.broadcast %619 : vector<1x32xf32> to vector<8x32xf32>
    %621 = arith.addf %618, %620 : vector<8x32xf32>
    %622 = vector.extract_strided_slice %612 {offsets = [0, 0], sizes = [8, 8], strides = [1, 1]} : vector<8x32xf32> to vector<8x8xf32>
    %cst_237 = arith.constant 0.353553385 : f32
    %623 = vector.broadcast %cst_237 : f32 to vector<8x8xf32>
    %624 = arith.mulf %622, %623 : vector<8x8xf32>
    %625 = vector.extract_strided_slice %616 {offsets = [0, 0], sizes = [8, 8], strides = [1, 1]} : vector<8x32xf32> to vector<8x8xf32>
    %cst_238 = arith.constant dense<0.000000e+00> : vector<8x8xf32>
    %626 = tpu.matmul %624, %625, %cst_238 {dimension_numbers = #tpu.dot_dimension_numbers<[1], [1], [0], [0], [0, 0, 1, 0], [], []>} : vector<8x8xf32>, vector<8x8xf32>, vector<8x8xf32> -> vector<8x8xf32>
    %cst_239 = arith.constant dense<0xFF800000> : vector<8xf32>
    %627 = vector.multi_reduction <maximumf>, %626, %cst_239 [1] : vector<8x8xf32> to vector<8xf32>
    %628 = vector.shape_cast %627 : vector<8xf32> to vector<8x1xf32>
    %629 = vector.broadcast %628 : vector<8x1xf32> to vector<8x8xf32>
    %630 = arith.subf %626, %629 : vector<8x8xf32>
    %631 = math.exp %630 : vector<8x8xf32>
    %cst_240 = arith.constant dense<0.000000e+00> : vector<8xf32>
    %632 = vector.multi_reduction <add>, %631, %cst_240 [1] : vector<8x8xf32> to vector<8xf32>
    %633 = vector.shape_cast %632 : vector<8xf32> to vector<8x1xf32>
    %634 = tpu.reciprocal %633 {approx = true} : vector<8x1xf32> -> vector<8x1xf32>
    %635 = vector.broadcast %634 : vector<8x1xf32> to vector<8x8xf32>
    %636 = arith.mulf %631, %635 : vector<8x8xf32>
    %637 = vector.extract_strided_slice %621 {offsets = [0, 0], sizes = [8, 8], strides = [1, 1]} : vector<8x32xf32> to vector<8x8xf32>
    %cst_241 = arith.constant dense<0.000000e+00> : vector<8x8xf32>
    %638 = tpu.matmul %636, %637, %cst_241 {dimension_numbers = #tpu.dot_dimension_numbers<[1], [0], [0], [1], [0, 0, 1, 1], [], []>} : vector<8x8xf32>, vector<8x8xf32>, vector<8x8xf32> -> vector<8x8xf32>
    %639 = vector.extract_strided_slice %612 {offsets = [0, 8], sizes = [8, 8], strides = [1, 1]} : vector<8x32xf32> to vector<8x8xf32>
    %cst_242 = arith.constant 0.353553385 : f32
    %640 = vector.broadcast %cst_242 : f32 to vector<8x8xf32>
    %641 = arith.mulf %639, %640 : vector<8x8xf32>
    %642 = vector.extract_strided_slice %616 {offsets = [0, 8], sizes = [8, 8], strides = [1, 1]} : vector<8x32xf32> to vector<8x8xf32>
    %cst_243 = arith.constant dense<0.000000e+00> : vector<8x8xf32>
    %643 = tpu.matmul %641, %642, %cst_243 {dimension_numbers = #tpu.dot_dimension_numbers<[1], [1], [0], [0], [0, 0, 1, 0], [], []>} : vector<8x8xf32>, vector<8x8xf32>, vector<8x8xf32> -> vector<8x8xf32>
    %cst_244 = arith.constant dense<0xFF800000> : vector<8xf32>
    %644 = vector.multi_reduction <maximumf>, %643, %cst_244 [1] : vector<8x8xf32> to vector<8xf32>
    %645 = vector.shape_cast %644 : vector<8xf32> to vector<8x1xf32>
    %646 = vector.broadcast %645 : vector<8x1xf32> to vector<8x8xf32>
    %647 = arith.subf %643, %646 : vector<8x8xf32>
    %648 = math.exp %647 : vector<8x8xf32>
    %cst_245 = arith.constant dense<0.000000e+00> : vector<8xf32>
    %649 = vector.multi_reduction <add>, %648, %cst_245 [1] : vector<8x8xf32> to vector<8xf32>
    %650 = vector.shape_cast %649 : vector<8xf32> to vector<8x1xf32>
    %651 = tpu.reciprocal %650 {approx = true} : vector<8x1xf32> -> vector<8x1xf32>
    %652 = vector.broadcast %651 : vector<8x1xf32> to vector<8x8xf32>
    %653 = arith.mulf %648, %652 : vector<8x8xf32>
    %654 = vector.extract_strided_slice %621 {offsets = [0, 8], sizes = [8, 8], strides = [1, 1]} : vector<8x32xf32> to vector<8x8xf32>
    %cst_246 = arith.constant dense<0.000000e+00> : vector<8x8xf32>
    %655 = tpu.matmul %653, %654, %cst_246 {dimension_numbers = #tpu.dot_dimension_numbers<[1], [0], [0], [1], [0, 0, 1, 1], [], []>} : vector<8x8xf32>, vector<8x8xf32>, vector<8x8xf32> -> vector<8x8xf32>
    %656 = vector.extract_strided_slice %612 {offsets = [0, 16], sizes = [8, 8], strides = [1, 1]} : vector<8x32xf32> to vector<8x8xf32>
    %cst_247 = arith.constant 0.353553385 : f32
    %657 = vector.broadcast %cst_247 : f32 to vector<8x8xf32>
    %658 = arith.mulf %656, %657 : vector<8x8xf32>
    %659 = vector.extract_strided_slice %616 {offsets = [0, 16], sizes = [8, 8], strides = [1, 1]} : vector<8x32xf32> to vector<8x8xf32>
    %cst_248 = arith.constant dense<0.000000e+00> : vector<8x8xf32>
    %660 = tpu.matmul %658, %659, %cst_248 {dimension_numbers = #tpu.dot_dimension_numbers<[1], [1], [0], [0], [0, 0, 1, 0], [], []>} : vector<8x8xf32>, vector<8x8xf32>, vector<8x8xf32> -> vector<8x8xf32>
    %cst_249 = arith.constant dense<0xFF800000> : vector<8xf32>
    %661 = vector.multi_reduction <maximumf>, %660, %cst_249 [1] : vector<8x8xf32> to vector<8xf32>
    %662 = vector.shape_cast %661 : vector<8xf32> to vector<8x1xf32>
    %663 = vector.broadcast %662 : vector<8x1xf32> to vector<8x8xf32>
    %664 = arith.subf %660, %663 : vector<8x8xf32>
    %665 = math.exp %664 : vector<8x8xf32>
    %cst_250 = arith.constant dense<0.000000e+00> : vector<8xf32>
    %666 = vector.multi_reduction <add>, %665, %cst_250 [1] : vector<8x8xf32> to vector<8xf32>
    %667 = vector.shape_cast %666 : vector<8xf32> to vector<8x1xf32>
    %668 = tpu.reciprocal %667 {approx = true} : vector<8x1xf32> -> vector<8x1xf32>
    %669 = vector.broadcast %668 : vector<8x1xf32> to vector<8x8xf32>
    %670 = arith.mulf %665, %669 : vector<8x8xf32>
    %671 = vector.extract_strided_slice %621 {offsets = [0, 16], sizes = [8, 8], strides = [1, 1]} : vector<8x32xf32> to vector<8x8xf32>
    %cst_251 = arith.constant dense<0.000000e+00> : vector<8x8xf32>
    %672 = tpu.matmul %670, %671, %cst_251 {dimension_numbers = #tpu.dot_dimension_numbers<[1], [0], [0], [1], [0, 0, 1, 1], [], []>} : vector<8x8xf32>, vector<8x8xf32>, vector<8x8xf32> -> vector<8x8xf32>
    %673 = vector.extract_strided_slice %612 {offsets = [0, 24], sizes = [8, 8], strides = [1, 1]} : vector<8x32xf32> to vector<8x8xf32>
    %cst_252 = arith.constant 0.353553385 : f32
    %674 = vector.broadcast %cst_252 : f32 to vector<8x8xf32>
    %675 = arith.mulf %673, %674 : vector<8x8xf32>
    %676 = vector.extract_strided_slice %616 {offsets = [0, 24], sizes = [8, 8], strides = [1, 1]} : vector<8x32xf32> to vector<8x8xf32>
    %cst_253 = arith.constant dense<0.000000e+00> : vector<8x8xf32>
    %677 = tpu.matmul %675, %676, %cst_253 {dimension_numbers = #tpu.dot_dimension_numbers<[1], [1], [0], [0], [0, 0, 1, 0], [], []>} : vector<8x8xf32>, vector<8x8xf32>, vector<8x8xf32> -> vector<8x8xf32>
    %cst_254 = arith.constant dense<0xFF800000> : vector<8xf32>
    %678 = vector.multi_reduction <maximumf>, %677, %cst_254 [1] : vector<8x8xf32> to vector<8xf32>
    %679 = vector.shape_cast %678 : vector<8xf32> to vector<8x1xf32>
    %680 = vector.broadcast %679 : vector<8x1xf32> to vector<8x8xf32>
    %681 = arith.subf %677, %680 : vector<8x8xf32>
    %682 = math.exp %681 : vector<8x8xf32>
    %cst_255 = arith.constant dense<0.000000e+00> : vector<8xf32>
    %683 = vector.multi_reduction <add>, %682, %cst_255 [1] : vector<8x8xf32> to vector<8xf32>
    %684 = vector.shape_cast %683 : vector<8xf32> to vector<8x1xf32>
    %685 = tpu.reciprocal %684 {approx = true} : vector<8x1xf32> -> vector<8x1xf32>
    %686 = vector.broadcast %685 : vector<8x1xf32> to vector<8x8xf32>
    %687 = arith.mulf %682, %686 : vector<8x8xf32>
    %688 = vector.extract_strided_slice %621 {offsets = [0, 24], sizes = [8, 8], strides = [1, 1]} : vector<8x32xf32> to vector<8x8xf32>
    %cst_256 = arith.constant dense<0.000000e+00> : vector<8x8xf32>
    %689 = tpu.matmul %687, %688, %cst_256 {dimension_numbers = #tpu.dot_dimension_numbers<[1], [0], [0], [1], [0, 0, 1, 1], [], []>} : vector<8x8xf32>, vector<8x8xf32>, vector<8x8xf32> -> vector<8x8xf32>
    %690 = tpu.concatenate %638, %655, %672, %689 in 1 : vector<8x8xf32>, vector<8x8xf32>, vector<8x8xf32>, vector<8x8xf32> -> vector<8x32xf32>
    %691 = vector.extract_strided_slice %479 {offsets = [0, 96], sizes = [32, 32], strides = [1, 1]} : vector<32x128xf32> to vector<32x32xf32>
    %cst_257 = arith.constant dense<0.000000e+00> : vector<8x32xf32>
    %692 = tpu.matmul %690, %691, %cst_257 {dimension_numbers = #tpu.dot_dimension_numbers<[1], [0], [0], [1], [0, 0, 1, 1], [], []>} : vector<8x32xf32>, vector<32x32xf32>, vector<8x32xf32> -> vector<8x32xf32>
    %693 = vector.extract_strided_slice %481 {offsets = [3, 0], sizes = [1, 32], strides = [1, 1]} : vector<4x32xf32> to vector<1x32xf32>
    %694 = vector.broadcast %693 : vector<1x32xf32> to vector<8x32xf32>
    %695 = arith.addf %692, %694 : vector<8x32xf32>
    %696 = arith.addf %605, %695 : vector<8x32xf32>
    %697 = vector.extract_strided_slice %483 {offsets = [1, 0], sizes = [1, 32], strides = [1, 1]} : vector<3x32xf32> to vector<1x32xf32>
    %698 = vector.extract_strided_slice %485 {offsets = [1, 0], sizes = [1, 32], strides = [1, 1]} : vector<3x32xf32> to vector<1x32xf32>
    %cst_258 = arith.constant dense<0.000000e+00> : vector<8xf32>
    %699 = vector.multi_reduction <add>, %696, %cst_258 [1] : vector<8x32xf32> to vector<8xf32>
    %700 = vector.shape_cast %699 : vector<8xf32> to vector<8x1xf32>
    %cst_259 = arith.constant 3.200000e+01 : f32
    %701 = vector.broadcast %cst_259 : f32 to vector<8x1xf32>
    %702 = arith.divf %700, %701 : vector<8x1xf32>
    %703 = vector.broadcast %702 : vector<8x1xf32> to vector<8x32xf32>
    %704 = arith.subf %696, %703 : vector<8x32xf32>
    %705 = arith.mulf %704, %704 : vector<8x32xf32>
    %cst_260 = arith.constant dense<0.000000e+00> : vector<8xf32>
    %706 = vector.multi_reduction <add>, %705, %cst_260 [1] : vector<8x32xf32> to vector<8xf32>
    %707 = vector.shape_cast %706 : vector<8xf32> to vector<8x1xf32>
    %cst_261 = arith.constant 3.200000e+01 : f32
    %708 = vector.broadcast %cst_261 : f32 to vector<8x1xf32>
    %709 = arith.divf %707, %708 : vector<8x1xf32>
    %710 = vector.broadcast %702 : vector<8x1xf32> to vector<8x32xf32>
    %711 = arith.subf %696, %710 : vector<8x32xf32>
    %cst_262 = arith.constant 9.99999974E-6 : f32
    %712 = vector.broadcast %cst_262 : f32 to vector<8x1xf32>
    %713 = arith.addf %709, %712 : vector<8x1xf32>
    %714 = math.rsqrt %713 : vector<8x1xf32>
    %715 = vector.broadcast %714 : vector<8x1xf32> to vector<8x32xf32>
    %716 = arith.mulf %711, %715 : vector<8x32xf32>
    %717 = vector.broadcast %697 : vector<1x32xf32> to vector<8x32xf32>
    %718 = arith.mulf %716, %717 : vector<8x32xf32>
    %719 = vector.broadcast %698 : vector<1x32xf32> to vector<8x32xf32>
    %720 = arith.addf %718, %719 : vector<8x32xf32>
    %c1_263 = arith.constant 1 : index
    %c0_264 = arith.constant 0 : index
    %c0_265 = arith.constant 0 : index
    %721 = vector.load %arg12[%c1_263, %c0_264, %c0_265] : memref<2x32x128xf32, #tpu.memory_space<vmem>>, vector<1x32x128xf32>
    %722 = vector.shape_cast %721 : vector<1x32x128xf32> to vector<32x128xf32>
    %cst_266 = arith.constant dense<0.000000e+00> : vector<8x128xf32>
    %723 = tpu.matmul %720, %722, %cst_266 {dimension_numbers = #tpu.dot_dimension_numbers<[1], [0], [0], [1], [0, 0, 1, 1], [], []>} : vector<8x32xf32>, vector<32x128xf32>, vector<8x128xf32> -> vector<8x128xf32>
    %c1_267 = arith.constant 1 : index
    %c0_268 = arith.constant 0 : index
    %c0_269 = arith.constant 0 : index
    %724 = vector.load %arg13[%c1_267, %c0_268, %c0_269] : memref<2x1x128xf32, #tpu.memory_space<vmem>>, vector<1x1x128xf32>
    %725 = vector.shape_cast %724 : vector<1x1x128xf32> to vector<1x128xf32>
    %726 = vector.broadcast %725 : vector<1x128xf32> to vector<8x128xf32>
    %727 = arith.addf %723, %726 : vector<8x128xf32>
    %cst_270 = arith.constant 5.000000e-01 : f32
    %728 = vector.broadcast %cst_270 : f32 to vector<8x128xf32>
    %729 = arith.mulf %728, %727 : vector<8x128xf32>
    %cst_271 = arith.constant 0.707106769 : f32
    %730 = vector.broadcast %cst_271 : f32 to vector<8x128xf32>
    %731 = arith.mulf %727, %730 : vector<8x128xf32>
    %732 = math.absf %731 : vector<8x128xf32>
    %cst_272 = arith.constant 0.327591091 : f32
    %733 = vector.broadcast %cst_272 : f32 to vector<8x128xf32>
    %734 = arith.mulf %733, %732 : vector<8x128xf32>
    %cst_273 = arith.constant 1.000000e+00 : f32
    %735 = vector.broadcast %cst_273 : f32 to vector<8x128xf32>
    %736 = arith.addf %735, %734 : vector<8x128xf32>
    %cst_274 = arith.constant 1.000000e+00 : f32
    %737 = vector.broadcast %cst_274 : f32 to vector<8x128xf32>
    %738 = arith.divf %737, %736 : vector<8x128xf32>
    %cst_275 = arith.constant 1.06140542 : f32
    %739 = vector.broadcast %cst_275 : f32 to vector<8x128xf32>
    %740 = arith.mulf %738, %739 : vector<8x128xf32>
    %cst_276 = arith.constant -1.45315206 : f32
    %741 = vector.broadcast %cst_276 : f32 to vector<8x128xf32>
    %742 = arith.addf %741, %740 : vector<8x128xf32>
    %743 = arith.mulf %738, %742 : vector<8x128xf32>
    %cst_277 = arith.constant 1.42141378 : f32
    %744 = vector.broadcast %cst_277 : f32 to vector<8x128xf32>
    %745 = arith.addf %744, %743 : vector<8x128xf32>
    %746 = arith.mulf %738, %745 : vector<8x128xf32>
    %cst_278 = arith.constant -0.284496725 : f32
    %747 = vector.broadcast %cst_278 : f32 to vector<8x128xf32>
    %748 = arith.addf %747, %746 : vector<8x128xf32>
    %749 = arith.mulf %738, %748 : vector<8x128xf32>
    %cst_279 = arith.constant 0.254829586 : f32
    %750 = vector.broadcast %cst_279 : f32 to vector<8x128xf32>
    %751 = arith.addf %750, %749 : vector<8x128xf32>
    %752 = arith.mulf %738, %751 : vector<8x128xf32>
    %cst_280 = arith.constant 0.000000e+00 : f32
    %753 = vector.broadcast %cst_280 : f32 to vector<8x128xf32>
    %754 = arith.subf %753, %732 : vector<8x128xf32>
    %755 = arith.mulf %754, %732 : vector<8x128xf32>
    %756 = math.exp %755 : vector<8x128xf32>
    %757 = arith.mulf %752, %756 : vector<8x128xf32>
    %cst_281 = arith.constant 1.000000e+00 : f32
    %758 = vector.broadcast %cst_281 : f32 to vector<8x128xf32>
    %759 = arith.subf %758, %757 : vector<8x128xf32>
    %cst_282 = arith.constant 0.000000e+00 : f32
    %760 = vector.broadcast %cst_282 : f32 to vector<8x128xf32>
    %761 = arith.cmpf olt, %731, %760 : vector<8x128xf32>
    %cst_283 = arith.constant 0.000000e+00 : f32
    %762 = vector.broadcast %cst_283 : f32 to vector<8x128xf32>
    %763 = arith.subf %762, %759 : vector<8x128xf32>
    %764 = arith.select %761, %763, %759 : vector<8x128xi1>, vector<8x128xf32>
    %cst_284 = arith.constant 1.000000e+00 : f32
    %765 = vector.broadcast %cst_284 : f32 to vector<8x128xf32>
    %766 = arith.addf %765, %764 : vector<8x128xf32>
    %767 = arith.mulf %729, %766 : vector<8x128xf32>
    %c1_285 = arith.constant 1 : index
    %c0_286 = arith.constant 0 : index
    %c0_287 = arith.constant 0 : index
    %768 = vector.load %arg14[%c1_285, %c0_286, %c0_287] : memref<2x128x32xf32, #tpu.memory_space<vmem>>, vector<1x128x32xf32>
    %769 = vector.shape_cast %768 : vector<1x128x32xf32> to vector<128x32xf32>
    %cst_288 = arith.constant dense<0.000000e+00> : vector<8x32xf32>
    %770 = tpu.matmul %767, %769, %cst_288 {dimension_numbers = #tpu.dot_dimension_numbers<[1], [0], [0], [1], [0, 0, 1, 1], [], []>} : vector<8x128xf32>, vector<128x32xf32>, vector<8x32xf32> -> vector<8x32xf32>
    %c1_289 = arith.constant 1 : index
    %c0_290 = arith.constant 0 : index
    %c0_291 = arith.constant 0 : index
    %771 = vector.load %arg15[%c1_289, %c0_290, %c0_291] : memref<2x1x32xf32, #tpu.memory_space<vmem>>, vector<1x1x32xf32>
    %772 = vector.shape_cast %771 : vector<1x1x32xf32> to vector<1x32xf32>
    %773 = vector.broadcast %772 : vector<1x32xf32> to vector<8x32xf32>
    %774 = arith.addf %770, %773 : vector<8x32xf32>
    %775 = arith.addf %720, %774 : vector<8x32xf32>
    %776 = vector.extract_strided_slice %483 {offsets = [2, 0], sizes = [1, 32], strides = [1, 1]} : vector<3x32xf32> to vector<1x32xf32>
    %777 = vector.extract_strided_slice %485 {offsets = [2, 0], sizes = [1, 32], strides = [1, 1]} : vector<3x32xf32> to vector<1x32xf32>
    %cst_292 = arith.constant dense<0.000000e+00> : vector<8xf32>
    %778 = vector.multi_reduction <add>, %775, %cst_292 [1] : vector<8x32xf32> to vector<8xf32>
    %779 = vector.shape_cast %778 : vector<8xf32> to vector<8x1xf32>
    %cst_293 = arith.constant 3.200000e+01 : f32
    %780 = vector.broadcast %cst_293 : f32 to vector<8x1xf32>
    %781 = arith.divf %779, %780 : vector<8x1xf32>
    %782 = vector.broadcast %781 : vector<8x1xf32> to vector<8x32xf32>
    %783 = arith.subf %775, %782 : vector<8x32xf32>
    %784 = arith.mulf %783, %783 : vector<8x32xf32>
    %cst_294 = arith.constant dense<0.000000e+00> : vector<8xf32>
    %785 = vector.multi_reduction <add>, %784, %cst_294 [1] : vector<8x32xf32> to vector<8xf32>
    %786 = vector.shape_cast %785 : vector<8xf32> to vector<8x1xf32>
    %cst_295 = arith.constant 3.200000e+01 : f32
    %787 = vector.broadcast %cst_295 : f32 to vector<8x1xf32>
    %788 = arith.divf %786, %787 : vector<8x1xf32>
    %789 = vector.broadcast %781 : vector<8x1xf32> to vector<8x32xf32>
    %790 = arith.subf %775, %789 : vector<8x32xf32>
    %cst_296 = arith.constant 9.99999974E-6 : f32
    %791 = vector.broadcast %cst_296 : f32 to vector<8x1xf32>
    %792 = arith.addf %788, %791 : vector<8x1xf32>
    %793 = math.rsqrt %792 : vector<8x1xf32>
    %794 = vector.broadcast %793 : vector<8x1xf32> to vector<8x32xf32>
    %795 = arith.mulf %790, %794 : vector<8x32xf32>
    %796 = vector.broadcast %776 : vector<1x32xf32> to vector<8x32xf32>
    %797 = arith.mulf %795, %796 : vector<8x32xf32>
    %798 = vector.broadcast %777 : vector<1x32xf32> to vector<8x32xf32>
    %799 = arith.addf %797, %798 : vector<8x32xf32>
    %cst_297 = arith.constant dense<0.000000e+00> : vector<8xf32>
    %800 = vector.multi_reduction <add>, %799, %cst_297 [1] : vector<8x32xf32> to vector<8xf32>
    %801 = vector.shape_cast %800 : vector<8xf32> to vector<8x1xf32>
    %cst_298 = arith.constant 3.200000e+01 : f32
    %802 = vector.broadcast %cst_298 : f32 to vector<8x1xf32>
    %803 = arith.divf %801, %802 : vector<8x1xf32>
    %804 = vector.broadcast %803 : vector<8x1xf32> to vector<8x32xf32>
    %805 = arith.subf %799, %804 : vector<8x32xf32>
    %806 = arith.mulf %805, %805 : vector<8x32xf32>
    %cst_299 = arith.constant dense<0.000000e+00> : vector<8xf32>
    %807 = vector.multi_reduction <add>, %806, %cst_299 [1] : vector<8x32xf32> to vector<8xf32>
    %808 = vector.shape_cast %807 : vector<8xf32> to vector<8x1xf32>
    %cst_300 = arith.constant 3.200000e+01 : f32
    %809 = vector.broadcast %cst_300 : f32 to vector<8x1xf32>
    %810 = arith.divf %808, %809 : vector<8x1xf32>
    %811 = vector.broadcast %803 : vector<8x1xf32> to vector<8x32xf32>
    %812 = arith.subf %799, %811 : vector<8x32xf32>
    %cst_301 = arith.constant 9.99999974E-6 : f32
    %813 = vector.broadcast %cst_301 : f32 to vector<8x1xf32>
    %814 = arith.addf %810, %813 : vector<8x1xf32>
    %815 = math.rsqrt %814 : vector<8x1xf32>
    %816 = vector.broadcast %815 : vector<8x1xf32> to vector<8x32xf32>
    %817 = arith.mulf %812, %816 : vector<8x32xf32>
    %818 = vector.broadcast %3 : vector<1x32xf32> to vector<8x32xf32>
    %819 = arith.mulf %817, %818 : vector<8x32xf32>
    %820 = vector.broadcast %4 : vector<1x32xf32> to vector<8x32xf32>
    %821 = arith.addf %819, %820 : vector<8x32xf32>
    %cst_302 = arith.constant dense<0.000000e+00> : vector<8x128xf32>
    %822 = tpu.matmul %821, %5, %cst_302 {dimension_numbers = #tpu.dot_dimension_numbers<[1], [0], [0], [1], [0, 0, 1, 1], [], []>} : vector<8x32xf32>, vector<32x128xf32>, vector<8x128xf32> -> vector<8x128xf32>
    %823 = vector.broadcast %6 : vector<1x128xf32> to vector<8x128xf32>
    %824 = arith.addf %822, %823 : vector<8x128xf32>
    %c0_303 = arith.constant 0 : index
    %c2 = arith.constant 2 : index
    %c0_304 = arith.constant 0 : index
    %c0_305 = arith.constant 0 : index
    %825 = vector.load %arg22[%c0_303, %c2, %c0_304, %c0_305] : memref<1x3x8x128xf32, #tpu.memory_space<vmem>>, vector<1x1x8x128xf32>
    %826 = vector.shape_cast %825 : vector<1x1x8x128xf32> to vector<8x128xf32>
    %827 = vector.shape_cast %824 : vector<8x128xf32> to vector<1x1x8x128xf32>
    tpu.vector_store %arg22[%c0_303, %c2, %c0_304, %c0_305], %827 {strides = array<i32>} : memref<1x3x8x128xf32, #tpu.memory_space<vmem>>, vector<1x1x8x128xf32>,
    %828 = vector.extract_strided_slice %7 {offsets = [0, 0, 0], sizes = [1, 32, 32], strides = [1, 1, 1]} : vector<3x32x32xf32> to vector<1x32x32xf32>
    %829 = vector.shape_cast %828 : vector<1x32x32xf32> to vector<32x32xf32>
    %cst_306 = arith.constant dense<0.000000e+00> : vector<8x32xf32>
    %830 = tpu.matmul %821, %829, %cst_306 {dimension_numbers = #tpu.dot_dimension_numbers<[1], [0], [0], [1], [0, 0, 1, 1], [], []>} : vector<8x32xf32>, vector<32x32xf32>, vector<8x32xf32> -> vector<8x32xf32>
    %831 = vector.extract_strided_slice %8 {offsets = [0, 0], sizes = [1, 32], strides = [1, 1]} : vector<3x32xf32> to vector<1x32xf32>
    %832 = vector.broadcast %831 : vector<1x32xf32> to vector<8x32xf32>
    %833 = arith.addf %830, %832 : vector<8x32xf32>
    %cst_307 = arith.constant 0.000000e+00 : f32
    %834 = vector.broadcast %cst_307 : f32 to vector<8x32xf32>
    %835 = arith.maximumf %833, %834 : vector<8x32xf32>
    %836 = vector.extract_strided_slice %7 {offsets = [1, 0, 0], sizes = [1, 32, 32], strides = [1, 1, 1]} : vector<3x32x32xf32> to vector<1x32x32xf32>
    %837 = vector.shape_cast %836 : vector<1x32x32xf32> to vector<32x32xf32>
    %cst_308 = arith.constant dense<0.000000e+00> : vector<8x32xf32>
    %838 = tpu.matmul %835, %837, %cst_308 {dimension_numbers = #tpu.dot_dimension_numbers<[1], [0], [0], [1], [0, 0, 1, 1], [], []>} : vector<8x32xf32>, vector<32x32xf32>, vector<8x32xf32> -> vector<8x32xf32>
    %839 = vector.extract_strided_slice %8 {offsets = [1, 0], sizes = [1, 32], strides = [1, 1]} : vector<3x32xf32> to vector<1x32xf32>
    %840 = vector.broadcast %839 : vector<1x32xf32> to vector<8x32xf32>
    %841 = arith.addf %838, %840 : vector<8x32xf32>
    %cst_309 = arith.constant 0.000000e+00 : f32
    %842 = vector.broadcast %cst_309 : f32 to vector<8x32xf32>
    %843 = arith.maximumf %841, %842 : vector<8x32xf32>
    %844 = vector.extract_strided_slice %7 {offsets = [2, 0, 0], sizes = [1, 32, 32], strides = [1, 1, 1]} : vector<3x32x32xf32> to vector<1x32x32xf32>
    %845 = vector.shape_cast %844 : vector<1x32x32xf32> to vector<32x32xf32>
    %cst_310 = arith.constant dense<0.000000e+00> : vector<8x32xf32>
    %846 = tpu.matmul %843, %845, %cst_310 {dimension_numbers = #tpu.dot_dimension_numbers<[1], [0], [0], [1], [0, 0, 1, 1], [], []>} : vector<8x32xf32>, vector<32x32xf32>, vector<8x32xf32> -> vector<8x32xf32>
    %847 = vector.extract_strided_slice %8 {offsets = [2, 0], sizes = [1, 32], strides = [1, 1]} : vector<3x32xf32> to vector<1x32xf32>
    %848 = vector.broadcast %847 : vector<1x32xf32> to vector<8x32xf32>
    %849 = arith.addf %846, %848 : vector<8x32xf32>
    %cst_311 = arith.constant dense<0.000000e+00> : vector<8x64xf32>
    %850 = tpu.matmul %849, %2, %cst_311 {dimension_numbers = #tpu.dot_dimension_numbers<[1], [0], [0], [1], [0, 0, 1, 1], [], []>} : vector<8x32xf32>, vector<32x64xf32>, vector<8x64xf32> -> vector<8x64xf32>
    %c0_312 = arith.constant 0 : index
    %c2_313 = arith.constant 2 : index
    %c0_314 = arith.constant 0 : index
    %c0_315 = arith.constant 0 : index
    %851 = vector.load %arg23[%c0_312, %c2_313, %c0_314, %c0_315] : memref<1x3x8x64xf32, #tpu.memory_space<vmem>>, vector<1x1x8x64xf32>
    %852 = vector.shape_cast %851 : vector<1x1x8x64xf32> to vector<8x64xf32>
    %853 = vector.shape_cast %850 : vector<8x64xf32> to vector<1x1x8x64xf32>
    tpu.vector_store %arg23[%c0_312, %c2_313, %c0_314, %c0_315], %853 {strides = array<i32>} : memref<1x3x8x64xf32, #tpu.memory_space<vmem>>, vector<1x1x8x64xf32>,
    return
  }
  func.func @transform_0(%arg0: i32) -> (i32, i32) {
    %c0_i32 = arith.constant 0 : i32
    %c0_i32_0 = arith.constant 0 : i32
    %c0_i32_1 = arith.constant 0 : i32
    return %c0_i32, %c0_i32_0 : i32, i32
  }
  func.func @transform_1(%arg0: i32) -> (i32, i32) {
    %c0_i32 = arith.constant 0 : i32
    %c0_i32_0 = arith.constant 0 : i32
    %c0_i32_1 = arith.constant 0 : i32
    return %c0_i32, %c0_i32_0 : i32, i32
  }
  func.func @transform_2(%arg0: i32) -> (i32, i32, i32, i32) {
    %c0_i32 = arith.constant 0 : i32
    %c0_i32_0 = arith.constant 0 : i32
    %c0_i32_1 = arith.constant 0 : i32
    %c0_i32_2 = arith.constant 0 : i32
    return %arg0, %c0_i32, %c0_i32_0, %c0_i32_1 : i32, i32, i32, i32
  }
  func.func @transform_3(%arg0: i32) -> (i32, i32, i32) {
    %c0_i32 = arith.constant 0 : i32
    %c0_i32_0 = arith.constant 0 : i32
    %c0_i32_1 = arith.constant 0 : i32
    %c0_i32_2 = arith.constant 0 : i32
    return %c0_i32, %c0_i32_0, %c0_i32_1 : i32, i32, i32
  }
  func.func @transform_4(%arg0: i32) -> (i32, i32, i32) {
    %c0_i32 = arith.constant 0 : i32
    %c0_i32_0 = arith.constant 0 : i32
    %c0_i32_1 = arith.constant 0 : i32
    return %arg0, %c0_i32, %c0_i32_0 : i32, i32, i32
  }
  func.func @transform_5(%arg0: i32) -> (i32, i32, i32) {
    %c0_i32 = arith.constant 0 : i32
    %c0_i32_0 = arith.constant 0 : i32
    %c0_i32_1 = arith.constant 0 : i32
    %c0_i32_2 = arith.constant 0 : i32
    return %c0_i32, %c0_i32_0, %c0_i32_1 : i32, i32, i32
  }
  func.func @transform_6(%arg0: i32) -> (i32, i32, i32) {
    %c0_i32 = arith.constant 0 : i32
    %c0_i32_0 = arith.constant 0 : i32
    %c0_i32_1 = arith.constant 0 : i32
    %c0_i32_2 = arith.constant 0 : i32
    return %c0_i32, %c0_i32_0, %c0_i32_1 : i32, i32, i32
  }
  func.func @transform_7(%arg0: i32) -> (i32, i32, i32) {
    %c0_i32 = arith.constant 0 : i32
    %c0_i32_0 = arith.constant 0 : i32
    %c0_i32_1 = arith.constant 0 : i32
    %c0_i32_2 = arith.constant 0 : i32
    return %c0_i32, %c0_i32_0, %c0_i32_1 : i32, i32, i32
  }
  func.func @transform_8(%arg0: i32) -> (i32, i32, i32) {
    %c0_i32 = arith.constant 0 : i32
    %c0_i32_0 = arith.constant 0 : i32
    %c0_i32_1 = arith.constant 0 : i32
    %c0_i32_2 = arith.constant 0 : i32
    return %c0_i32, %c0_i32_0, %c0_i32_1 : i32, i32, i32
  }
  func.func @transform_9(%arg0: i32) -> (i32, i32, i32) {
    %c0_i32 = arith.constant 0 : i32
    %c0_i32_0 = arith.constant 0 : i32
    %c0_i32_1 = arith.constant 0 : i32
    %c0_i32_2 = arith.constant 0 : i32
    return %c0_i32, %c0_i32_0, %c0_i32_1 : i32, i32, i32
  }
  func.func @transform_10(%arg0: i32) -> (i32, i32, i32) {
    %c0_i32 = arith.constant 0 : i32
    %c0_i32_0 = arith.constant 0 : i32
    %c0_i32_1 = arith.constant 0 : i32
    %c0_i32_2 = arith.constant 0 : i32
    return %c0_i32, %c0_i32_0, %c0_i32_1 : i32, i32, i32
  }
  func.func @transform_11(%arg0: i32) -> (i32, i32, i32) {
    %c0_i32 = arith.constant 0 : i32
    %c0_i32_0 = arith.constant 0 : i32
    %c0_i32_1 = arith.constant 0 : i32
    %c0_i32_2 = arith.constant 0 : i32
    return %c0_i32, %c0_i32_0, %c0_i32_1 : i32, i32, i32
  }
  func.func @transform_12(%arg0: i32) -> (i32, i32, i32) {
    %c0_i32 = arith.constant 0 : i32
    %c0_i32_0 = arith.constant 0 : i32
    %c0_i32_1 = arith.constant 0 : i32
    %c0_i32_2 = arith.constant 0 : i32
    return %c0_i32, %c0_i32_0, %c0_i32_1 : i32, i32, i32
  }
  func.func @transform_13(%arg0: i32) -> (i32, i32, i32) {
    %c0_i32 = arith.constant 0 : i32
    %c0_i32_0 = arith.constant 0 : i32
    %c0_i32_1 = arith.constant 0 : i32
    %c0_i32_2 = arith.constant 0 : i32
    return %c0_i32, %c0_i32_0, %c0_i32_1 : i32, i32, i32
  }
  func.func @transform_14(%arg0: i32) -> (i32, i32, i32) {
    %c0_i32 = arith.constant 0 : i32
    %c0_i32_0 = arith.constant 0 : i32
    %c0_i32_1 = arith.constant 0 : i32
    %c0_i32_2 = arith.constant 0 : i32
    return %c0_i32, %c0_i32_0, %c0_i32_1 : i32, i32, i32
  }
  func.func @transform_15(%arg0: i32) -> (i32, i32) {
    %c0_i32 = arith.constant 0 : i32
    %c0_i32_0 = arith.constant 0 : i32
    %c0_i32_1 = arith.constant 0 : i32
    return %c0_i32, %c0_i32_0 : i32, i32
  }
  func.func @transform_16(%arg0: i32) -> (i32, i32) {
    %c0_i32 = arith.constant 0 : i32
    %c0_i32_0 = arith.constant 0 : i32
    %c0_i32_1 = arith.constant 0 : i32
    return %c0_i32, %c0_i32_0 : i32, i32
  }
  func.func @transform_17(%arg0: i32) -> (i32, i32) {
    %c0_i32 = arith.constant 0 : i32
    %c0_i32_0 = arith.constant 0 : i32
    %c0_i32_1 = arith.constant 0 : i32
    return %c0_i32, %c0_i32_0 : i32, i32
  }
  func.func @transform_18(%arg0: i32) -> (i32, i32) {
    %c0_i32 = arith.constant 0 : i32
    %c0_i32_0 = arith.constant 0 : i32
    %c0_i32_1 = arith.constant 0 : i32
    return %c0_i32, %c0_i32_0 : i32, i32
  }
  func.func @transform_19(%arg0: i32) -> (i32, i32, i32) {
    %c0_i32 = arith.constant 0 : i32
    %c0_i32_0 = arith.constant 0 : i32
    %c0_i32_1 = arith.constant 0 : i32
    %c0_i32_2 = arith.constant 0 : i32
    return %c0_i32, %c0_i32_0, %c0_i32_1 : i32, i32, i32
  }
  func.func @transform_20(%arg0: i32) -> (i32, i32) {
    %c0_i32 = arith.constant 0 : i32
    %c0_i32_0 = arith.constant 0 : i32
    %c0_i32_1 = arith.constant 0 : i32
    return %c0_i32, %c0_i32_0 : i32, i32
  }
  func.func @transform_21(%arg0: i32) -> (i32, i32, i32, i32) {
    %c0_i32 = arith.constant 0 : i32
    %c0_i32_0 = arith.constant 0 : i32
    %c0_i32_1 = arith.constant 0 : i32
    %c0_i32_2 = arith.constant 0 : i32
    return %arg0, %c0_i32, %c0_i32_0, %c0_i32_1 : i32, i32, i32, i32
  }
  func.func @transform_22(%arg0: i32) -> (i32, i32, i32, i32) {
    %c0_i32 = arith.constant 0 : i32
    %c0_i32_0 = arith.constant 0 : i32
    %c0_i32_1 = arith.constant 0 : i32
    %c0_i32_2 = arith.constant 0 : i32
    return %arg0, %c0_i32, %c0_i32_0, %c0_i32_1 : i32, i32, i32, i32
  }
}

</mosaic_0001>

<bundles_post_ra>
// kernel: squeeze.13
= control target key start
LH: loop header
LB: loop body
LE: loop exit
PB: predicated region body
PF: predicated region fallthrough
CT: control target
= control target key end

     0   :  { %vm4_vm0 = vcmask 64512   ;;  %s184_s10 = smov 120   ;;  %s251_s0 = inlined_call_operand.vmem [shape: f32[2,1,8,64], index: 0, kind: input, shape index: {}]   ;;  %s252_s1 = inlined_call_operand.hbm [shape: f32[2,8,8,8], index: 1, kind: output, shape index: {}]  }
   0x1   :  { %v31_v0 = vld [vmem:[%s251_s0] sm:$0xff]   ;;  %v145_v1 = vld [vmem:[%s251_s0 + $0x8] sm:$0xff]   ;;  %s183_s0 = smov 112  }
   0x2   :  { %32 = vrot.lane.b32.xlu1 %v31_v0, %s183_s0  ;;  %15 = vrot.lane.b32.xlu0 %v31_v0, %s184_s10 }
   0x3   :  { %2 = vsyncpa [#allocation1], 0  ;;  %5 = vst.msk [vmem:[#allocation0] ss:$8 sm:$0xf] %vm4_vm0, %v31_v0   ;;  %s185_s11 = smov 104  }
   0x4   :  { %6 = vst.msk [vmem:[#allocation0] ss:$8 sm:$0xf0] %vm4_vm0, %v31_v0   ;;  %11 = vst.msk [vmem:[#allocation0 + $0x40] ss:$8 sm:$0xf] %vm4_vm0, %v145_v1  }
   0x5   :  { %13 = vst.msk [vmem:[#allocation0 + $0x40] ss:$8 sm:$0xf0] %vm4_vm0, %v145_v1   ;;  %s186_s12 = smov 96   ;;  %s187_s13 = smov 88  }
   0x6   :  { %41 = vrot.lane.b32.xlu1 %v145_v1, %s183_s0  ;;  %24 = vrot.lane.b32.xlu0 %v145_v1, %s184_s10  ;;  %s188_s14 = smov 80   ;;  %s189_s15 = smov 72  }
   0x7   :  { %s190_s16 = smov [#allocation0]  }
   0x8   :  { %s137_s17 = sshll.u32 %s190_s16, 4  ;;  %s138_s17 = int_to_ptr.vmem [resolvable:$true] %s137_s17 }
   0x9   :  { %s159_s18 = scalar_lea.vmem %s138_s17, 2048  ;;  %p164_p1 = scmp.lt.s32.totalorder %s138_s17, %s138_s17 }
   0xa   :  { %58 = vrot.lane.b32.xlu1 %v145_v1, %s185_s11  ;;  %49 = vrot.lane.b32.xlu0 %v31_v0, %s185_s11  ;;  %p160_p0 = scmp.ne.s32.totalorder %s138_s17, %s159_s18  ;;  %p165_p2 = scmp.lt.s32.totalorder %s159_s18, %s159_s18 }
   0xc   :  { %p166_p3 = por %p165_p2, %p164_p1 }
   0xe   :  { %75 = vrot.lane.b32.xlu1 %v145_v1, %s186_s12  ;;  %66 = vrot.lane.b32.xlu0 %v31_v0, %s186_s12  ;;  %p167_p4 = pnand %p166_p3, %p160_p0 }
  0x12   :  { %92 = vrot.lane.b32.xlu1 %v145_v1, %s187_s13  ;;  %83 = vrot.lane.b32.xlu0 %v31_v0, %s187_s13 }
  0x16   :  { %109 = vrot.lane.b32.xlu1 %v145_v1, %s188_s14  ;;  %100 = vrot.lane.b32.xlu0 %v31_v0, %s188_s14 }
  0x1a   :  { %126 = vrot.lane.b32.xlu1 %v145_v1, %s189_s15  ;;  %117 = vrot.lane.b32.xlu0 %v31_v0, %s189_s15 }
  0x74   :  { %v33_v2 = vpop.permute.xlu1 %32   ;;  %v16_v3 = vpop.permute.xlu0 %15  }
  0x75   :  { %36 = vst.msk [vmem:[#allocation0 + $0x2] ss:$8 sm:$0xf] %vm4_vm0, %v33_v2   ;;  %38 = vst.msk [vmem:[#allocation0 + $0x2] ss:$8 sm:$0xf0] %vm4_vm0, %v33_v2  }
  0x76   :  { %19 = vst.msk [vmem:[#allocation0 + $0x1] ss:$8 sm:$0xf] %vm4_vm0, %v16_v3   ;;  %21 = vst.msk [vmem:[#allocation0 + $0x1] ss:$8 sm:$0xf0] %vm4_vm0, %v16_v3  }
  0x78   :  { %v42_v4 = vpop.permute.xlu1 %41   ;;  %v25_v5 = vpop.permute.xlu0 %24  }
  0x79   :  { %45 = vst.msk [vmem:[#allocation0 + $0x42] ss:$8 sm:$0xf] %vm4_vm0, %v42_v4   ;;  %47 = vst.msk [vmem:[#allocation0 + $0x42] ss:$8 sm:$0xf0] %vm4_vm0, %v42_v4  }
  0x7a   :  { %28 = vst.msk [vmem:[#allocation0 + $0x41] ss:$8 sm:$0xf] %vm4_vm0, %v25_v5   ;;  %30 = vst.msk [vmem:[#allocation0 + $0x41] ss:$8 sm:$0xf0] %vm4_vm0, %v25_v5  }
  0x7c   :  { %v59_v6 = vpop.permute.xlu1 %58   ;;  %v50_v7 = vpop.permute.xlu0 %49  }
  0x7d   :  { %62 = vst.msk [vmem:[#allocation0 + $0x43] ss:$8 sm:$0xf] %vm4_vm0, %v59_v6   ;;  %64 = vst.msk [vmem:[#allocation0 + $0x43] ss:$8 sm:$0xf0] %vm4_vm0, %v59_v6  }
  0x7e   :  { %53 = vst.msk [vmem:[#allocation0 + $0x3] ss:$8 sm:$0xf] %vm4_vm0, %v50_v7   ;;  %55 = vst.msk [vmem:[#allocation0 + $0x3] ss:$8 sm:$0xf0] %vm4_vm0, %v50_v7  }
  0x80   :  { %v76_v8 = vpop.permute.xlu1 %75   ;;  %v67_v9 = vpop.permute.xlu0 %66  }
  0x81   :  { %79 = vst.msk [vmem:[#allocation0 + $0x44] ss:$8 sm:$0xf] %vm4_vm0, %v76_v8   ;;  %81 = vst.msk [vmem:[#allocation0 + $0x44] ss:$8 sm:$0xf0] %vm4_vm0, %v76_v8  }
  0x82   :  { %70 = vst.msk [vmem:[#allocation0 + $0x4] ss:$8 sm:$0xf] %vm4_vm0, %v67_v9   ;;  %72 = vst.msk [vmem:[#allocation0 + $0x4] ss:$8 sm:$0xf0] %vm4_vm0, %v67_v9  }
  0x84   :  { %v93_v10 = vpop.permute.xlu1 %92   ;;  %v84_v11 = vpop.permute.xlu0 %83  }
  0x85   :  { %96 = vst.msk [vmem:[#allocation0 + $0x45] ss:$8 sm:$0xf] %vm4_vm0, %v93_v10   ;;  %98 = vst.msk [vmem:[#allocation0 + $0x45] ss:$8 sm:$0xf0] %vm4_vm0, %v93_v10  }
  0x86   :  { %87 = vst.msk [vmem:[#allocation0 + $0x5] ss:$8 sm:$0xf] %vm4_vm0, %v84_v11   ;;  %89 = vst.msk [vmem:[#allocation0 + $0x5] ss:$8 sm:$0xf0] %vm4_vm0, %v84_v11  }
  0x88   :  { %v110_v12 = vpop.permute.xlu1 %109   ;;  %v101_v13 = vpop.permute.xlu0 %100  }
  0x89   :  { %113 = vst.msk [vmem:[#allocation0 + $0x46] ss:$8 sm:$0xf] %vm4_vm0, %v110_v12   ;;  %115 = vst.msk [vmem:[#allocation0 + $0x46] ss:$8 sm:$0xf0] %vm4_vm0, %v110_v12  }
  0x8a   :  { %104 = vst.msk [vmem:[#allocation0 + $0x6] ss:$8 sm:$0xf] %vm4_vm0, %v101_v13   ;;  %106 = vst.msk [vmem:[#allocation0 + $0x6] ss:$8 sm:$0xf0] %vm4_vm0, %v101_v13  }
  0x8c   :  { %v127_v14 = vpop.permute.xlu1 %126   ;;  %v118_v15 = vpop.permute.xlu0 %117  }
  0x8d   :  { %130 = vst.msk [vmem:[#allocation0 + $0x47] ss:$8 sm:$0xf] %vm4_vm0, %v127_v14   ;;  %132 = vst.msk [vmem:[#allocation0 + $0x47] ss:$8 sm:$0xf0] %vm4_vm0, %v127_v14  }
  0x8e   :  { %121 = vst.msk [vmem:[#allocation0 + $0x7] ss:$8 sm:$0xf] %vm4_vm0, %v118_v15   ;;  %123 = vst.msk [vmem:[#allocation0 + $0x7] ss:$8 sm:$0xf0] %vm4_vm0, %v118_v15  }
  0x8f   :  { %170 = shalt.err (!%p167_p4)
}
  0x90   :  { %s171_s21 = scalar_lea.hbm %s252_s1, 2048 }
  0x91   :  { %p172_p5 = scmp.ne.s32.totalorder %s252_s1, %s171_s21  ;;  %p175_p6 = scmp.lt.u32.totalorder %s171_s21, %s252_s1 }
  0x93   :  { %p177_p7 = pnand %p175_p6, %p172_p5 }
  0x95   :  { %180 = shalt.err (!%p177_p7)
}
  0x96   :  { %140 = dma.vmem_to_hbm [thread:$0]  %s138_s17, 2048, %s252_s1, [#allocation1]  }
  0x97   :  { %181 = dma.done.wait [#allocation1], 2048  }
  0x98   :  { %182 = vsyncadd [#allocation1], 4294965248 }
  0x99   :  { %142 = vsyncpa [#allocation1], 1 }

// kernel: transformer_decoder_forward.1
= control target key start
LH: loop header
LB: loop body
LE: loop exit
PB: predicated region body
PF: predicated region fallthrough
CT: control target
= control target key end

     0   :  { %s10838_s0 = inlined_call_operand.vmem [shape: f32[8,32], index: 0, kind: input, shape index: {}]   ;;  %s10839_s1 = inlined_call_operand.vmem [shape: f32[8,32], index: 1, kind: input, shape index: {}]   ;;  %s10840_s2 = inlined_call_operand.vmem [shape: f32[2,3,64,32], index: 2, kind: input, shape index: {}]   ;;  %s10841_s3 = inlined_call_operand.vmem [shape: f32[2,64,32], index: 3, kind: input, shape index: {}]   ;;  %s10842_s4 = inlined_call_operand.vmem [shape: f32[2,32,64], index: 4, kind: input, shape index: {}]   ;;  %s10843_s5 = inlined_call_operand.vmem [shape: f32[2,32,128], index: 5, kind: input, shape index: {}]   ;;  %s10844_s6 = inlined_call_operand.vmem [shape: f32[2,4,32], index: 6, kind: input, shape index: {}]   ;;  %s10845_s7 = inlined_call_operand.vmem [shape: f32[2,32,128], index: 7, kind: input, shape index: {}]   ;;  %s10846_s8 = inlined_call_operand.vmem [shape: f32[2,4,32], index: 8, kind: input, shape index: {}]   ;;  %s10847_s9 = inlined_call_operand.vmem [shape: f32[2,3,32], index: 9, kind: input, shape index: {}]   ;;  %s10848_s10 = inlined_call_operand.vmem [shape: f32[2,3,32], index: 10, kind: input, shape index: {}]   ;;  %s10849_s11 = inlined_call_operand.vmem [shape: f32[2,32,128], index: 11, kind: input, shape index: {}]   ;;  %s10850_s12 = inlined_call_operand.vmem [shape: f32[2,1,128], index: 12, kind: input, shape index: {}]   ;;  %s10851_s13 = inlined_call_operand.vmem [shape: f32[2,128,32], index: 13, kind: input, shape index: {}]   ;;  %s10852_s14 = inlined_call_operand.vmem [shape: f32[2,1,32], index: 14, kind: input, shape index: {}]   ;;  %s10853_s15 = inlined_call_operand.vmem [shape: f32[1,32], index: 15, kind: input, shape index: {}]   ;;  %s10854_s16 = inlined_call_operand.vmem [shape: f32[1,32], index: 16, kind: input, shape index: {}]   ;;  %s10855_s17 = inlined_call_operand.vmem [shape: f32[32,128], index: 17, kind: input, shape index: {}]   ;;  %s10856_s18 = inlined_call_operand.vmem [shape: f32[1,128], index: 18, kind: input, shape index: {}]   ;;  %s10857_s19 = inlined_call_operand.vmem [shape: f32[3,32,32], index: 19, kind: input, shape index: {}]   ;;  %s10858_s20 = inlined_call_operand.vmem [shape: f32[3,32], index: 20, kind: input, shape index: {}]   ;;  %s10859_s21 = inlined_call_operand.vmem [shape: f32[2,3,8,128], index: 21, kind: output, shape index: {0}]   ;;  %s10860_s22 = inlined_call_operand.vmem [shape: f32[2,3,8,64], index: 22, kind: output, shape index: {1}]  }
   0x1   :  { %10896 = sst [smem:[#allocation3_spill]] %s10838_s0 }
   0x2   :  { %10897 = sst [smem:[#allocation4_spill]] %s10839_s1 }
   0x3   :  { %10898 = sst [smem:[#allocation5_spill]] %s10840_s2 }
   0x4   :  { %10899 = sst [smem:[#allocation6_spill]] %s10841_s3  ;;  %s9443_s3 = smov 0  }
   0x5   :  { %10900 = sst [smem:[#allocation7_spill]] %s10842_s4 }
   0x6   :  { %10901 = sst [smem:[#allocation8_spill]] %s10843_s5 }
   0x7   :  { %10902 = sst [smem:[#allocation9_spill]] %s10844_s6 }
   0x8   :  { %10903 = sst [smem:[#allocation10_spill]] %s10845_s7 }
   0x9   :  { %10904 = sst [smem:[#allocation11_spill]] %s10846_s8 }
   0xa   :  { %10905 = sst [smem:[#allocation12_spill]] %s10847_s9 }
   0xb   :  { %10906 = sst [smem:[#allocation13_spill]] %s10848_s10 }
   0xc   :  { %10907 = sst [smem:[#allocation14_spill]] %s10855_s17 }
   0xd   :  { %10908 = sst [smem:[#allocation15_spill]] %s10857_s19 }
   0xe   :  { %10909 = sst [smem:[#allocation16_spill]] %s10858_s20 }
   0xf   :  { %10910 = sst [smem:[#allocation17_spill]] %s10859_s21 }
  0x10   :  { %10911 = sst [smem:[#allocation18_spill]] %s10860_s22 }
  0x11 LB: > { %10912 = sst [smem:[#allocation2_spill]] %s9311_s3  ;;  %s6990_s28 = sadd.s32 4294967295, %s9311_s3   ;;  %s9311_s3 = sphi %s9443_s3, %s33_s3  }
  0x12   : > { %p6994_p0 = scmp.ge.s32.totalorder %s9311_s3, 1  ;;  %p625_p1 = scmp.lt.s32.totalorder %s9311_s3, 3 }
  0x14   : > { %p626_p2 = pnand %p6994_p0, %p625_p1 }
  0x15   : > { %s10913_s4 = sld [smem:[#allocation3_spill]] (!%p626_p2)  ;;  %vm743_vm0 = vcmask (!%p626_p2), 261120   ;;  %s10914_s17 = sld [smem:[#allocation14_spill]] (!%p626_p2)  ;;  %v9313_v10 = vmov (!%p626_p2), 0.0|0.0   ;;  %vm9314_vm1 = vmmov (!%p626_p2), 0   ;;  %v9315_v18 = vmov (!%p626_p2), 0.0  }
  0x16   : > { %629 = sbr.rel (%p626_p2) target bundleno = 14952 (0x3a68), region = 104  ;;  %s10915_s19 = sld [smem:[#allocation15_spill]] (!%p626_p2)  ;;  %8371 = vmatprep.subr.bf16.mxu0 (!%p626_p2), %v9313_v10  ;;  %8377 = vmatprep.subr.bf16.mxu1 (!%p626_p2), %v9313_v10  ;;  %v7000_v25 = vld [vmem:[%s10853_s15] ss:$0 sm:$0xff] (!%p626_p2)  ;;  %v852_v39 = vlaneseq (!%p626_p2)  ;;  %vm1155_vm2 = vcmask (!%p626_p2), 523264   ;;  %vm1454_vm3 = vcmask (!%p626_p2), 64512  }
  0x17   : > { %7588 = vmatprep.mubr.msk.f32.mxu0 (!%p626_p2), %vm9314_vm1, %v9315_v18  ;;  %7599 = vmatprep.mubr.msk.f32.mxu1 (!%p626_p2), %vm9314_vm1, %v9315_v18  ;;  %v7001_v29 = vld [vmem:[%s10854_s16] ss:$0 sm:$0xff] (!%p626_p2)  ;;  %p697_p3 = scmp.lt.s32.totalorder (!%p626_p2), %s6990_s28, 1  ;;  %s10916_s20 = sld [smem:[#allocation16_spill]] (!%p626_p2)  ;;  %vm9716_vm4 = vmpackc.low (!%p626_p2), %vm1454_vm3, %vm1454_vm3  ;;  %vm2323_vm8 = vcmask (!%p626_p2), 130048   ;;  %vm2325_vm9 = vcmask (!%p626_p2), 195584  }
  0x18   : > { %v9550_v40 = vshrl.u32 (!%p626_p2), %v852_v39, 7  ;;  %v7002_v44 = vld [vmem:[%s10856_s18] ss:$0 sm:$0xff] (!%p626_p2)  ;;  %s10917_s21 = sld [smem:[#allocation17_spill]] (!%p626_p2)  ;;  %s10918_s30 = sld [smem:[#allocation8_spill]] (!%p626_p2) }
  0x19   : > { %s10867_s27 = smov (!%p626_p2), 96   ;;  %s10921_s24 = sld [smem:[#allocation5_spill]] (!%p626_p2) }
  0x1a   : > { %v9557_v41 = vsub.s32 (!%p626_p2), 0, %v9550_v40  ;;  %s10923_s22 = sld [smem:[#allocation18_spill]] (!%p626_p2)  ;;  %s10928_s23 = smov (!%p626_p2), 96  }
  0x1b   : > { %v9454_v0 = vld [vmem:[%s10913_s4] sm:$0xff] (!%p626_p2)  ;;  %v725_v8 = vld [vmem:[%s10914_s17 + $0x8] sm:$0xff] (!%p626_p2)  ;;  %v726_v13 = vld [vmem:[%s10914_s17 + $0x10] sm:$0xff] (!%p626_p2)  ;;  %s10881_s1 = smov (!%p626_p2), 120   ;;  %s10877_s26 = smov (!%p626_p2), 112  }
  0x1c   : > { %v744_v1 = vsel (!%p626_p2), %vm743_vm0, %v9454_v0, 0.0  ;;  %v724_v7 = vld [vmem:[%s10914_s17] sm:$0xff] (!%p626_p2)  ;;  %v730_v12 = vld [vmem:[%s10915_s19 + $0x8] sm:$0xff] (!%p626_p2)  ;;  %v727_v14 = vld [vmem:[%s10914_s17 + $0x18] sm:$0xff] (!%p626_p2)  ;;  %s10929_s7 = sld [smem:[#allocation10_spill]] (!%p626_p2)  ;;  %s10930_s8 = sld [smem:[#allocation11_spill]] (!%p626_p2) }
  0x1d   : > { %745 = vadd.xlane.f32.xlu0 %v744_v1  ;;  %v729_v9 = vld [vmem:[%s10915_s19] sm:$0xff]  ;;  %v9471_v11 = vpack.c.bf16 %v725_v8, %v724_v7  ;;  %v731_v16 = vld [vmem:[%s10915_s19 + $0x10] sm:$0xff]  ;;  %v732_v17 = vld [vmem:[%s10915_s19 + $0x18] sm:$0xff]  ;;  %v9495_v19 = vpack.c.bf16 %v727_v14, %v726_v13  ;;  %s10952_s28 = smov (!%p697_p3, %s6990_s28), 1  ;;  %s10932_s9 = sld [smem:[#allocation12_spill]] }
  0x1e   : > { %v9482_v15 = vpack.c.bf16 %v730_v12, %v729_v9  ;;  %v9499_v20 = vpack.c.bf16 %v732_v17, %v731_v16  ;;  %v733_v27 = vld [vmem:[%s10915_s19 + $0x20] sm:$0xff]  ;;  %v734_v28 = vld [vmem:[%s10915_s19 + $0x28] sm:$0xff]  ;;  %v735_v33 = vld [vmem:[%s10915_s19 + $0x30] sm:$0xff]  ;;  %s10866_s29 = smul.u32 24, %s10952_s28  ;;  %s7210_s6 = sshll.u32 %s10952_s28, 5 }
  0x1f   : > { %8373 = vmatpush3.bf16.msra.mxu0 %v9471_v11  ;;  %v9518_v31 = vpack.c.bf16 %v734_v28, %v733_v27  ;;  %v736_v34 = vld [vmem:[%s10915_s19 + $0x38] sm:$0xff]  ;;  %v737_v36 = vld [vmem:[%s10915_s19 + $0x40] sm:$0xff]  ;;  %v738_v37 = vld [vmem:[%s10915_s19 + $0x48] sm:$0xff]  ;;  %s8821_s0 = smul.u32 192, %s10952_s28  ;;  %s10933_s10 = sld [smem:[#allocation13_spill]] }
  0x20   : > { %8379 = vmatpush3.bf16.msra.mxu1 %v9482_v15  ;;  %8374 = vmatprep.subr.bf16.mxu0 %v9313_v10  ;;  %v9534_v35 = vpack.c.bf16 %v736_v34, %v735_v33  ;;  %v9544_v38 = vpack.c.bf16 %v738_v37, %v737_v36  ;;  %v9562_v42 = vld [vmem:[%s10916_s20] sm:$0x7]  ;;  %s9577_s5 = scalar_lea.vmem %s10917_s21, %s10866_s29  ;;  %v739_v52 = vld [vmem:[%s10915_s19 + $0x50] sm:$0xff]  ;;  %v740_v53 = vld [vmem:[%s10915_s19 + $0x58] sm:$0xff]  ;;  %s10919_s19 = sld [smem:[#allocation7_spill]] }
  0x21   : > { %8380 = vmatprep.subr.bf16.mxu1 %v9313_v10  ;;  %v9567_v43 = vrot.slane %v9562_v42, %v9557_v41  ;;  %v9590_v54 = vpack.c.bf16 %v740_v53, %v739_v52  ;;  %v1182_v55 = vld [vmem:[%s10918_s30] sm:$0xff]  ;;  %v1183_v56 = vld [vmem:[%s10918_s30 + $0x8] sm:$0xff]  ;;  %v1184_v57 = vld [vmem:[%s10918_s30 + $0x10] sm:$0xff]  ;;  %s10920_s29 = sld [smem:[#allocation4_spill]]  ;;  %s10922_s25 = smul.u32 24, %s10952_s28 }
  0x22   : > { %v9604_v58 = vpack.i.bf16 %v1183_v56, %v1182_v55  ;;  %v1185_v59 = vld [vmem:[%s10918_s30 + $0x18] sm:$0xff]  ;;  %v8402_v9 = vpack.c.bf16 %v1183_v56, %v1182_v55  ;;  %s10924_s28 = sld [smem:[#allocation9_spill]]  ;;  %s10940_s20 = smov 8  }
  0x23   : > { %8376 = vmatpush3.bf16.msra.mxu0 %v9495_v19  ;;  %v9614_v63 = vpack.i.bf16 %v1185_v59, %v1184_v57  ;;  %s9686_s17 = scalar_lea.vmem %s10923_s22, %s10922_s25  ;;  %s10885_s25 = smov 88  }
  0x24   : > { %8382 = vmatpush3.bf16.msra.mxu1 %v9499_v20  ;;  %8383 = vmatprep.subr.bf16.mxu0 %v9313_v10  ;;  %s10942_s21 = smov 24   ;;  %s10945_s22 = sld [smem:[#allocation11_spill]] }
  0x25   : > { %8389 = vmatprep.subr.bf16.mxu1 %v9313_v10  ;;  %8847 = vrot.lane.b32.xlu1 %v9604_v58, %s10867_s27  ;;  %s10946_s3 = sld [smem:[#allocation12_spill]] }
  0x26   : > { %s706_s2 = scalar_lea.vmem %s10919_s19, %s7210_s6  ;;  %s9656_s6 = scalar_lea.vmem %s10921_s24, %s8821_s0 }
  0x27   : > { %v718_v60 = vld [vmem:[%s706_s2] sm:$0xff]  ;;  %v719_v61 = vld [vmem:[%s706_s2 + $0x8] sm:$0xff]  ;;  %v720_v62 = vld [vmem:[%s706_s2 + $0x10] sm:$0xff]  ;;  %s10925_s24 = sld [smem:[#allocation6_spill]]  ;;  %s10869_s19 = smov 104  }
  0x28   : > { %v9616_v1 = vpack.c.bf16 %v719_v61, %v718_v60  ;;  %v1166_v33 = vld [vmem:[%s9656_s6] sm:$0xff]  ;;  %v1167_v34 = vld [vmem:[%s9656_s6 + $0x8] sm:$0xff]  ;;  %v1168_v36 = vld [vmem:[%s9656_s6 + $0x10] sm:$0xff]  ;;  %s10879_s0 = smov 72  }
  0x29   : > { %8852 = vrot.lane.b32.xlu1 %v9614_v63, %s10867_s27  ;;  %v1169_v37 = vld [vmem:[%s9656_s6 + $0x18] sm:$0xff]  ;;  %v1170_v39 = vld [vmem:[%s9656_s6 + $0x20] sm:$0xff]  ;;  %s10887_s27 = smov 32  }
  0x2d   : > { %v1175_v52 = vld [vmem:[%s10925_s24 + $0x8] sm:$0xff]  ;;  %v1174_v55 = vld [vmem:[%s10925_s24] sm:$0xff]  ;;  %v1177_v61 = vld [vmem:[%s10925_s24 + $0x18] sm:$0xff] }
  0x97   : > { %v8848_v13 = vpop.permute.xlu1 %8847 }
  0x98   : > { %v8850_v14 = vunpack.i.h.bf16 %v8848_v13  ;;  %v8849_v16 = vunpack.i.l.bf16 %v8848_v13 }
  0x9a   : > { %v8407_v17 = vpack.c.bf16 %v8850_v14, %v8849_v16  ;;  %v1179_v16 = vld [vmem:[%s10925_s24 + $0x28] sm:$0xff] }
  0xaa   : > { %v746_v2 = vpop.xlane.xlu0 %745 }
  0xab   : > { %v748_v3 = vmul.f32 0.03125, %v746_v2  ;;  %v721_v2 = vld [vmem:[%s706_s2 + $0x18] sm:$0xff]  ;;  %s10883_s2 = smov 80  }
  0xad   : > { %v749_v4 = vsub.f32 %v9454_v0, %v748_v3  ;;  %v9619_v3 = vpack.c.bf16 %v721_v2, %v720_v62  ;;  %v1176_v2 = vld [vmem:[%s10925_s24 + $0x10] sm:$0xff] }
  0xaf   : > { %v750_v5 = vmul.f32 %v749_v4, %v749_v4 }
  0xb1   : > { %v751_v6 = vsel %vm743_vm0, %v750_v5, 0.0 }
  0xb2   : > { %752 = vadd.xlane.f32.xlu0 %v751_v6 }
 0x13f   : > { %v753_v21 = vpop.xlane.xlu0 %752 }
 0x140   : > { %v754_v22 = vmul.f32 0.03125, %v753_v21  ;;  %v717_v21 = vld [vmem:[%s10920_s29] sm:$0xff] }
 0x142   : > { %v755_v23 = vadd.f32 1e-05, %v754_v22  ;;  %v8405_v22 = vpack.c.bf16 %v1185_v59, %v1184_v57 }
 0x144   : > { %9206 = vrsqrt.f32 %v755_v23  ;;  %v1194_v23 = vadd.f32 %v9454_v0, %v717_v21 }
 0x14e   : > { %v9207_v24 = vpop.eup %9206 }
 0x14f   : > { %v757_v26 = vmul.f32 %v9207_v24, %v749_v4  ;;  %v9626_v4 = vsub.s32 1, %v9550_v40  ;;  %v9646_v24 = vsub.s32 2, %v9550_v40 }
 0x151   : > { %v764_v30 = vmul.f32 %v7000_v25, %v757_v26  ;;  %v9630_v5 = vrot.slane %v9562_v42, %v9626_v4  ;;  %v8853_v25 = vpop.permute.xlu1 %8852  ;;  %v9651_v26 = vrot.slane %v9562_v42, %v9646_v24  ;;  %v1171_v42 = vld [vmem:[%s9656_s6 + $0x28] sm:$0xff] }
 0x152   : > { %v8855_v27 = vunpack.i.h.bf16 %v8853_v25  ;;  %v8854_v28 = vunpack.i.l.bf16 %v8853_v25 }
 0x153   : > { %v771_v32 = vadd.f32 %v7001_v29, %v764_v30 }
 0x155   : > { %7589 = vmatmul.mubr.msk.f32.vlgmr.msra.gmra.mrb[0].mxu0 %vm743_vm0, %v771_v32  ;;  %7600 = vmatmul.mubr.msk.f32.vlgmr.msra.gmra.mrb[0].mxu1 %vm743_vm0, %v771_v32  ;;  %v8411_v32 = vpack.c.bf16 %v8855_v27, %v8854_v28 }
 0x156   : > { %8385 = vmatpush3.bf16.msra.mxu0 %v9518_v31  ;;  %7610 = vmatprep.mubr.msk.f32.mxu0 %vm9314_vm1, %v9315_v18 }
 0x157   : > { %8386 = vmatprep.subr.bf16.mxu0 %v9313_v10  ;;  %7621 = vmatprep.mubr.msk.f32.mxu1 %vm9314_vm1, %v9315_v18 }
 0x158   : > { %8391 = vmatpush3.bf16.msra.mxu1 %v9544_v38 }
 0x159   : > { %8392 = vmatprep.subr.bf16.mxu1 %v9313_v10 }
 0x15a   : > { %8388 = vmatpush3.bf16.msra.mxu0 %v9534_v35 }
 0x15b   : > { %8395 = vmatprep.subr.bf16.mxu0 %v9313_v10 }
 0x15c   : > { %8394 = vmatpush3.bf16.msra.mxu1 %v9590_v54 }
 0x15d   : > { %8401 = vmatprep.subr.bf16.mxu1 %v9313_v10 }
 0x228   : > { %v847_v45 = vpop.f32.mrb[0].mxu0  ;;  %v922_v46 = vpop.f32.mrb[0].mxu1 }
 0x229   : > { %v848_v47 = vadd.f32 %v7002_v44, %v847_v45  ;;  %v923_v48 = vadd.f32 %v922_v46, %v9567_v43  ;;  %v7590_v49 = vpop.f32.mrb[1].mxu0  ;;  %v7601_v50 = vpop.f32.mrb[1].mxu1  ;;  %v1172_v44 = vld [vmem:[%s9656_s6 + $0x30] sm:$0xff]  ;;  %v1173_v45 = vld [vmem:[%s9656_s6 + $0x38] sm:$0xff] }
 0x22b   : > { %851 = vst [vmem:[%s9577_s5] sm:$0xff] %v848_v47  ;;  %v926_v51 = vmax.f32 %v923_v48, 0.0 }
 0x22d   : > { %7611 = vmatmul.mubr.msk.f32.vlgmr.msra.gmra.mrb[2].mxu0 %vm743_vm0, %v926_v51  ;;  %v9698_v51 = vld [vmem:[%s10924_s28] sm:$0xf] }
 0x22e   : > { %7632 = vmatprep.mubr.msk.f32.mxu0 %vm9314_vm1, %v9315_v18  ;;  %8397 = vmatpush3.bf16.msra.mxu0 %v9616_v1  ;;  %v1428_v53 = vrot.slane %v9698_v51, %v9626_v4 }
 0x22f   : > { %8398 = vmatprep.subr.bf16.mxu0 %v9313_v10 }
 0x232   : > { %8400 = vmatpush3.bf16.msra.mxu0 %v9619_v3 }
 0x233   : > { %8408 = vmatprep.subr.bf16.mxu0 %v8407_v17 }
 0x300   : > { %v1000_v6 = vpop.f32.mrb[2].mxu0 }
 0x301   : > { %v1001_v7 = vadd.f32 %v1000_v6, %v9630_v5  ;;  %v7612_v8 = vpop.f32.mrb[3].mxu0 }
 0x303   : > { %v1004_v12 = vmax.f32 %v1001_v7, 0.0 }
 0x305   : > { %7622 = vmatmul.mubr.msk.f32.vlgmr.msra.gmra.mrb[2].mxu1 %vm743_vm0, %v1004_v12 }
 0x306   : > { %8403 = vmatpush3.bf16.msra.mxu1 %v8402_v9  ;;  %7643 = vmatprep.mubr.msk.f32.mxu1 %vm9314_vm1, %v9315_v18 }
 0x307   : > { %8404 = vmatprep.subr.bf16.mxu1 %v9313_v10 }
 0x30a   : > { %8406 = vmatpush3.bf16.msra.mxu1 %v8405_v22  ;;  %v1178_v22 = vld [vmem:[%s10925_s24 + $0x20] sm:$0xff] }
 0x30b   : > { %8415 = vmatprep.subr.bf16.mxu1 %v9313_v10 }
 0x30d   : > { %7644 = vmatmul.mubr.msk.f32.vlgmr.msra.gmra.mrb[4].mxu1 %vm743_vm0, %v1194_v23 }
 0x30e   : > { %7682 = vmatprep.mubr.msk.f32.mxu1 %vm9314_vm1, %v9315_v18 }
 0x3d8   : > { %v1078_v0 = vpop.f32.mrb[2].mxu1 }
 0x3d9   : > { %v1079_v29 = vadd.f32 %v1078_v0, %v9651_v26  ;;  %v7623_v30 = vpop.f32.mrb[3].mxu1 }
 0x3da   : > { %v1181_v30 = vld [vmem:[%s10925_s24 + $0x38] sm:$0xff] }
 0x3db   : > { %7633 = vmatmul.mubr.msk.f32.vlgmr.msra.gmra.mrb[4].mxu0 %vm743_vm0, %v1079_v29 }
 0x3dc   : > { %8410 = vmatpush3.bf16.msra.mxu0 %v8407_v17  ;;  %7654 = vmatprep.mubr.msk.f32.mxu0 %vm743_vm0, %v1166_v33 }
 0x3dd   : > { %8412 = vmatprep.subr.bf16.mxu0 %v8411_v32 }
 0x3e0   : > { %8414 = vmatpush3.bf16.msra.mxu0 %v8411_v32  ;;  %v9679_v46 = vpop.f32.mrb[4].mxu1 }
 0x3e1   : > { %8431 = vmatprep.subr.bf16.mxu0 %v9313_v10  ;;  %v7645_v47 = vpop.f32.mrb[5].mxu1 }
 0x3e3   : > { %7655 = vmatmul.mubr.msk.f32.vlgmr.msra.gmra.mrb[6].mxu0 %vm743_vm0, %v1167_v34  ;;  %v1180_v34 = vld [vmem:[%s10925_s24 + $0x30] sm:$0xff] }
 0x3e4   : > { %7657 = vmatprep.mubr.msk.f32.mxu0 %vm743_vm0, %v1168_v36 }
 0x3e7   : > { %7658 = vmatmul.mubr.msk.f32.gmra.mrb[8].mxu0 %vm743_vm0, %v1169_v37 }
 0x3e8   : > { %7660 = vmatprep.mubr.msk.f32.mxu0 %vm743_vm0, %v1170_v39  ;;  %v1440_v39 = vrot.slane %v9698_v51, %v9646_v24 }
 0x3eb   : > { %7661 = vmatmul.mubr.msk.f32.gmra.mrb[10].mxu0 %vm743_vm0, %v1171_v42 }
 0x3ec   : > { %7663 = vmatprep.mubr.msk.f32.mxu0 %vm743_vm0, %v1172_v44 }
 0x3ef   : > { %7664 = vmatmul.mubr.msk.f32.gmra.mrb[12].mxu0 %vm743_vm0, %v1173_v45 }
 0x3f0   : > { %7701 = vmatprep.mubr.msk.f32.mxu0 %vm9314_vm1, %v9315_v18 }
 0x4ae   : > { %v9688_v48 = vpop.f32.mrb[4].mxu0 }
 0x4af   : > { %1156 = vst.msk [vmem:[%s9686_s17] sm:$0xff] %vm1155_vm2, %v9688_v48  ;;  %v7634_v49 = vpop.f32.mrb[5].mxu0  ;;  %v1157_v50 = vsel %vm1155_vm2, %v9688_v48, -inf  ;;  %vm1161_vm6 = vcmp.lt.f32.partialorder %v9688_v48, 0.0 }
 0x4b0   : > { %1158 = vmax.xlane.f32.xlu0 %v1157_v50 }
 0x4b6   : > { %v7656_v56 = vpop.f32.mrb[6].mxu0 }
 0x4b7   : > { %v1418_v57 = vadd.f32 %v7656_v56, %v1175_v52  ;;  %v1378_v59 = vpop.f32.mrb[7].mxu0 }
 0x4b8   : > { %v1417_v60 = vadd.f32 %v1378_v59, %v1174_v55 }
 0x4b9   : > { %v1430_v62 = vadd.f32 %v1428_v53, %v1418_v57 }
 0x4ba   : > { %v1429_v6 = vadd.f32 %v1428_v53, %v1417_v60  ;;  %v7659_v7 = vpop.f32.mrb[8].mxu0  ;;  %v1198_v60 = vrot.slane %v9698_v51, %v9557_v41 }
 0x4bb   : > { %v1420_v8 = vadd.f32 %v7659_v7, %v1177_v61  ;;  %v1388_v9 = vpop.f32.mrb[9].mxu0 }
 0x4bc   : > { %v8416_v13 = vpack.c.bf16 %v1430_v62, %v1429_v6  ;;  %v1419_v14 = vadd.f32 %v1388_v9, %v1176_v2  ;;  %v9723_v17 = vpack.i.bf16 %v1430_v62, %v1429_v6  ;;  %v1269_v61 = vadd.f32 %v9679_v46, %v1198_v60 }
 0x4bd   : > { %v1432_v21 = vadd.f32 %v1428_v53, %v1420_v8 }
 0x4be   : > { %v1431_v23 = vadd.f32 %v1428_v53, %v1419_v14  ;;  %8418 = vmatpush3.bf16.xpose.msk.msra.mxu1 %vm9716_vm4, %v8416_v13  ;;  %v7662_v25 = vpop.f32.mrb[10].mxu0 }
 0x4bf   : > { %v1422_v27 = vadd.f32 %v7662_v25, %v1179_v16  ;;  %8419 = vmatprep.subr.bf16.mxu1 %v9313_v10  ;;  %v1398_v28 = vpop.f32.mrb[11].mxu0 }
 0x4c0   : > { %v8420_v0 = vpack.c.bf16 %v1432_v21, %v1431_v23  ;;  %v1421_v29 = vadd.f32 %v1398_v28, %v1178_v22  ;;  %v9734_v32 = vpack.i.bf16 %v1432_v21, %v1431_v23 }
 0x4c1   : > { %v1434_v33 = vadd.f32 %v1428_v53, %v1422_v27 }
 0x4c2   : > { %v1433_v36 = vadd.f32 %v1428_v53, %v1421_v29  ;;  %v7665_v37 = vpop.f32.mrb[12].mxu0 }
 0x4c3   : > { %v1424_v42 = vadd.f32 %v7665_v37, %v1181_v30  ;;  %v1408_v44 = vpop.f32.mrb[13].mxu0 }
 0x4c4   : > { %v8424_v45 = vpack.c.bf16 %v1434_v33, %v1433_v36  ;;  %v1423_v47 = vadd.f32 %v1408_v44, %v1180_v34  ;;  %v9741_v49 = vpack.i.bf16 %v1434_v33, %v1433_v36 }
 0x4c5   : > { %v1436_v50 = vadd.f32 %v1428_v53, %v1424_v42 }
 0x4c6   : > { %8422 = vmatpush3.bf16.xpose.msk.msra.mxu1 %vm9716_vm4, %v8420_v0  ;;  %v1435_v52 = vadd.f32 %v1428_v53, %v1423_v47  ;;  %1442 = vrot.lane.b32.xlu0 %v1440_v39, %s10887_s27  ;;  %v9758_v53 = vmul.f32 0.35355338, %v1269_v61 }
 0x4c7   : > { %8423 = vmatprep.subr.bf16.mxu1 %v9313_v10 }
 0x4c8   : > { %v8428_v55 = vpack.c.bf16 %v1436_v50, %v1435_v52  ;;  %v9747_v57 = vpack.i.bf16 %v1436_v50, %v1435_v52 }
 0x4ce   : > { %8426 = vmatpush3.bf16.xpose.msk.msra.mxu1 %vm9716_vm4, %v8424_v45 }
 0x4cf   : > { %8427 = vmatprep.subr.bf16.mxu1 %v9313_v10 }
 0x4d6   : > { %8430 = vmatpush3.bf16.xpose.msk.msra.mxu1 %vm9716_vm4, %v8428_v55 }
 0x4d7   : > { %8459 = vmatprep.subr.bf16.mxu1 %v9313_v10 }
 0x4dd   : > { %7683 = vmatmul.mubr.msk.f32.vlgmr.msra.gmra.mrb[6].mxu1 %vm1454_vm3, %v9758_v53 }
 0x4de   : > { %7739 = vmatprep.mubr.msk.f32.mxu1 %vm9314_vm1, %v9315_v18 }
 0x53d   : > { %v1159_v62 = vpop.xlane.xlu0 %1158 }
 0x53e   : > { %vm1160_vm5 = vcmp.ge.f32.partialorder %v1159_v62, 0.0 }
 0x53f   : > { %vm1164_vm7 = vmand %vm1161_vm6, %vm1160_vm5 }
 0x541   : > { %v1443_v2 = vpop.permute.xlu0 %1442 }
 0x542   : > { %v1445_v6 = vadd.f32 %v1443_v2, %v1378_v59  ;;  %v1446_v8 = vadd.f32 %v7656_v56, %v1443_v2  ;;  %v1447_v13 = vadd.f32 %v1443_v2, %v1388_v9  ;;  %v1448_v14 = vadd.f32 %v7659_v7, %v1443_v2 }
 0x543   : > { %v1451_v46 = vadd.f32 %v1443_v2, %v1408_v44  ;;  %v1452_v16 = vadd.f32 %v7665_v37, %v1443_v2  ;;  %v1449_v21 = vadd.f32 %v1443_v2, %v1398_v28  ;;  %v1450_v22 = vadd.f32 %v7662_v25, %v1443_v2 }
 0x544   : > { %v9764_v23 = vpack.i.bf16 %v1446_v8, %v1445_v6  ;;  %v9766_v27 = vpack.i.bf16 %v1448_v14, %v1447_v13  ;;  %v9774_v56 = vsel %vm1164_vm7, -1e+30, %v9315_v18 }
 0x545   : > { %v9768_v0 = vpack.i.bf16 %v1452_v16, %v1451_v46  ;;  %v9770_v29 = vpack.i.bf16 %v1450_v22, %v1449_v21 }
 0x5b0   : > { %v1548_v59 = vpop.f32.mrb[6].mxu1 }
 0x5b1   : > { %v1549_v7 = vadd.f32 %v1548_v59, %v9774_v56  ;;  %v7684_v9 = vpop.f32.mrb[7].mxu1 }
 0x5b3   : > { %v1552_v25 = vsel %vm1155_vm2, %v1549_v7, -inf }
 0x5b4   : > { %1553 = vmax.xlane.f32.xlu1 %v1552_v25 }
 0x5c5   : > { %8857 = vrot.lane.b32.xlu1 %v9764_v23, %s10928_s23 }
 0x5c9   : > { %8862 = vrot.lane.b32.xlu1 %v9766_v27, %s10928_s23 }
 0x5cd   : > { %8872 = vrot.lane.b32.xlu1 %v9768_v0, %s10928_s23 }
 0x5d1   : > { %8877 = vrot.lane.b32.xlu1 %v9723_v17, %s10881_s1 }
 0x5d5   : > { %8882 = vrot.lane.b32.xlu1 %v9734_v32, %s10881_s1 }
 0x5d9   : > { %8887 = vrot.lane.b32.xlu1 %v9741_v49, %s10881_s1 }
 0x5dd   : > { %8892 = vrot.lane.b32.xlu1 %v9747_v57, %s10881_s1 }
 0x5e1   : > { %1668 = vrot.lane.b32.xlu1 %v9758_v53, %s10881_s1  ;;  %s10931_s1 = smov 32  }
 0x5e5   : > { %8902 = vrot.lane.b32.xlu1 %v9766_v27, %s10885_s25 }
 0x5e9   : > { %8912 = vrot.lane.b32.xlu1 %v9768_v0, %s10885_s25 }
 0x641   : > { %v1554_v48 = vpop.xlane.xlu1 %1553 }
 0x642   : > { %v1555_v28 = vsub.f32 %v1549_v7, %v1554_v48 }
 0x644   : > { %v1556_v30 = vmul.f32 1.442695, %v1555_v28 }
 0x645   : > { %v8858_v33 = vpop.permute.xlu1 %8857 }
 0x646   : > { %9208 = vpow2.f32 %v1556_v30  ;;  %v8860_v34 = vunpack.i.h.bf16 %v8858_v33  ;;  %v8859_v36 = vunpack.i.l.bf16 %v8858_v33 }
 0x648   : > { %v8432_v37 = vpack.c.bf16 %v8860_v34, %v8859_v36 }
 0x649   : > { %v8863_v39 = vpop.permute.xlu1 %8862 }
 0x64a   : > { %v8865_v42 = vunpack.i.h.bf16 %v8863_v39  ;;  %v8864_v44 = vunpack.i.l.bf16 %v8863_v39  ;;  %8433 = vmatpush3.bf16.msra.mxu0 %v8432_v37 }
 0x64b   : > { %8434 = vmatprep.subr.bf16.mxu0 %v9313_v10 }
 0x64c   : > { %v8435_v45 = vpack.c.bf16 %v8865_v42, %v8864_v44 }
 0x64d   : > { %v8873_v55 = vpop.permute.xlu1 %8872 }
 0x64e   : > { %8436 = vmatpush3.bf16.msra.mxu0 %v8435_v45  ;;  %v8875_v2 = vunpack.i.h.bf16 %v8873_v55  ;;  %v8874_v6 = vunpack.i.l.bf16 %v8873_v55 }
 0x64f   : > { %8437 = vmatprep.subr.bf16.mxu0 %v9313_v10 }
 0x650   : > { %v9209_v47 = vpop.eup %9208  ;;  %v8441_v14 = vpack.c.bf16 %v8875_v2, %v8874_v6 }
 0x651   : > { %v1558_v50 = vsel %vm1155_vm2, %v9209_v47, 0.0  ;;  %v8878_v46 = vpop.permute.xlu1 %8877 }
 0x652   : > { %1559 = vadd.xlane.f32.xlu0 %v1558_v50  ;;  %v8880_v21 = vunpack.i.h.bf16 %v8878_v46  ;;  %v8879_v22 = vunpack.i.l.bf16 %v8878_v46 }
 0x654   : > { %v8444_v59 = vpack.c.bf16 %v8880_v21, %v8879_v22 }
 0x655   : > { %v8883_v7 = vpop.permute.xlu1 %8882 }
 0x656   : > { %v8885_v9 = vunpack.i.h.bf16 %v8883_v7  ;;  %v8884_v25 = vunpack.i.l.bf16 %v8883_v7 }
 0x658   : > { %v8448_v48 = vpack.c.bf16 %v8885_v9, %v8884_v25 }
 0x659   : > { %v8888_v28 = vpop.permute.xlu1 %8887 }
 0x65a   : > { %v8890_v30 = vunpack.i.h.bf16 %v8888_v28  ;;  %v8889_v33 = vunpack.i.l.bf16 %v8888_v28 }
 0x65c   : > { %v8452_v34 = vpack.c.bf16 %v8890_v30, %v8889_v33 }
 0x65d   : > { %v8893_v36 = vpop.permute.xlu1 %8892 }
 0x65e   : > { %v8895_v37 = vunpack.i.h.bf16 %v8893_v36  ;;  %v8894_v39 = vunpack.i.l.bf16 %v8893_v36 }
 0x660   : > { %v8456_v42 = vpack.c.bf16 %v8895_v37, %v8894_v39 }
 0x661   : > { %v1669_v44 = vpop.permute.xlu1 %1668 }
 0x665   : > { %v8903_v6 = vpop.permute.xlu1 %8902 }
 0x666   : > { %v8905_v46 = vunpack.i.h.bf16 %v8903_v6 }
 0x668   : > { %8867 = vrot.lane.b32.xlu0 %v9770_v29, %s10928_s23 }
 0x669   : > { %v8913_v25 = vpop.permute.xlu1 %8912 }
 0x66a   : > { %v8915_v30 = vunpack.i.h.bf16 %v8913_v25  ;;  %v8914_v33 = vunpack.i.l.bf16 %v8913_v25 }
 0x66c   : > { %v8469_v39 = vpack.c.bf16 %v8915_v30, %v8914_v33 }
 0x6df   : > { %v1560_v52 = vpop.xlane.xlu0 %1559 }
 0x6e0   : > { %9210 = vrcp.f32 %v1560_v52 }
 0x6e3   : > { %v8868_v60 = vpop.permute.xlu0 %8867 }
 0x6e4   : > { %v8870_v61 = vunpack.i.h.bf16 %v8868_v60  ;;  %v8869_v62 = vunpack.i.l.bf16 %v8868_v60 }
 0x6e6   : > { %v8438_v8 = vpack.c.bf16 %v8870_v61, %v8869_v62 }
 0x6e8   : > { %8439 = vmatpush3.bf16.msra.mxu0 %v8438_v8 }
 0x6e9   : > { %8440 = vmatprep.subr.bf16.mxu0 %v9313_v10 }
 0x6ea   : > { %v9211_v13 = vpop.eup %9210 }
 0x6eb   : > { %v1562_v16 = vmul.f32 %v9211_v13, %v9209_v47 }
 0x6ec   : > { %8442 = vmatpush3.bf16.msra.mxu0 %v8441_v14 }
 0x6ed   : > { %8443 = vmatprep.subr.bf16.mxu0 %v9313_v10 }
 0x6ef   : > { %7702 = vmatmul.mubr.msk.f32.vlgmr.msra.gmra.mrb[14].mxu0 %vm1155_vm2, %v1562_v16  ;;  %v8904_v16 = vunpack.i.l.bf16 %v8903_v6 }
 0x6f0   : > { %7720 = vmatprep.mubr.msk.f32.mxu0 %vm9314_vm1, %v9315_v18 }
 0x6f5   : > { %8446 = vmatpush3.bf16.xpose.msk.msra.mxu0 %vm9716_vm4, %v8444_v59  ;;  %v8463_v59 = vpack.c.bf16 %v8905_v46, %v8904_v16 }
 0x6f6   : > { %8447 = vmatprep.subr.bf16.mxu0 %v9313_v10 }
 0x6fd   : > { %8450 = vmatpush3.bf16.xpose.msk.msra.mxu0 %vm9716_vm4, %v8448_v48 }
 0x6fe   : > { %8451 = vmatprep.subr.bf16.mxu0 %v9313_v10 }
 0x705   : > { %8454 = vmatpush3.bf16.xpose.msk.msra.mxu0 %vm9716_vm4, %v8452_v34 }
 0x706   : > { %8455 = vmatprep.subr.bf16.mxu0 %v9313_v10 }
 0x70d   : > { %8458 = vmatpush3.bf16.xpose.msk.msra.mxu0 %vm9716_vm4, %v8456_v42 }
 0x70e   : > { %8487 = vmatprep.subr.bf16.mxu0 %v9313_v10 }
 0x714   : > { %7721 = vmatmul.mubr.msk.f32.vlgmr.msra.gmra.mrb[16].mxu0 %vm1454_vm3, %v1669_v44 }
 0x715   : > { %7777 = vmatprep.mubr.msk.f32.mxu0 %vm9314_vm1, %v9315_v18 }
 0x7c2   : > { %v9823_v45 = vpop.f32.mrb[14].mxu0 }
 0x7c3   : > { %v7703_v47 = vpop.f32.mrb[15].mxu0 }
 0x7e7   : > { %v1770_v50 = vpop.f32.mrb[16].mxu0 }
 0x7e8   : > { %v1771_v52 = vadd.f32 %v1770_v50, %v9774_v56  ;;  %v7722_v55 = vpop.f32.mrb[17].mxu0 }
 0x7ea   : > { %v1774_v60 = vsel %vm1155_vm2, %v1771_v52, -inf }
 0x7eb   : > { %1775 = vmax.xlane.f32.xlu0 %v1774_v60 }
 0x801   : > { %8897 = vrot.lane.b32.xlu0 %v9764_v23, %s10885_s25 }
 0x805   : > { %8907 = vrot.lane.b32.xlu0 %v9770_v29, %s10885_s25  ;;  %s10935_s25 = smov 80  }
 0x809   : > { %8917 = vrot.lane.b32.xlu0 %v9723_v17, %s10877_s26 }
 0x80d   : > { %8927 = vrot.lane.b32.xlu0 %v9741_v49, %s10877_s26 }
 0x811   : > { %1882 = vrot.lane.b32.xlu0 %v9758_v53, %s10877_s26 }
 0x815   : > { %8937 = vrot.lane.b32.xlu0 %v9764_v23, %s10883_s2 }
 0x878   : > { %v1776_v61 = vpop.xlane.xlu0 %1775 }
 0x879   : > { %v1777_v62 = vsub.f32 %v1771_v52, %v1776_v61 }
 0x87b   : > { %v1778_v2 = vmul.f32 1.442695, %v1777_v62 }
 0x87c   : > { %v8898_v8 = vpop.permute.xlu0 %8897 }
 0x87d   : > { %9212 = vpow2.f32 %v1778_v2  ;;  %v8900_v13 = vunpack.i.h.bf16 %v8898_v8  ;;  %v8899_v14 = vunpack.i.l.bf16 %v8898_v8 }
 0x87f   : > { %v8460_v21 = vpack.c.bf16 %v8900_v13, %v8899_v14 }
 0x880   : > { %v8908_v22 = vpop.permute.xlu0 %8907 }
 0x881   : > { %8461 = vmatpush3.bf16.msra.mxu1 %v8460_v21  ;;  %v8910_v7 = vunpack.i.h.bf16 %v8908_v22  ;;  %v8909_v9 = vunpack.i.l.bf16 %v8908_v22 }
 0x882   : > { %8462 = vmatprep.subr.bf16.mxu1 %v9313_v10 }
 0x883   : > { %v8466_v34 = vpack.c.bf16 %v8910_v7, %v8909_v9 }
 0x884   : > { %v8918_v48 = vpop.permute.xlu0 %8917 }
 0x885   : > { %8464 = vmatpush3.bf16.msra.mxu1 %v8463_v59  ;;  %v8920_v60 = vunpack.i.h.bf16 %v8918_v48  ;;  %v8919_v61 = vunpack.i.l.bf16 %v8918_v48 }
 0x886   : > { %8465 = vmatprep.subr.bf16.mxu1 %v9313_v10 }
 0x887   : > { %v9213_v28 = vpop.eup %9212  ;;  %v8472_v6 = vpack.c.bf16 %v8920_v60, %v8919_v61 }
 0x888   : > { %v8928_v36 = vpop.permute.xlu0 %8927  ;;  %v1780_v37 = vsel %vm1155_vm2, %v9213_v28, 0.0 }
 0x889   : > { %1781 = vadd.xlane.f32.xlu1 %v1780_v37  ;;  %8467 = vmatpush3.bf16.msra.mxu1 %v8466_v34  ;;  %v8930_v16 = vunpack.i.h.bf16 %v8928_v36  ;;  %v8929_v21 = vunpack.i.l.bf16 %v8928_v36 }
 0x88a   : > { %8468 = vmatprep.subr.bf16.mxu1 %v9313_v10 }
 0x88b   : > { %v8480_v22 = vpack.c.bf16 %v8930_v16, %v8929_v21 }
 0x88c   : > { %v1883_v42 = vpop.permute.xlu0 %1882 }
 0x88d   : > { %8470 = vmatpush3.bf16.msra.mxu1 %v8469_v39 }
 0x88e   : > { %8471 = vmatprep.subr.bf16.mxu1 %v9313_v10 }
 0x890   : > { %v8938_v44 = vpop.permute.xlu0 %8937 }
 0x891   : > { %v8940_v47 = vunpack.i.h.bf16 %v8938_v44  ;;  %v8939_v50 = vunpack.i.l.bf16 %v8938_v44 }
 0x893   : > { %v8488_v52 = vpack.c.bf16 %v8940_v47, %v8939_v50 }
 0x895   : > { %8489 = vmatpush3.bf16.msra.mxu0 %v8488_v52 }
 0x896   : > { %8490 = vmatprep.subr.bf16.mxu0 %v9313_v10 }
 0x89a   : > { %8922 = vrot.lane.b32.xlu1 %v9734_v32, %s10877_s26 }
 0x89e   : > { %8932 = vrot.lane.b32.xlu1 %v9747_v57, %s10877_s26  ;;  %s10938_s26 = smov 112  }
 0x916   : > { %v1782_v55 = vpop.xlane.xlu1 %1781 }
 0x917   : > { %9214 = vrcp.f32 %v1782_v55 }
 0x91a   : > { %v8923_v8 = vpop.permute.xlu1 %8922 }
 0x91b   : > { %v8925_v13 = vunpack.i.h.bf16 %v8923_v8  ;;  %v8924_v14 = vunpack.i.l.bf16 %v8923_v8 }
 0x91d   : > { %v8476_v46 = vpack.c.bf16 %v8925_v13, %v8924_v14 }
 0x91e   : > { %v8933_v59 = vpop.permute.xlu1 %8932 }
 0x91f   : > { %v8935_v7 = vunpack.i.h.bf16 %v8933_v59  ;;  %v8934_v9 = vunpack.i.l.bf16 %v8933_v59 }
 0x921   : > { %v9215_v62 = vpop.eup %9214  ;;  %v8484_v25 = vpack.c.bf16 %v8935_v7, %v8934_v9 }
 0x922   : > { %v1784_v2 = vmul.f32 %v9215_v62, %v9213_v28 }
 0x924   : > { %7740 = vmatmul.mubr.msk.f32.vlgmr.msra.gmra.mrb[8].mxu1 %vm1155_vm2, %v1784_v2 }
 0x925   : > { %8474 = vmatpush3.bf16.xpose.msk.msra.mxu1 %vm9716_vm4, %v8472_v6  ;;  %7758 = vmatprep.mubr.msk.f32.mxu1 %vm9314_vm1, %v9315_v18 }
 0x926   : > { %8475 = vmatprep.subr.bf16.mxu1 %v9313_v10 }
 0x92d   : > { %8478 = vmatpush3.bf16.xpose.msk.msra.mxu1 %vm9716_vm4, %v8476_v46 }
 0x92e   : > { %8479 = vmatprep.subr.bf16.mxu1 %v9313_v10 }
 0x935   : > { %8482 = vmatpush3.bf16.xpose.msk.msra.mxu1 %vm9716_vm4, %v8480_v22 }
 0x936   : > { %8483 = vmatprep.subr.bf16.mxu1 %v9313_v10 }
 0x93d   : > { %8486 = vmatpush3.bf16.xpose.msk.msra.mxu1 %vm9716_vm4, %v8484_v25 }
 0x93e   : > { %8515 = vmatprep.subr.bf16.mxu1 %v9313_v10 }
 0x944   : > { %7759 = vmatmul.mubr.msk.f32.vlgmr.msra.gmra.mrb[10].mxu1 %vm1454_vm3, %v1883_v42 }
 0x945   : > { %7815 = vmatprep.mubr.msk.f32.mxu1 %vm9314_vm1, %v9315_v18 }
 0x9f7   : > { %v9867_v48 = vpop.f32.mrb[8].mxu1 }
 0x9f8   : > { %v7741_v28 = vpop.f32.mrb[9].mxu1 }
 0xa17   : > { %v1984_v30 = vpop.f32.mrb[10].mxu1 }
 0xa18   : > { %v1985_v33 = vadd.f32 %v1984_v30, %v9774_v56  ;;  %v7760_v34 = vpop.f32.mrb[11].mxu1 }
 0xa1a   : > { %v1988_v36 = vsel %vm1155_vm2, %v1985_v33, -inf }
 0xa1b   : > { %1989 = vmax.xlane.f32.xlu1 %v1988_v36 }
 0xa2c   : > { %8942 = vrot.lane.b32.xlu1 %v9766_v27, %s10883_s2 }
 0xa30   : > { %8947 = vrot.lane.b32.xlu1 %v9770_v29, %s10883_s2 }
 0xa34   : > { %8957 = vrot.lane.b32.xlu1 %v9723_v17, %s10869_s19 }
 0xa38   : > { %8967 = vrot.lane.b32.xlu1 %v9741_v49, %s10869_s19 }
 0xa3c   : > { %2096 = vrot.lane.b32.xlu1 %v9758_v53, %s10869_s19 }
 0xa40   : > { %8982 = vrot.lane.b32.xlu1 %v9766_v27, %s10879_s0 }
 0xaa8   : > { %v1990_v37 = vpop.xlane.xlu1 %1989 }
 0xaa9   : > { %v1991_v39 = vsub.f32 %v1985_v33, %v1990_v37 }
 0xaab   : > { %v1992_v42 = vmul.f32 1.442695, %v1991_v39 }
 0xaac   : > { %v8943_v44 = vpop.permute.xlu1 %8942 }
 0xaad   : > { %9216 = vpow2.f32 %v1992_v42  ;;  %v8945_v47 = vunpack.i.h.bf16 %v8943_v44  ;;  %v8944_v50 = vunpack.i.l.bf16 %v8943_v44 }
 0xaaf   : > { %v8491_v52 = vpack.c.bf16 %v8945_v47, %v8944_v50 }
 0xab0   : > { %v8948_v55 = vpop.permute.xlu1 %8947 }
 0xab1   : > { %v8950_v17 = vunpack.i.h.bf16 %v8948_v55  ;;  %v8949_v60 = vunpack.i.l.bf16 %v8948_v55  ;;  %8492 = vmatpush3.bf16.msra.mxu0 %v8491_v52 }
 0xab2   : > { %8493 = vmatprep.subr.bf16.mxu0 %v9313_v10 }
 0xab3   : > { %v8494_v49 = vpack.c.bf16 %v8950_v17, %v8949_v60 }
 0xab4   : > { %v8958_v13 = vpop.permute.xlu1 %8957 }
 0xab5   : > { %8495 = vmatpush3.bf16.msra.mxu0 %v8494_v49  ;;  %v8960_v46 = vunpack.i.h.bf16 %v8958_v13  ;;  %v8959_v16 = vunpack.i.l.bf16 %v8958_v13 }
 0xab6   : > { %8496 = vmatprep.subr.bf16.mxu0 %v9313_v10 }
 0xab7   : > { %v9217_v53 = vpop.eup %9216 }
 0xab8   : > { %v1994_v27 = vsel %vm1155_vm2, %v9217_v53, 0.0  ;;  %v8968_v9 = vpop.permute.xlu1 %8967 }
 0xab9   : > { %1995 = vadd.xlane.f32.xlu0 %v1994_v27  ;;  %v8970_v25 = vunpack.i.h.bf16 %v8968_v9  ;;  %v8969_v28 = vunpack.i.l.bf16 %v8968_v9 }
 0xabb   : > { %v8508_v30 = vpack.c.bf16 %v8970_v25, %v8969_v28 }
 0xabc   : > { %v2097_v39 = vpop.permute.xlu1 %2096 }
 0xac0   : > { %v8983_v49 = vpop.permute.xlu1 %8982 }
 0xacf   : > { %8952 = vrot.lane.b32.xlu0 %v9768_v0, %s10883_s2  ;;  %s10936_s2 = smov 120  }
 0xad3   : > { %8962 = vrot.lane.b32.xlu0 %v9734_v32, %s10869_s19  ;;  %v8500_v32 = vpack.c.bf16 %v8960_v46, %v8959_v16 }
 0xad7   : > { %8972 = vrot.lane.b32.xlu0 %v9747_v57, %s10869_s19  ;;  %s10871_s19 = smov 8  }
 0xb46   : > { %v1996_v61 = vpop.xlane.xlu0 %1995 }
 0xb47   : > { %9218 = vrcp.f32 %v1996_v61 }
 0xb4a   : > { %v8953_v62 = vpop.permute.xlu0 %8952 }
 0xb4b   : > { %v8955_v2 = vunpack.i.h.bf16 %v8953_v62  ;;  %v8954_v6 = vunpack.i.l.bf16 %v8953_v62  ;;  %v8985_v62 = vunpack.i.h.bf16 %v8983_v49 }
 0xb4d   : > { %v8497_v8 = vpack.c.bf16 %v8955_v2, %v8954_v6 }
 0xb4e   : > { %v8963_v57 = vpop.permute.xlu0 %8962 }
 0xb4f   : > { %8498 = vmatpush3.bf16.msra.mxu0 %v8497_v8  ;;  %v8965_v22 = vunpack.i.h.bf16 %v8963_v57  ;;  %v8964_v59 = vunpack.i.l.bf16 %v8963_v57 }
 0xb50   : > { %8499 = vmatprep.subr.bf16.mxu0 %v9313_v10 }
 0xb51   : > { %v9219_v14 = vpop.eup %9218  ;;  %v8504_v7 = vpack.c.bf16 %v8965_v22, %v8964_v59 }
 0xb52   : > { %v1998_v21 = vmul.f32 %v9219_v14, %v9217_v53  ;;  %v8973_v33 = vpop.permute.xlu0 %8972 }
 0xb53   : > { %v8975_v34 = vunpack.i.h.bf16 %v8973_v33  ;;  %v8974_v36 = vunpack.i.l.bf16 %v8973_v33 }
 0xb54   : > { %7778 = vmatmul.mubr.msk.f32.vlgmr.msra.gmra.mrb[18].mxu0 %vm1155_vm2, %v1998_v21 }
 0xb55   : > { %7796 = vmatprep.mubr.msk.f32.mxu0 %vm9314_vm1, %v9315_v18  ;;  %v8512_v37 = vpack.c.bf16 %v8975_v34, %v8974_v36 }
 0xb58   : > { %8502 = vmatpush3.bf16.xpose.msk.msra.mxu0 %vm9716_vm4, %v8500_v32 }
 0xb59   : > { %8503 = vmatprep.subr.bf16.mxu0 %v9313_v10 }
 0xb60   : > { %8506 = vmatpush3.bf16.xpose.msk.msra.mxu0 %vm9716_vm4, %v8504_v7 }
 0xb61   : > { %8507 = vmatprep.subr.bf16.mxu0 %v9313_v10 }
 0xb68   : > { %8510 = vmatpush3.bf16.xpose.msk.msra.mxu0 %vm9716_vm4, %v8508_v30 }
 0xb69   : > { %8511 = vmatprep.subr.bf16.mxu0 %v9313_v10 }
 0xb70   : > { %8514 = vmatpush3.bf16.xpose.msk.msra.mxu0 %vm9716_vm4, %v8512_v37 }
 0xb71   : > { %8533 = vmatprep.subr.bf16.mxu0 %v9313_v10 }
 0xb77   : > { %7797 = vmatmul.mubr.msk.f32.vlgmr.msra.gmra.mrb[20].mxu0 %vm1454_vm3, %v2097_v39 }
 0xb78   : > { %7837 = vmatprep.mubr.msk.f32.mxu0 %vm9314_vm1, %v9315_v18 }
 0xc27   : > { %v2092_v42 = vpop.f32.mrb[18].mxu0 }
 0xc28   : > { %v7779_v44 = vpop.f32.mrb[19].mxu0 }
 0xc4a   : > { %v2198_v47 = vpop.f32.mrb[20].mxu0 }
 0xc4b   : > { %v2199_v50 = vadd.f32 %v2198_v47, %v9774_v56  ;;  %v7798_v52 = vpop.f32.mrb[21].mxu0 }
 0xc4c   : > { %v9945_v52 = vsub.s32 3, %v9550_v40  ;;  %v1188_v40 = vld [vmem:[%s10929_s7 + $0x8] sm:$0xff] }
 0xc4d   : > { %v2202_v55 = vsel %vm1155_vm2, %v2199_v50, -inf }
 0xc4e   : > { %2203 = vmax.xlane.f32.xlu0 %v2202_v55  ;;  %v2330_v55 = vrot.slane %v9698_v51, %v9945_v52  ;;  %v1189_v51 = vld [vmem:[%s10929_s7 + $0x10] sm:$0xff] }
 0xc64   : > { %8977 = vrot.lane.b32.xlu0 %v9764_v23, %s10879_s0  ;;  %v8984_v23 = vunpack.i.l.bf16 %v8983_v49 }
 0xc68   : > { %8987 = vrot.lane.b32.xlu0 %v9770_v29, %s10879_s0 }
 0xc6c   : > { %8997 = vrot.lane.b32.xlu0 %v9604_v58, %s10887_s27  ;;  %v8519_v58 = vpack.c.bf16 %v8985_v62, %v8984_v23  ;;  %v1190_v62 = vld [vmem:[%s10929_s7 + $0x18] sm:$0xff] }
 0xc6d   : > { %v9969_v23 = vpack.i.bf16 %v1190_v62, %v1189_v51 }
 0xc70   : > { %2311 = vrot.lane.b32.xlu0 %v9867_v48, %s10871_s19  ;;  %s10873_s19 = smov 16  }
 0xcdb   : > { %v2204_v17 = vpop.xlane.xlu0 %2203 }
 0xcdc   : > { %v2205_v60 = vsub.f32 %v2199_v50, %v2204_v17 }
 0xcde   : > { %v2206_v56 = vmul.f32 1.442695, %v2205_v60 }
 0xcdf   : > { %v8978_v53 = vpop.permute.xlu0 %8977 }
 0xce0   : > { %9220 = vpow2.f32 %v2206_v56  ;;  %v8980_v27 = vunpack.i.h.bf16 %v8978_v53  ;;  %v8979_v61 = vunpack.i.l.bf16 %v8978_v53 }
 0xce2   : > { %v8516_v2 = vpack.c.bf16 %v8980_v27, %v8979_v61  ;;  %v1187_v27 = vld [vmem:[%s10929_s7] sm:$0xff] }
 0xce3   : > { %v8988_v6 = vpop.permute.xlu0 %8987  ;;  %v9962_v61 = vpack.i.bf16 %v1188_v40, %v1187_v27 }
 0xce4   : > { %8517 = vmatpush3.bf16.msra.mxu1 %v8516_v2  ;;  %v8990_v29 = vunpack.i.h.bf16 %v8988_v6  ;;  %v8989_v8 = vunpack.i.l.bf16 %v8988_v6 }
 0xce5   : > { %8518 = vmatprep.subr.bf16.mxu1 %v9313_v10 }
 0xce6   : > { %v8522_v13 = vpack.c.bf16 %v8990_v29, %v8989_v8 }
 0xce7   : > { %v8998_v57 = vpop.permute.xlu0 %8997 }
 0xce8   : > { %8520 = vmatpush3.bf16.msra.mxu1 %v8519_v58  ;;  %v9000_v22 = vunpack.i.h.bf16 %v8998_v57  ;;  %v8999_v59 = vunpack.i.l.bf16 %v8998_v57  ;;  %v8534_v57 = vpack.c.bf16 %v1188_v40, %v1187_v27 }
 0xce9   : > { %8521 = vmatprep.subr.bf16.mxu1 %v9313_v10 }
 0xcea   : > { %v9221_v48 = vpop.eup %9220  ;;  %v8528_v25 = vpack.c.bf16 %v9000_v22, %v8999_v59  ;;  %8535 = vmatpush3.bf16.msra.mxu0 %v8534_v57  ;;  %v8537_v59 = vpack.c.bf16 %v1190_v62, %v1189_v51 }
 0xceb   : > { %v2208_v14 = vsel %vm1155_vm2, %v9221_v48, 0.0  ;;  %v2312_v37 = vpop.permute.xlu0 %2311  ;;  %8536 = vmatprep.subr.bf16.mxu0 %v9313_v10 }
 0xcec   : > { %2209 = vadd.xlane.f32.xlu1 %v2208_v14  ;;  %8523 = vmatpush3.bf16.msra.mxu1 %v8522_v13 }
 0xced   : > { %8524 = vmatprep.subr.bf16.mxu1 %v9313_v10 }
 0xcee   : > { %8538 = vmatpush3.bf16.msra.mxu0 %v8537_v59 }
 0xcef   : > { %7861 = vmatprep.subr.mxu0 %v9315_v18 }
 0xcfd   : > { %8992 = vrot.lane.b32.xlu1 %v9768_v0, %s10879_s0  ;;  %s10937_s0 = smov 72  }
 0xd01   : > { %9002 = vrot.lane.b32.xlu1 %v9614_v63, %s10887_s27  ;;  %s10934_s27 = smov 88  }
 0xd05   : > { %2315 = vrot.lane.b32.xlu1 %v2092_v42, %s10873_s19  ;;  %s10875_s19 = smov 24   ;;  %v2322_v42 = vsel %vm1454_vm3, %v9823_v45, %v2312_v37  ;;  %v9296_v45 = vld [vmem:[%s10913_s4] sm:$0xff]  ;;  %s10890_s4 = smov 64  }
 0xd79   : > { %v2210_v46 = vpop.xlane.xlu1 %2209 }
 0xd7a   : > { %9222 = vrcp.f32 %v2210_v46 }
 0xd7d   : > { %v8993_v16 = vpop.permute.xlu1 %8992 }
 0xd7e   : > { %v8995_v21 = vunpack.i.h.bf16 %v8993_v16  ;;  %v8994_v32 = vunpack.i.l.bf16 %v8993_v16 }
 0xd80   : > { %v8525_v7 = vpack.c.bf16 %v8995_v21, %v8994_v32 }
 0xd81   : > { %v9003_v9 = vpop.permute.xlu1 %9002 }
 0xd82   : > { %8526 = vmatpush3.bf16.msra.mxu1 %v8525_v7  ;;  %v9005_v28 = vunpack.i.h.bf16 %v9003_v9  ;;  %v9004_v63 = vunpack.i.l.bf16 %v9003_v9  ;;  %v9981_v7 = vld [vmem:[%s10930_s8] sm:$0xf]  ;;  %s10947_s8 = sld [smem:[#allocation13_spill]] }
 0xd83   : > { %8527 = vmatprep.subr.bf16.mxu1 %v9313_v10  ;;  %v2522_v9 = vrot.slane %v9981_v7, %v9626_v4  ;;  %v2531_v40 = vrot.slane %v9981_v7, %v9646_v24 }
 0xd84   : > { %v9223_v0 = vpop.eup %9222  ;;  %v8531_v33 = vpack.c.bf16 %v9005_v28, %v9004_v63  ;;  %v9989_v63 = vld [vmem:[%s10932_s9] sm:$0x7]  ;;  %s10943_s9 = smov 24  }
 0xd85   : > { %v2212_v30 = vmul.f32 %v9223_v0, %v9221_v48  ;;  %v2316_v39 = vpop.permute.xlu1 %2315 }
 0xd86   : > { %v2324_v44 = vsel %vm2323_vm8, %v2322_v42, %v2316_v39 }
 0xd87   : > { %7816 = vmatmul.mubr.msk.f32.vlgmr.msra.gmra.mrb[12].mxu1 %vm1155_vm2, %v2212_v30  ;;  %v9994_v30 = vld [vmem:[%s10933_s10] sm:$0x7] }
 0xd88   : > { %8529 = vmatpush3.bf16.msra.mxu1 %v8528_v25  ;;  %7826 = vmatprep.mubr.msk.f32.mxu1 %vm9314_vm1, %v9315_v18  ;;  %v2438_v37 = vrot.slane %v9994_v30, %v9557_v41 }
 0xd89   : > { %8530 = vmatprep.subr.bf16.mxu1 %v9313_v10 }
 0xd8c   : > { %8532 = vmatpush3.bf16.msra.mxu1 %v8531_v33  ;;  %v2433_v33 = vrot.slane %v9989_v63, %v9557_v41 }
 0xd8d   : > { %8539 = vmatprep.subr.bf16.mxu1 %v9313_v10 }
 0xe5a   : > { %v2306_v34 = vpop.f32.mrb[12].mxu1 }
 0xe5b   : > { %2319 = vrot.lane.b32.xlu0 %v2306_v34, %s10875_s19  ;;  %v7817_v36 = vpop.f32.mrb[13].mxu1  ;;  %s10939_s19 = smov 104  }
 0xecd   : > { %v2320_v47 = vpop.permute.xlu0 %2319 }
 0xece   : > { %v2326_v50 = vsel %vm2325_vm9, %v2324_v44, %v2320_v47  ;;  %v10007_v44 = vld [vmem:[%s10920_s29] sm:$0xff] }
 0xecf   : > { %7827 = vmatmul.mubr.msk.f32.vlgmr.msra.gmra.mrb[14].mxu1 %vm743_vm0, %v2326_v50  ;;  %v2517_v50 = vrot.slane %v9981_v7, %v9557_v41 }
 0xed0   : > { %7848 = vmatprep.mubr.msk.f32.mxu1 %vm9314_vm1, %v9315_v18 }
 0xfa2   : > { %v2412_v17 = vpop.f32.mrb[14].mxu1 }
 0xfa3   : > { %v2413_v60 = vadd.f32 %v2412_v17, %v2330_v55  ;;  %v7828_v56 = vpop.f32.mrb[15].mxu1 }
 0xfa5   : > { %v2416_v49 = vadd.f32 %v9296_v45, %v2413_v60 }
 0xfa7   : > { %v2417_v53 = vsel %vm743_vm0, %v2416_v49, 0.0 }
 0xfa8   : > { %2418 = vadd.xlane.f32.xlu1 %v2417_v53 }
 0xfb9   : > { %9007 = vrot.lane.b32.xlu1 %v9962_v61, %s10890_s4 }
 0xfbd   : > { %9012 = vrot.lane.b32.xlu1 %v9969_v23, %s10890_s4  ;;  %s10941_s4 = smov 16  }
0x1035   : > { %v2419_v2 = vpop.xlane.xlu1 %2418 }
0x1036   : > { %v2420_v6 = vmul.f32 0.03125, %v2419_v2 }
0x1038   : > { %v2421_v58 = vsub.f32 %v2416_v49, %v2420_v6 }
0x1039   : > { %v9008_v48 = vpop.permute.xlu1 %9007 }
0x103a   : > { %v2422_v29 = vmul.f32 %v2421_v58, %v2421_v58  ;;  %v9010_v13 = vunpack.i.h.bf16 %v9008_v48  ;;  %v9009_v14 = vunpack.i.l.bf16 %v9008_v48 }
0x103c   : > { %v2423_v8 = vsel %vm743_vm0, %v2422_v29, 0.0  ;;  %v8540_v46 = vpack.c.bf16 %v9010_v13, %v9009_v14 }
0x103d   : > { %2424 = vadd.xlane.f32.xlu0 %v2423_v8  ;;  %v9013_v16 = vpop.permute.xlu1 %9012 }
0x103e   : > { %v9015_v21 = vunpack.i.h.bf16 %v9013_v16  ;;  %v9014_v32 = vunpack.i.l.bf16 %v9013_v16  ;;  %8541 = vmatpush3.bf16.msra.mxu1 %v8540_v46 }
0x103f   : > { %8542 = vmatprep.subr.bf16.mxu1 %v9313_v10 }
0x1040   : > { %v8543_v22 = vpack.c.bf16 %v9015_v21, %v9014_v32 }
0x1042   : > { %8544 = vmatpush3.bf16.msra.mxu1 %v8543_v22 }
0x1043   : > { %7851 = vmatprep.subr.mxu1 %v9315_v18 }
0x1053   : > { %2524 = vrot.lane.b32.xlu0 %v2522_v9, %s10931_s1 }
0x10ca   : > { %v2425_v0 = vpop.xlane.xlu0 %2424 }
0x10cb   : > { %v2426_v25 = vmul.f32 0.03125, %v2425_v0 }
0x10cd   : > { %v2427_v28 = vadd.f32 1e-05, %v2426_v25 }
0x10ce   : > { %v2525_v17 = vpop.permute.xlu0 %2524 }
0x10cf   : > { %9224 = vrsqrt.f32 %v2427_v28 }
0x10d9   : > { %v9225_v34 = vpop.eup %9224 }
0x10da   : > { %v2429_v36 = vmul.f32 %v9225_v34, %v2421_v58 }
0x10dc   : > { %v2434_v39 = vmul.f32 %v2433_v33, %v2429_v36 }
0x10de   : > { %v10000_v42 = vadd.f32 %v2438_v37, %v2434_v39 }
0x10e0   : > { %7849 = vmatmul.mubr.msk.f32.vlgmr.msra.gmra.mrb[16].mxu1 %vm743_vm0, %v10000_v42  ;;  %v2440_v47 = vadd.f32 %v10007_v44, %v10000_v42 }
0x10e1   : > { %7853 = vmatprep.mubr.msk.f32.mxu1 %vm9314_vm1, %v9315_v18 }
0x10e2   : > { %7838 = vmatmul.mubr.msk.f32.vlgmr.msra.gmra.mrb[22].mxu0 %vm743_vm0, %v2440_v47 }
0x10e3   : > { %7863 = vmatprep.mubr.msk.f32.mxu0 %vm9314_vm1, %v9315_v18 }
0x11b3   : > { %v2617_v55 = vpop.f32.mrb[16].mxu1 }
0x11b4   : > { %v7850_v60 = vpop.f32.mrb[17].mxu1  ;;  %v10031_v2 = vadd.f32 %v2617_v55, %v2531_v40 }
0x11b5   : > { %v2510_v56 = vpop.f32.mrb[22].mxu0 }
0x11b6   : > { %v2518_v45 = vadd.f32 %v2517_v50, %v2510_v56  ;;  %v2527_v49 = vadd.f32 %v2525_v17, %v2510_v56  ;;  %v7839_v53 = vpop.f32.mrb[23].mxu0 }
0x11b8   : > { %2786 = vrot.lane.b32.xlu1 %v2527_v49, %s10934_s27  ;;  %2623 = vrot.lane.b32.xlu0 %v2527_v49, %s10928_s23  ;;  %v2621_v27 = vmul.f32 0.35355338, %v2518_v45 }
0x11bc   : > { %2952 = vrot.lane.b32.xlu1 %v2527_v49, %s10935_s25  ;;  %2784 = vrot.lane.b32.xlu0 %v2621_v27, %s10936_s2 }
0x11c0   : > { %3117 = vrot.lane.b32.xlu1 %v2527_v49, %s10937_s0  ;;  %2950 = vrot.lane.b32.xlu0 %v2621_v27, %s10938_s26 }
0x11c4   : > { %3115 = vrot.lane.b32.xlu0 %v2621_v27, %s10939_s19 }
0x122a   : > { %v2624_v51 = vpop.permute.xlu0 %2623  ;;  %v2787_v62 = vpop.permute.xlu1 %2786 }
0x122b   : > { %7852 = vmatpush3.xpose.msk.msra.mxu1 %vm1454_vm3, %v2624_v51  ;;  %7862 = vmatpush3.xpose.msk.msra.mxu0 %vm1454_vm3, %v2787_v62 }
0x122c   : > { %7871 = vmatprep.subr.mxu0 %v9315_v18  ;;  %7856 = vmatprep.subr.mxu1 %v9315_v18 }
0x122e   : > { %v2785_v6 = vpop.permute.xlu0 %2784  ;;  %v2953_v58 = vpop.permute.xlu1 %2952  ;;  %7854 = vmatmul.mubr.msk.f32.vlgmr.msra.gmra.mrb[18].mxu1 %vm1454_vm3, %v2621_v27 }
0x122f   : > { %7857 = vmatpush3.msra.mxu1 %v10031_v2  ;;  %7864 = vmatmul.mubr.msk.f32.vlgmr.msra.gmra.mrb[24].mxu0 %vm1454_vm3, %v2785_v6 }
0x1230   : > { %7872 = vmatpush3.xpose.msk.msra.mxu0 %vm1454_vm3, %v2953_v58  ;;  %7873 = vmatprep.mubr.msk.f32.mxu0 %vm9314_vm1, %v9315_v18 }
0x1231   : > { %7881 = vmatprep.subr.mxu0 %v9315_v18  ;;  %7858 = vmatprep.mubr.msk.f32.mxu1 %vm9314_vm1, %v9315_v18 }
0x1232   : > { %v2951_v29 = vpop.permute.xlu0 %2950  ;;  %v3118_v8 = vpop.permute.xlu1 %3117  ;;  %7866 = vmatprep.subr.mxu1 %v9315_v18 }
0x1233   : > { %7874 = vmatmul.mubr.msk.f32.vlgmr.msra.gmra.mrb[26].mxu0 %vm1454_vm3, %v2951_v29 }
0x1234   : > { %7882 = vmatpush3.xpose.msk.msra.mxu0 %vm1454_vm3, %v3118_v8  ;;  %7883 = vmatprep.mubr.msk.f32.mxu0 %vm9314_vm1, %v9315_v18 }
0x1235   : > { %8545 = vmatprep.subr.bf16.mxu0 %v9313_v10 }
0x1236   : > { %v3116_v48 = vpop.permute.xlu0 %3115 }
0x1237   : > { %7884 = vmatmul.mubr.msk.f32.vlgmr.msra.gmra.mrb[28].mxu0 %vm1454_vm3, %v3116_v48 }
0x1238   : > { %7899 = vmatprep.mubr.msk.f32.mxu0 %vm9314_vm1, %v9315_v18 }
0x1301   : > { %v2696_v13 = vpop.f32.mrb[18].mxu1 }
0x1302   : > { %v7855_v14 = vpop.f32.mrb[19].mxu1  ;;  %v2858_v46 = vpop.f32.mrb[24].mxu0  ;;  %v2700_v16 = vsel %vm1454_vm3, %v2696_v13, -inf }
0x1303   : > { %v7865_v21 = vpop.f32.mrb[25].mxu0  ;;  %2701 = vmax.xlane.f32.xlu1 %v2700_v16  ;;  %v2862_v32 = vsel %vm1454_vm3, %v2858_v46, -inf }
0x1304   : > { %2863 = vmax.xlane.f32.xlu0 %v2862_v32 }
0x1306   : > { %v3024_v57 = vpop.f32.mrb[26].mxu0 }
0x1307   : > { %v7875_v22 = vpop.f32.mrb[27].mxu0  ;;  %v3028_v59 = vsel %vm1454_vm3, %v3024_v57, -inf }
0x1308   : > { %3029 = vmax.xlane.f32.xlu0 %v3028_v59 }
0x130a   : > { %v3189_v9 = vpop.f32.mrb[28].mxu0 }
0x130b   : > { %v7885_v0 = vpop.f32.mrb[29].mxu0  ;;  %v3193_v25 = vsel %vm1454_vm3, %v3189_v9, -inf }
0x130c   : > { %3194 = vmax.xlane.f32.xlu1 %v3193_v25 }
0x1390   : > { %v2702_v28 = vpop.xlane.xlu1 %2701 }
0x1391   : > { %v2703_v33 = vsub.f32 %v2696_v13, %v2702_v28  ;;  %v2864_v34 = vpop.xlane.xlu0 %2863 }
0x1392   : > { %v2865_v36 = vsub.f32 %v2858_v46, %v2864_v34 }
0x1393   : > { %v2704_v37 = vmul.f32 1.442695, %v2703_v33 }
0x1394   : > { %v2866_v39 = vmul.f32 1.442695, %v2865_v36 }
0x1395   : > { %9226 = vpow2.f32 %v2704_v37  ;;  %v3030_v47 = vpop.xlane.xlu0 %3029 }
0x1396   : > { %9228 = vpow2.f32 %v2866_v39  ;;  %v3031_v50 = vsub.f32 %v3024_v57, %v3030_v47 }
0x1398   : > { %v3032_v55 = vmul.f32 1.442695, %v3031_v50 }
0x1399   : > { %v3195_v27 = vpop.xlane.xlu1 %3194 }
0x139a   : > { %9230 = vpow2.f32 %v3032_v55  ;;  %v3196_v40 = vsub.f32 %v3189_v9, %v3195_v27 }
0x139c   : > { %v3197_v51 = vmul.f32 1.442695, %v3196_v40 }
0x139e   : > { %9232 = vpow2.f32 %v3197_v51 }
0x139f   : > { %v9227_v17 = vpop.eup %9226 }
0x13a0   : > { %v9229_v60 = vpop.eup %9228  ;;  %v2706_v56 = vsel %vm1454_vm3, %v9227_v17, 0.0 }
0x13a1   : > { %2707 = vadd.xlane.f32.xlu0 %v2706_v56  ;;  %v2868_v45 = vsel %vm1454_vm3, %v9229_v60, 0.0 }
0x13a2   : > { %2869 = vadd.xlane.f32.xlu1 %v2868_v45 }
0x13a4   : > { %v9231_v49 = vpop.eup %9230 }
0x13a5   : > { %v3034_v53 = vsel %vm1454_vm3, %v9231_v49, 0.0 }
0x13a6   : > { %3035 = vadd.xlane.f32.xlu0 %v3034_v53 }
0x13a8   : > { %v9233_v62 = vpop.eup %9232 }
0x13a9   : > { %v3199_v6 = vsel %vm1454_vm3, %v9233_v62, 0.0 }
0x13b3   : > { %3039 = vrot.lane.b32.xlu1 %v10031_v2, %s10938_s26 }
0x13bc   : > { %2874 = vrot.lane.b32.xlu0 %v10031_v2, %s10936_s2 }
0x13c0   : > { %9017 = vrot.lane.b32.xlu0 %v9962_v61, %s10931_s1 }
0x13d7   : > { %3200 = vadd.xlane.f32.xlu1 %v3199_v6 }
0x13e8   : > { %3204 = vrot.lane.b32.xlu1 %v10031_v2, %s10939_s19 }
0x13ec   : > { %9022 = vrot.lane.b32.xlu1 %v9969_v23, %s10931_s1 }
0x142e   : > { %v2708_v58 = vpop.xlane.xlu0 %2707 }
0x142f   : > { %9234 = vrcp.f32 %v2708_v58  ;;  %v2870_v29 = vpop.xlane.xlu1 %2869 }
0x1430   : > { %9236 = vrcp.f32 %v2870_v29 }
0x1433   : > { %v3036_v8 = vpop.xlane.xlu0 %3035  ;;  %v3040_v21 = vpop.permute.xlu1 %3039 }
0x1434   : > { %9238 = vrcp.f32 %v3036_v8 }
0x1437   : > { %v2875_v46 = vpop.permute.xlu0 %2874 }
0x1439   : > { %v9235_v48 = vpop.eup %9234 }
0x143a   : > { %v2710_v13 = vmul.f32 %v9235_v48, %v9227_v17  ;;  %v9237_v14 = vpop.eup %9236 }
0x143b   : > { %v2872_v16 = vmul.f32 %v9237_v14, %v9229_v60  ;;  %v9018_v0 = vpop.permute.xlu0 %9017 }
0x143c   : > { %7859 = vmatmul.mubr.msk.f32.vlgmr.msra.gmra.mrb[20].mxu1 %vm1454_vm3, %v2710_v13  ;;  %v9020_v25 = vunpack.i.h.bf16 %v9018_v0  ;;  %v9019_v28 = vunpack.i.l.bf16 %v9018_v0 }
0x143d   : > { %7867 = vmatpush3.msra.mxu1 %v2875_v46  ;;  %7868 = vmatprep.mubr.msk.f32.mxu1 %vm9314_vm1, %v9315_v18 }
0x143e   : > { %7876 = vmatprep.subr.mxu1 %v9315_v18  ;;  %v9239_v2 = vpop.eup %9238  ;;  %v8546_v33 = vpack.c.bf16 %v9020_v25, %v9019_v28  ;;  %v3401_v25 = vrot.slane %v9989_v63, %v9626_v4 }
0x143f   : > { %v3038_v32 = vmul.f32 %v9239_v2, %v9231_v49 }
0x1440   : > { %7869 = vmatmul.mubr.msk.f32.vlgmr.msra.gmra.mrb[22].mxu1 %vm1454_vm3, %v2872_v16  ;;  %8547 = vmatpush3.bf16.msra.mxu0 %v8546_v33 }
0x1441   : > { %7877 = vmatpush3.msra.mxu1 %v3040_v21  ;;  %7878 = vmatprep.mubr.msk.f32.mxu1 %vm9314_vm1, %v9315_v18  ;;  %v3408_v21 = vld [vmem:[%s10849_s11] sm:$0xff] }
0x1442   : > { %7886 = vmatprep.subr.mxu1 %v9315_v18  ;;  %8548 = vmatprep.subr.bf16.mxu0 %v9313_v10 }
0x1444   : > { %7879 = vmatmul.mubr.msk.f32.vlgmr.msra.gmra.mrb[24].mxu1 %vm1454_vm3, %v3038_v32 }
0x1445   : > { %7888 = vmatprep.mubr.msk.f32.mxu1 %vm9314_vm1, %v9315_v18 }
0x1464   : > { %v3201_v57 = vpop.xlane.xlu1 %3200 }
0x1465   : > { %9240 = vrcp.f32 %v3201_v57  ;;  %v3411_v57 = vld [vmem:[%s10849_s11 + $0x18] sm:$0xff] }
0x1468   : > { %v3205_v22 = vpop.permute.xlu1 %3204 }
0x1469   : > { %7887 = vmatpush3.msra.mxu1 %v3205_v22 }
0x146a   : > { %8551 = vmatprep.subr.bf16.mxu1 %v9313_v10 }
0x146c   : > { %v9023_v34 = vpop.permute.xlu1 %9022 }
0x146d   : > { %v9025_v36 = vunpack.i.h.bf16 %v9023_v34  ;;  %v9024_v37 = vunpack.i.l.bf16 %v9023_v34  ;;  %v3406_v34 = vrot.slane %v9994_v30, %v9626_v4 }
0x146f   : > { %v9241_v59 = vpop.eup %9240  ;;  %v8549_v39 = vpack.c.bf16 %v9025_v36, %v9024_v37 }
0x1470   : > { %v3203_v9 = vmul.f32 %v9241_v59, %v9233_v62  ;;  %v3298_v62 = vrot.slane %v9981_v7, %v9945_v52  ;;  %v3409_v7 = vld [vmem:[%s10849_s11 + $0x8] sm:$0xff] }
0x1471   : > { %8550 = vmatpush3.bf16.msra.mxu0 %v8549_v39  ;;  %v8552_v32 = vpack.c.bf16 %v3409_v7, %v3408_v21  ;;  %v3519_v39 = vld [vmem:[%s10851_s13] sm:$0xff] }
0x1472   : > { %7889 = vmatmul.mubr.msk.f32.vlgmr.msra.gmra.mrb[26].mxu1 %vm1454_vm3, %v3203_v9  ;;  %8557 = vmatprep.subr.bf16.mxu0 %v9313_v10 }
0x1473   : > { %7910 = vmatprep.mubr.msk.f32.mxu1 %vm9314_vm1, %v9315_v18  ;;  %8553 = vmatpush3.bf16.msra.mxu1 %v8552_v32 }
0x1474   : > { %8554 = vmatprep.subr.bf16.mxu1 %v9313_v10 }
0x150f   : > { %v2780_v47 = vpop.f32.mrb[20].mxu1 }
0x1510   : > { %v7860_v50 = vpop.f32.mrb[21].mxu1 }
0x1513   : > { %v2946_v61 = vpop.f32.mrb[22].mxu1 }
0x1514   : > { %3281 = vrot.lane.b32.xlu0 %v2946_v61, %s10940_s20  ;;  %v7870_v23 = vpop.f32.mrb[23].mxu1  ;;  %v3521_v61 = vld [vmem:[%s10851_s13 + $0x10] sm:$0xff] }
0x1515   : > { %v3522_v23 = vld [vmem:[%s10851_s13 + $0x18] sm:$0xff] }
0x1517   : > { %v3111_v55 = vpop.f32.mrb[24].mxu1 }
0x1518   : > { %3285 = vrot.lane.b32.xlu1 %v3111_v55, %s10941_s4  ;;  %v7880_v17 = vpop.f32.mrb[25].mxu1  ;;  %v8561_v55 = vpack.c.bf16 %v3522_v23, %v3521_v61 }
0x1519   : > { %v3523_v17 = vld [vmem:[%s10851_s13 + $0x20] sm:$0xff] }
0x1545   : > { %v3276_v60 = vpop.f32.mrb[26].mxu1 }
0x1546   : > { %3289 = vrot.lane.b32.xlu0 %v3276_v60, %s10942_s21  ;;  %v7890_v56 = vpop.f32.mrb[27].mxu1  ;;  %v3524_v60 = vld [vmem:[%s10851_s13 + $0x28] sm:$0xff]  ;;  %s10944_s21 = sld [smem:[#allocation10_spill]] }
0x1547   : > { %v8564_v56 = vpack.c.bf16 %v3524_v60, %v3523_v17 }
0x1586   : > { %v3282_v45 = vpop.permute.xlu0 %3281 }
0x1587   : > { %v3292_v53 = vsel %vm1454_vm3, %v2780_v47, %v3282_v45  ;;  %v3520_v47 = vld [vmem:[%s10851_s13 + $0x8] sm:$0xff]  ;;  %v3525_v45 = vld [vmem:[%s10851_s13 + $0x30] sm:$0xff] }
0x1588   : > { %v8558_v50 = vpack.c.bf16 %v3520_v47, %v3519_v39 }
0x158a   : > { %v3286_v49 = vpop.permute.xlu1 %3285 }
0x158b   : > { %v3293_v27 = vsel %vm2323_vm8, %v3292_v53, %v3286_v49  ;;  %v3526_v49 = vld [vmem:[%s10851_s13 + $0x38] sm:$0xff] }
0x158c   : > { %v8567_v53 = vpack.c.bf16 %v3526_v49, %v3525_v45 }
0x15b8   : > { %v3290_v40 = vpop.permute.xlu0 %3289 }
0x15b9   : > { %v3294_v51 = vsel %vm2325_vm9, %v3293_v27, %v3290_v40  ;;  %v3527_v27 = vld [vmem:[%s10851_s13 + $0x40] sm:$0xff]  ;;  %v3528_v40 = vld [vmem:[%s10851_s13 + $0x48] sm:$0xff] }
0x15ba   : > { %7900 = vmatmul.mubr.msk.f32.vlgmr.msra.gmra.mrb[30].mxu0 %vm743_vm0, %v3294_v51  ;;  %v8570_v51 = vpack.c.bf16 %v3528_v40, %v3527_v27  ;;  %v7075_v40 = vld [vmem:[%s10852_s14] ss:$0 sm:$0xff] }
0x15bb   : > { %7945 = vmatprep.mubr.msk.f32.mxu0 %vm9314_vm1, %v9315_v18  ;;  %8559 = vmatpush3.bf16.msra.mxu0 %v8558_v50 }
0x15bc   : > { %8560 = vmatprep.subr.bf16.mxu0 %v9313_v10 }
0x15bf   : > { %8562 = vmatpush3.bf16.msra.mxu0 %v8561_v55 }
0x15c0   : > { %8563 = vmatprep.subr.bf16.mxu0 %v9313_v10 }
0x15c3   : > { %8565 = vmatpush3.bf16.msra.mxu0 %v8564_v56 }
0x15c4   : > { %8566 = vmatprep.subr.bf16.mxu0 %v9313_v10 }
0x15c7   : > { %8568 = vmatpush3.bf16.msra.mxu0 %v8567_v53 }
0x15c8   : > { %8569 = vmatprep.subr.bf16.mxu0 %v9313_v10 }
0x15cb   : > { %8571 = vmatpush3.bf16.msra.mxu0 %v8570_v51 }
0x15cc   : > { %8572 = vmatprep.subr.bf16.mxu0 %v9313_v10 }
0x168d   : > { %v3380_v6 = vpop.f32.mrb[30].mxu0 }
0x168e   : > { %v3381_v58 = vadd.f32 %v3380_v6, %v3298_v62  ;;  %v7901_v29 = vpop.f32.mrb[31].mxu0  ;;  %v3529_v62 = vld [vmem:[%s10851_s13 + $0x50] sm:$0xff]  ;;  %v3530_v6 = vld [vmem:[%s10851_s13 + $0x58] sm:$0xff] }
0x168f   : > { %v3531_v29 = vld [vmem:[%s10851_s13 + $0x60] sm:$0xff] }
0x1690   : > { %v3384_v8 = vadd.f32 %v3381_v58, %v10000_v42  ;;  %v3410_v42 = vld [vmem:[%s10849_s11 + $0x10] sm:$0xff]  ;;  %v8573_v58 = vpack.c.bf16 %v3530_v6, %v3529_v62 }
0x1691   : > { %v8555_v22 = vpack.c.bf16 %v3411_v57, %v3410_v42 }
0x1692   : > { %v3385_v48 = vsel %vm743_vm0, %v3384_v8, 0.0  ;;  %8574 = vmatpush3.bf16.msra.mxu0 %v8573_v58 }
0x1693   : > { %3386 = vadd.xlane.f32.xlu1 %v3385_v48  ;;  %8556 = vmatpush3.bf16.msra.mxu1 %v8555_v22 }
0x1694   : > { %8581 = vmatprep.subr.bf16.mxu1 %v9313_v10  ;;  %8575 = vmatprep.subr.bf16.mxu0 %v9313_v10 }
0x1720   : > { %v3387_v13 = vpop.xlane.xlu1 %3386 }
0x1721   : > { %v3388_v14 = vmul.f32 0.03125, %v3387_v13  ;;  %v3533_v13 = vld [vmem:[%s10851_s13 + $0x70] sm:$0xff] }
0x1723   : > { %v3389_v46 = vsub.f32 %v3384_v8, %v3388_v14  ;;  %v3532_v8 = vld [vmem:[%s10851_s13 + $0x68] sm:$0xff]  ;;  %v3534_v14 = vld [vmem:[%s10851_s13 + $0x78] sm:$0xff] }
0x1724   : > { %v8576_v48 = vpack.c.bf16 %v3532_v8, %v3531_v29 }
0x1725   : > { %v3390_v16 = vmul.f32 %v3389_v46, %v3389_v46 }
0x1726   : > { %8577 = vmatpush3.bf16.msra.mxu0 %v8576_v48 }
0x1727   : > { %v3391_v2 = vsel %vm743_vm0, %v3390_v16, 0.0  ;;  %8578 = vmatprep.subr.bf16.mxu0 %v9313_v10  ;;  %v7073_v16 = vld [vmem:[%s10850_s12] ss:$0 sm:$0xff] }
0x1728   : > { %3392 = vadd.xlane.f32.xlu0 %v3391_v2 }
0x17b5   : > { %v3393_v59 = vpop.xlane.xlu0 %3392 }
0x17b6   : > { %v3394_v9 = vmul.f32 0.03125, %v3393_v59 }
0x17b8   : > { %v3395_v0 = vadd.f32 1e-05, %v3394_v9 }
0x17ba   : > { %9242 = vrsqrt.f32 %v3395_v0 }
0x17c4   : > { %v9243_v28 = vpop.eup %9242 }
0x17c5   : > { %v3397_v33 = vmul.f32 %v9243_v28, %v3389_v46  ;;  %v8579_v46 = vpack.c.bf16 %v3534_v14, %v3533_v13 }
0x17c7   : > { %v3402_v36 = vmul.f32 %v3401_v25, %v3397_v33  ;;  %8580 = vmatpush3.bf16.msra.mxu0 %v8579_v46 }
0x17c8   : > { %8605 = vmatprep.subr.bf16.mxu0 %v9313_v10 }
0x17c9   : > { %v10118_v37 = vadd.f32 %v3406_v34, %v3402_v36 }
0x17cb   : > { %7911 = vmatmul.mubr.msk.f32.vlgmr.msra.gmra.mrb[28].mxu1 %vm743_vm0, %v10118_v37 }
0x17cc   : > { %8583 = vmatpush3.bf16.msra.mxu1 %v9471_v11  ;;  %7956 = vmatprep.mubr.msk.f32.mxu1 %vm9314_vm1, %v9315_v18 }
0x17cd   : > { %8584 = vmatprep.subr.bf16.mxu1 %v9313_v10 }
0x17d0   : > { %8586 = vmatpush3.bf16.msra.mxu1 %v9495_v19 }
0x17d1   : > { %8587 = vmatprep.subr.bf16.mxu1 %v9313_v10 }
0x189e   : > { %v3488_v2 = vpop.f32.mrb[28].mxu1 }
0x189f   : > { %v3489_v21 = vadd.f32 %v7073_v16, %v3488_v2  ;;  %v7912_v7 = vpop.f32.mrb[29].mxu1 }
0x18a0   : > { %v3629_v7 = vrot.slane %v9989_v63, %v9646_v24 }
0x18a1   : > { %v3493_v32 = vmul.f32 0.70710677, %v3489_v21  ;;  %v3492_v49 = vmul.f32 0.5, %v3489_v21 }
0x18a3   : > { %v3494_v42 = vand.u32 2147483647, %v3493_v32  ;;  %vm3514_vm10 = vcmp.lt.f32.partialorder %v3493_v32, 0.0 }
0x18a5   : > { %v3495_v57 = vmul.f32 0.3275911, %v3494_v42  ;;  %v3508_v59 = vsub.f32 0.0, %v3494_v42 }
0x18a7   : > { %v3496_v22 = vadd.f32 1.0, %v3495_v57  ;;  %v3509_v0 = vmul.f32 %v3508_v59, %v3494_v42 }
0x18a9   : > { %9244 = vrcp.f32 %v3496_v22  ;;  %v3510_v33 = vmul.f32 1.442695, %v3509_v0 }
0x18ab   : > { %9246 = vpow2.f32 %v3510_v33 }
0x18b3   : > { %v9245_v9 = vpop.eup %9244 }
0x18b4   : > { %v3499_v25 = vmul.f32 1.0614054, %v9245_v9 }
0x18b5   : > { %v9247_v55 = vpop.eup %9246 }
0x18b6   : > { %v3500_v28 = vadd.f32 -1.4531521, %v3499_v25 }
0x18b8   : > { %v3501_v34 = vmul.f32 %v9245_v9, %v3500_v28 }
0x18ba   : > { %v3502_v36 = vadd.f32 1.4214138, %v3501_v34 }
0x18bc   : > { %v3503_v39 = vmul.f32 %v9245_v9, %v3502_v36 }
0x18be   : > { %v3504_v47 = vadd.f32 -0.28449672, %v3503_v39 }
0x18c0   : > { %v3505_v50 = vmul.f32 %v9245_v9, %v3504_v47  ;;  %v9298_v47 = vld [vmem:[%s10853_s15] ss:$0 sm:$0xff] }
0x18c2   : > { %v3506_v61 = vadd.f32 0.2548296, %v3505_v50 }
0x18c4   : > { %v3507_v23 = vmul.f32 %v9245_v9, %v3506_v61  ;;  %v9299_v61 = vld [vmem:[%s10854_s16] ss:$0 sm:$0xff] }
0x18c6   : > { %v3512_v17 = vmul.f32 %v9247_v55, %v3507_v23 }
0x18c8   : > { %v3513_v60 = vsub.f32 1.0, %v3512_v17  ;;  %v9300_v17 = vld [vmem:[%s10856_s18] ss:$0 sm:$0xff] }
0x18ca   : > { %v3515_v56 = vsub.f32 0.0, %v3513_v60 }
0x18cc   : > { %v3516_v45 = vsel %vm3514_vm10, %v3515_v56, %v3513_v60 }
0x18cd   : > { %v3517_v53 = vadd.f32 1.0, %v3516_v45 }
0x18cf   : > { %v3518_v27 = vmul.f32 %v3517_v53, %v3492_v49 }
0x18d1   : > { %7946 = vmatmul.mubr.f32.vlgmr.msra.gmra.mrb[32].mxu0 %v3518_v27 }
0x18d2   : > { %8607 = vmatpush3.bf16.msra.mxu0 %v9616_v1  ;;  %8000 = vmatprep.mubr.msk.f32.mxu0 %vm9314_vm1, %v9315_v18 }
0x18d3   : > { %8608 = vmatprep.subr.bf16.mxu0 %v9313_v10 }
0x18d6   : > { %8610 = vmatpush3.bf16.msra.mxu0 %v9619_v3 }
0x19a4   : > { %v3608_v51 = vpop.f32.mrb[32].mxu0 }
0x19a5   : > { %v3609_v62 = vadd.f32 %v7075_v40, %v3608_v51  ;;  %v7947_v6 = vpop.f32.mrb[33].mxu0  ;;  %v7099_v40 = vld [vmem:[%s10918_s30 + $0x20] sm:$0xff]  ;;  %v7100_v51 = vld [vmem:[%s10918_s30 + $0x28] sm:$0xff] }
0x19a6   : > { %v7102_v6 = vld [vmem:[%s10918_s30 + $0x38] sm:$0xff] }
0x19a7   : > { %v3612_v58 = vadd.f32 %v3609_v62, %v10118_v37  ;;  %v3634_v37 = vrot.slane %v9994_v30, %v9646_v24  ;;  %v7101_v62 = vld [vmem:[%s10918_s30 + $0x30] sm:$0xff] }
0x19a9   : > { %v3613_v29 = vsel %vm743_vm0, %v3612_v58, 0.0 }
0x19aa   : > { %3614 = vadd.xlane.f32.xlu0 %v3613_v29  ;;  %v10254_v29 = vpack.i.bf16 %v7102_v6, %v7101_v62 }
0x1a37   : > { %v3615_v8 = vpop.xlane.xlu0 %3614 }
0x1a38   : > { %v3616_v48 = vmul.f32 0.03125, %v3615_v8 }
0x1a3a   : > { %v3617_v13 = vsub.f32 %v3612_v58, %v3616_v48  ;;  %v10252_v58 = vpack.i.bf16 %v7100_v51, %v7099_v40 }
0x1a3c   : > { %v3618_v14 = vmul.f32 %v3617_v13, %v3617_v13 }
0x1a3e   : > { %v3619_v46 = vsel %vm743_vm0, %v3618_v14, 0.0 }
0x1a3f   : > { %3620 = vadd.xlane.f32.xlu1 %v3619_v46  ;;  %v8612_v46 = vpack.c.bf16 %v7100_v51, %v7099_v40 }
0x1acc   : > { %v3621_v16 = vpop.xlane.xlu1 %3620 }
0x1acd   : > { %v3622_v2 = vmul.f32 0.03125, %v3621_v16 }
0x1acf   : > { %v3623_v21 = vadd.f32 1e-05, %v3622_v2 }
0x1ad1   : > { %9248 = vrsqrt.f32 %v3623_v21 }
0x1adb   : > { %v9249_v32 = vpop.eup %9248 }
0x1adc   : > { %v3625_v42 = vmul.f32 %v9249_v32, %v3617_v13  ;;  %v8615_v32 = vpack.c.bf16 %v7102_v6, %v7101_v62  ;;  %v7094_v62 = vld [vmem:[%s10925_s24 + $0x58] sm:$0xff] }
0x1ade   : > { %v3630_v57 = vmul.f32 %v3629_v7, %v3625_v42 }
0x1ae0   : > { %v10202_v22 = vadd.f32 %v3634_v37, %v3630_v57 }
0x1ae2   : > { %v3636_v59 = vsel %vm743_vm0, %v10202_v22, 0.0  ;;  %v4064_v42 = vadd.f32 %v10007_v44, %v10202_v22  ;;  %v7083_v44 = vld [vmem:[%s9656_s6 + $0x40] sm:$0xff] }
0x1ae3   : > { %3637 = vadd.xlane.f32.xlu0 %v3636_v59 }
0x1af9   : > { %9027 = vrot.lane.b32.xlu0 %v10252_v58, %s10928_s23 }
0x1b70   : > { %v3638_v9 = vpop.xlane.xlu0 %3637 }
0x1b71   : > { %v3639_v0 = vmul.f32 0.03125, %v3638_v9 }
0x1b73   : > { %v3640_v25 = vsub.f32 %v10202_v22, %v3639_v0 }
0x1b74   : > { %v9028_v14 = vpop.permute.xlu0 %9027 }
0x1b75   : > { %v3641_v28 = vmul.f32 %v3640_v25, %v3640_v25  ;;  %v9030_v16 = vunpack.i.h.bf16 %v9028_v14  ;;  %v9029_v2 = vunpack.i.l.bf16 %v9028_v14 }
0x1b77   : > { %v3642_v33 = vsel %vm743_vm0, %v3641_v28, 0.0  ;;  %v8617_v7 = vpack.c.bf16 %v9030_v16, %v9029_v2 }
0x1b78   : > { %3643 = vadd.xlane.f32.xlu1 %v3642_v33 }
0x1b79   : > { %8618 = vmatprep.subr.bf16.mxu0 %v8617_v7 }
0x1b89   : > { %9032 = vrot.lane.b32.xlu1 %v10254_v29, %s10928_s23 }
0x1c05   : > { %v3644_v63 = vpop.xlane.xlu1 %3643 }
0x1c06   : > { %v3645_v34 = vmul.f32 0.03125, %v3644_v63  ;;  %v7084_v63 = vld [vmem:[%s9656_s6 + $0x48] sm:$0xff] }
0x1c08   : > { %v3646_v36 = vadd.f32 1e-05, %v3645_v34 }
0x1c09   : > { %v9033_v37 = vpop.permute.xlu1 %9032 }
0x1c0a   : > { %9250 = vrsqrt.f32 %v3646_v36  ;;  %v9035_v57 = vunpack.i.h.bf16 %v9033_v37  ;;  %v9034_v59 = vunpack.i.l.bf16 %v9033_v37  ;;  %v7085_v36 = vld [vmem:[%s9656_s6 + $0x50] sm:$0xff] }
0x1c14   : > { %v9251_v30 = vpop.eup %9250 }
0x1c15   : > { %v3648_v39 = vmul.f32 %v9251_v30, %v3640_v25  ;;  %v8621_v25 = vpack.c.bf16 %v9035_v57, %v9034_v59  ;;  %v7086_v30 = vld [vmem:[%s9656_s6 + $0x58] sm:$0xff] }
0x1c17   : > { %v3649_v50 = vmul.f32 %v9298_v47, %v3648_v39  ;;  %v7087_v39 = vld [vmem:[%s9656_s6 + $0x60] sm:$0xff]  ;;  %v7088_v47 = vld [vmem:[%s9656_s6 + $0x68] sm:$0xff] }
0x1c19   : > { %v3650_v23 = vadd.f32 %v9299_v61, %v3649_v50  ;;  %v7089_v50 = vld [vmem:[%s9656_s6 + $0x70] sm:$0xff]  ;;  %v7090_v61 = vld [vmem:[%s9656_s6 + $0x78] sm:$0xff] }
0x1c1b   : > { %7957 = vmatmul.mubr.msk.f32.vlgmr.msra.gmra.mrb[30].mxu1 %vm743_vm0, %v3650_v23 }
0x1c1c   : > { %8589 = vmatpush3.bf16.msra.mxu1 %v9482_v15  ;;  %7967 = vmatprep.mubr.msk.f32.mxu1 %vm9314_vm1, %v9315_v18 }
0x1c1d   : > { %8590 = vmatprep.subr.bf16.mxu1 %v9313_v10 }
0x1c20   : > { %8592 = vmatpush3.bf16.msra.mxu1 %v9499_v20 }
0x1c21   : > { %8593 = vmatprep.subr.bf16.mxu1 %v9313_v10 }
0x1c23   : > { %7968 = vmatmul.mubr.msk.f32.vlgmr.msra.gmra.mrb[32].mxu1 %vm743_vm0, %v3650_v23 }
0x1c24   : > { %8595 = vmatpush3.bf16.msra.mxu1 %v9518_v31  ;;  %7978 = vmatprep.mubr.msk.f32.mxu1 %vm9314_vm1, %v9315_v18 }
0x1c25   : > { %8596 = vmatprep.subr.bf16.mxu1 %v9313_v10 }
0x1c28   : > { %8598 = vmatpush3.bf16.msra.mxu1 %v9534_v35 }
0x1c29   : > { %8599 = vmatprep.subr.bf16.mxu1 %v9313_v10 }
0x1cee   : > { %v3720_v55 = vpop.f32.mrb[30].mxu1 }
0x1cef   : > { %v3721_v60 = vadd.f32 %v9300_v17, %v3720_v55  ;;  %v7958_v56 = vpop.f32.mrb[31].mxu1 }
0x1cf0   : > { %v7092_v56 = vld [vmem:[%s10925_s24 + $0x48] sm:$0xff] }
0x1cf1   : > { %7077 = vst [vmem:[%s9577_s5 + $0x8] sm:$0xff] %v3721_v60  ;;  %v10304_v60 = vld [vmem:[%s10924_s28 + $0x4] sm:$0xf] }
0x1cf6   : > { %v3792_v45 = vpop.f32.mrb[32].mxu1 }
0x1cf7   : > { %v3793_v49 = vadd.f32 %v3792_v45, %v9567_v43  ;;  %v7969_v53 = vpop.f32.mrb[33].mxu1  ;;  %v4298_v45 = vrot.slane %v10304_v60, %v9626_v4 }
0x1cf9   : > { %v3796_v27 = vmax.f32 %v3793_v49, 0.0  ;;  %v7091_v49 = vld [vmem:[%s10925_s24 + $0x40] sm:$0xff] }
0x1cfb   : > { %7979 = vmatmul.mubr.msk.f32.vlgmr.msra.gmra.mrb[34].mxu1 %vm743_vm0, %v3796_v27 }
0x1cfc   : > { %8601 = vmatpush3.bf16.msra.mxu1 %v9544_v38  ;;  %7989 = vmatprep.mubr.msk.f32.mxu1 %vm9314_vm1, %v9315_v18 }
0x1cfd   : > { %8602 = vmatprep.subr.bf16.mxu1 %v9313_v10 }
0x1d00   : > { %8604 = vmatpush3.bf16.msra.mxu1 %v9590_v54 }
0x1d01   : > { %8611 = vmatprep.subr.bf16.mxu1 %v9313_v10 }
0x1dce   : > { %v3866_v8 = vpop.f32.mrb[34].mxu1 }
0x1dcf   : > { %v3867_v48 = vadd.f32 %v3866_v8, %v9630_v5  ;;  %v7980_v13 = vpop.f32.mrb[35].mxu1  ;;  %v7093_v8 = vld [vmem:[%s10925_s24 + $0x50] sm:$0xff] }
0x1dd1   : > { %v3870_v21 = vmax.f32 %v3867_v48, 0.0 }
0x1dd3   : > { %7990 = vmatmul.mubr.msk.f32.vlgmr.msra.gmra.mrb[36].mxu1 %vm743_vm0, %v3870_v21  ;;  %v7096_v21 = vld [vmem:[%s10925_s24 + $0x68] sm:$0xff] }
0x1dd4   : > { %8613 = vmatpush3.bf16.msra.mxu1 %v8612_v46  ;;  %8011 = vmatprep.mubr.msk.f32.mxu1 %vm9314_vm1, %v9315_v18 }
0x1dd5   : > { %8614 = vmatprep.subr.bf16.mxu1 %v9313_v10 }
0x1dd8   : > { %8616 = vmatpush3.bf16.msra.mxu1 %v8615_v32 }
0x1dd9   : > { %8625 = vmatprep.subr.bf16.mxu1 %v9313_v10 }
0x1ddb   : > { %8012 = vmatmul.mubr.msk.f32.vlgmr.msra.gmra.mrb[38].mxu1 %vm743_vm0, %v4064_v42  ;;  %v7095_v42 = vld [vmem:[%s10925_s24 + $0x60] sm:$0xff] }
0x1ddc   : > { %8050 = vmatprep.mubr.msk.f32.mxu1 %vm9314_vm1, %v9315_v18 }
0x1ea6   : > { %v3940_v9 = vpop.f32.mrb[36].mxu1 }
0x1ea7   : > { %v3941_v0 = vadd.f32 %v3940_v9, %v9651_v26  ;;  %v7991_v28 = vpop.f32.mrb[37].mxu1 }
0x1ea8   : > { %v7098_v28 = vld [vmem:[%s10925_s24 + $0x78] sm:$0xff] }
0x1ea9   : > { %8001 = vmatmul.mubr.msk.f32.vlgmr.msra.gmra.mrb[34].mxu0 %vm743_vm0, %v3941_v0 }
0x1eaa   : > { %8620 = vmatpush3.bf16.msra.mxu0 %v8617_v7  ;;  %8022 = vmatprep.mubr.msk.f32.mxu0 %vm743_vm0, %v7083_v44 }
0x1eab   : > { %8622 = vmatprep.subr.bf16.mxu0 %v8621_v25 }
0x1eae   : > { %v10275_v33 = vpop.f32.mrb[38].mxu1  ;;  %8624 = vmatpush3.bf16.msra.mxu0 %v8621_v25 }
0x1eaf   : > { %v8013_v34 = vpop.f32.mrb[39].mxu1  ;;  %8641 = vmatprep.subr.bf16.mxu0 %v9313_v10 }
0x1eb0   : > { %v7097_v34 = vld [vmem:[%s10925_s24 + $0x70] sm:$0xff]  ;;  %s10949_s24 = smov 64  }
0x1eb1   : > { %8023 = vmatmul.mubr.msk.f32.vlgmr.msra.gmra.mrb[36].mxu0 %vm743_vm0, %v7084_v63 }
0x1eb2   : > { %8025 = vmatprep.mubr.msk.f32.mxu0 %vm743_vm0, %v7085_v36 }
0x1eb5   : > { %8026 = vmatmul.mubr.msk.f32.gmra.mrb[38].mxu0 %vm743_vm0, %v7086_v30 }
0x1eb6   : > { %8028 = vmatprep.mubr.msk.f32.mxu0 %vm743_vm0, %v7087_v39 }
0x1eb9   : > { %8029 = vmatmul.mubr.msk.f32.gmra.mrb[40].mxu0 %vm743_vm0, %v7088_v47 }
0x1eba   : > { %8031 = vmatprep.mubr.msk.f32.mxu0 %vm743_vm0, %v7089_v50 }
0x1ebd   : > { %8032 = vmatmul.mubr.msk.f32.gmra.mrb[42].mxu0 %vm743_vm0, %v7090_v61 }
0x1ebe   : > { %8069 = vmatprep.mubr.msk.f32.mxu0 %vm9314_vm1, %v9315_v18 }
0x1f7c   : > { %v10294_v23 = vpop.f32.mrb[34].mxu0 }
0x1f7d   : > { %7082 = vst.msk [vmem:[%s9686_s17 + $0x8] sm:$0xff] %vm1155_vm2, %v10294_v23  ;;  %v8002_v55 = vpop.f32.mrb[35].mxu0  ;;  %v4019_v17 = vsel %vm1155_vm2, %v10294_v23, -inf  ;;  %vm4023_vm12 = vcmp.lt.f32.partialorder %v10294_v23, 0.0 }
0x1f7e   : > { %4020 = vmax.xlane.f32.xlu1 %v4019_v17 }
0x1f84   : > { %v10314_v53 = vpop.f32.mrb[36].mxu0 }
0x1f85   : > { %v4288_v27 = vadd.f32 %v10314_v53, %v7092_v56  ;;  %v10317_v40 = vpop.f32.mrb[37].mxu0 }
0x1f86   : > { %v4287_v51 = vadd.f32 %v7091_v49, %v10317_v40 }
0x1f87   : > { %v4300_v6 = vadd.f32 %v4298_v45, %v4288_v27 }
0x1f88   : > { %v4299_v48 = vadd.f32 %v4298_v45, %v4287_v51  ;;  %v8027_v13 = vpop.f32.mrb[38].mxu0  ;;  %v4068_v51 = vrot.slane %v10304_v60, %v9557_v41 }
0x1f89   : > { %v4290_v14 = vadd.f32 %v8027_v13, %v7094_v62  ;;  %v4258_v46 = vpop.f32.mrb[39].mxu0 }
0x1f8a   : > { %v8626_v16 = vpack.c.bf16 %v4300_v6, %v4299_v48  ;;  %v4289_v2 = vadd.f32 %v7093_v8, %v4258_v46  ;;  %v10329_v7 = vpack.i.bf16 %v4300_v6, %v4299_v48  ;;  %v4139_v62 = vadd.f32 %v10275_v33, %v4068_v51 }
0x1f8b   : > { %v4302_v32 = vadd.f32 %v4298_v45, %v4290_v14 }
0x1f8c   : > { %v4301_v37 = vadd.f32 %v4298_v45, %v4289_v2  ;;  %8628 = vmatpush3.bf16.xpose.msk.msra.mxu1 %vm9716_vm4, %v8626_v16  ;;  %v8030_v57 = vpop.f32.mrb[40].mxu0  ;;  %v4310_v2 = vrot.slane %v10304_v60, %v9646_v24 }
0x1f8d   : > { %v4292_v59 = vadd.f32 %v8030_v57, %v7096_v21  ;;  %8629 = vmatprep.subr.bf16.mxu1 %v9313_v10  ;;  %v4268_v9 = vpop.f32.mrb[41].mxu0 }
0x1f8e   : > { %v8630_v0 = vpack.c.bf16 %v4302_v32, %v4301_v37  ;;  %v4291_v25 = vadd.f32 %v7095_v42, %v4268_v9  ;;  %v10340_v44 = vpack.i.bf16 %v4302_v32, %v4301_v37 }
0x1f8f   : > { %v4304_v63 = vadd.f32 %v4298_v45, %v4292_v59 }
0x1f90   : > { %v4303_v36 = vadd.f32 %v4298_v45, %v4291_v25  ;;  %v8033_v30 = vpop.f32.mrb[42].mxu0 }
0x1f91   : > { %v4294_v39 = vadd.f32 %v8033_v30, %v7098_v28  ;;  %v4278_v47 = vpop.f32.mrb[43].mxu0 }
0x1f92   : > { %v8634_v50 = vpack.c.bf16 %v4304_v63, %v4303_v36  ;;  %v4293_v61 = vadd.f32 %v7097_v34, %v4278_v47  ;;  %v10345_v55 = vpack.i.bf16 %v4304_v63, %v4303_v36 }
0x1f93   : > { %v4306_v17 = vadd.f32 %v4298_v45, %v4294_v39 }
0x1f94   : > { %8632 = vmatpush3.bf16.xpose.msk.msra.mxu1 %vm9716_vm4, %v8630_v0  ;;  %v4305_v56 = vadd.f32 %v4298_v45, %v4293_v61  ;;  %v10361_v45 = vmul.f32 0.35355338, %v4139_v62 }
0x1f95   : > { %8633 = vmatprep.subr.bf16.mxu1 %v9313_v10 }
0x1f96   : > { %v8638_v49 = vpack.c.bf16 %v4306_v17, %v4305_v56  ;;  %v10350_v27 = vpack.i.bf16 %v4306_v17, %v4305_v56 }
0x1f9c   : > { %8636 = vmatpush3.bf16.xpose.msk.msra.mxu1 %vm9716_vm4, %v8634_v50 }
0x1f9d   : > { %8637 = vmatprep.subr.bf16.mxu1 %v9313_v10 }
0x1fa4   : > { %8640 = vmatpush3.bf16.xpose.msk.msra.mxu1 %vm9716_vm4, %v8638_v49 }
0x1fa5   : > { %8669 = vmatprep.subr.bf16.mxu1 %v9313_v10 }
0x1fab   : > { %8051 = vmatmul.mubr.msk.f32.vlgmr.msra.gmra.mrb[40].mxu1 %vm1454_vm3, %v10361_v45 }
0x1fac   : > { %8107 = vmatprep.mubr.msk.f32.mxu1 %vm9314_vm1, %v9315_v18 }
0x200b   : > { %v4021_v6 = vpop.xlane.xlu1 %4020 }
0x200c   : > { %vm4022_vm11 = vcmp.ge.f32.partialorder %v4021_v6, 0.0 }
0x200d   : > { %vm4026_vm13 = vmand %vm4023_vm12, %vm4022_vm11 }
0x200e   : > { %v10369_v8 = vsel %vm4026_vm13, -1e+30, %v9315_v18 }
0x207e   : > { %v4417_v48 = vpop.f32.mrb[40].mxu1 }
0x207f   : > { %v4418_v33 = vadd.f32 %v4417_v48, %v10369_v8  ;;  %v8052_v14 = vpop.f32.mrb[41].mxu1 }
0x2081   : > { %v4421_v16 = vsel %vm1155_vm2, %v4418_v33, -inf }
0x2082   : > { %4422 = vmax.xlane.f32.xlu0 %v4421_v16 }
0x2098   : > { %4312 = vrot.lane.b32.xlu0 %v4310_v2, %s10931_s1 }
0x210f   : > { %v4423_v21 = vpop.xlane.xlu0 %4422 }
0x2113   : > { %v4313_v32 = vpop.permute.xlu0 %4312 }
0x2114   : > { %v4317_v42 = vadd.f32 %v4313_v32, %v4258_v46  ;;  %v4318_v23 = vadd.f32 %v8027_v13, %v4313_v32  ;;  %v4315_v37 = vadd.f32 %v4313_v32, %v10317_v40  ;;  %v4316_v59 = vadd.f32 %v10314_v53, %v4313_v32 }
0x2115   : > { %v4321_v0 = vadd.f32 %v4313_v32, %v4278_v47  ;;  %v4322_v25 = vadd.f32 %v8033_v30, %v4313_v32  ;;  %v4319_v28 = vadd.f32 %v4313_v32, %v4268_v9  ;;  %v4320_v34 = vadd.f32 %v8030_v57, %v4313_v32 }
0x2116   : > { %v10378_v63 = vpack.i.bf16 %v4318_v23, %v4317_v42  ;;  %v10380_v36 = vpack.i.bf16 %v4316_v59, %v4315_v37  ;;  %v4424_v53 = vsub.f32 %v4418_v33, %v4423_v21 }
0x2117   : > { %v10382_v39 = vpack.i.bf16 %v4322_v25, %v4321_v0  ;;  %v10386_v50 = vpack.i.bf16 %v4320_v34, %v4319_v28 }
0x2118   : > { %9042 = vrot.lane.b32.xlu0 %v10378_v63, %s10928_s23  ;;  %9037 = vrot.lane.b32.xlu1 %v10380_v36, %s10928_s23  ;;  %v4425_v40 = vmul.f32 1.442695, %v4424_v53 }
0x211a   : > { %9252 = vpow2.f32 %v4425_v40 }
0x211c   : > { %9052 = vrot.lane.b32.xlu0 %v10382_v39, %s10928_s23  ;;  %9047 = vrot.lane.b32.xlu1 %v10386_v50, %s10928_s23 }
0x2120   : > { %9062 = vrot.lane.b32.xlu0 %v10340_v44, %s10936_s2 }
0x2124   : > { %9072 = vrot.lane.b32.xlu0 %v10350_v27, %s10936_s2  ;;  %v9253_v13 = vpop.eup %9252 }
0x2125   : > { %v4427_v46 = vsel %vm1155_vm2, %v9253_v13, 0.0 }
0x2140   : > { %4428 = vadd.xlane.f32.xlu1 %v4427_v46 }
0x2151   : > { %9057 = vrot.lane.b32.xlu1 %v10329_v7, %s10936_s2 }
0x2155   : > { %9067 = vrot.lane.b32.xlu1 %v10345_v55, %s10936_s2 }
0x2159   : > { %4537 = vrot.lane.b32.xlu1 %v10361_v45, %s10936_s2 }
0x215d   : > { %9082 = vrot.lane.b32.xlu1 %v10378_v63, %s10934_s27 }
0x2161   : > { %9092 = vrot.lane.b32.xlu1 %v10382_v39, %s10934_s27 }
0x218a   : > { %v9043_v57 = vpop.permute.xlu0 %9042  ;;  %v9038_v9 = vpop.permute.xlu1 %9037 }
0x218b   : > { %v9040_v30 = vunpack.i.h.bf16 %v9038_v9  ;;  %v9039_v47 = vunpack.i.l.bf16 %v9038_v9  ;;  %v9045_v61 = vunpack.i.h.bf16 %v9043_v57  ;;  %v9044_v17 = vunpack.i.l.bf16 %v9043_v57 }
0x218d   : > { %v8642_v56 = vpack.c.bf16 %v9040_v30, %v9039_v47  ;;  %v8645_v51 = vpack.c.bf16 %v9045_v61, %v9044_v17 }
0x218e   : > { %v9048_v49 = vpop.permute.xlu1 %9047  ;;  %v9053_v48 = vpop.permute.xlu0 %9052 }
0x218f   : > { %8643 = vmatpush3.bf16.msra.mxu0 %v8642_v56  ;;  %v9050_v62 = vunpack.i.h.bf16 %v9048_v49  ;;  %v9049_v6 = vunpack.i.l.bf16 %v9048_v49  ;;  %v9055_v33 = vunpack.i.h.bf16 %v9053_v48  ;;  %v9054_v14 = vunpack.i.l.bf16 %v9053_v48 }
0x2190   : > { %8644 = vmatprep.subr.bf16.mxu0 %v9313_v10 }
0x2191   : > { %v8648_v16 = vpack.c.bf16 %v9050_v62, %v9049_v6  ;;  %v8651_v2 = vpack.c.bf16 %v9055_v33, %v9054_v14 }
0x2192   : > { %v9063_v25 = vpop.permute.xlu0 %9062 }
0x2193   : > { %8646 = vmatpush3.bf16.msra.mxu0 %v8645_v51  ;;  %v9065_v28 = vunpack.i.h.bf16 %v9063_v25  ;;  %v9064_v34 = vunpack.i.l.bf16 %v9063_v25 }
0x2194   : > { %8647 = vmatprep.subr.bf16.mxu0 %v9313_v10 }
0x2195   : > { %v8658_v53 = vpack.c.bf16 %v9065_v28, %v9064_v34 }
0x2196   : > { %v9073_v9 = vpop.permute.xlu0 %9072 }
0x2197   : > { %8649 = vmatpush3.bf16.msra.mxu0 %v8648_v16  ;;  %v9075_v30 = vunpack.i.h.bf16 %v9073_v9  ;;  %v9074_v47 = vunpack.i.l.bf16 %v9073_v9 }
0x2198   : > { %8650 = vmatprep.subr.bf16.mxu0 %v9313_v10 }
0x2199   : > { %v8666_v61 = vpack.c.bf16 %v9075_v30, %v9074_v47 }
0x219b   : > { %8652 = vmatpush3.bf16.msra.mxu0 %v8651_v2 }
0x219c   : > { %8653 = vmatprep.subr.bf16.mxu0 %v9313_v10 }
0x21cd   : > { %v4429_v21 = vpop.xlane.xlu1 %4428 }
0x21ce   : > { %9254 = vrcp.f32 %v4429_v21 }
0x21d1   : > { %v9058_v32 = vpop.permute.xlu1 %9057 }
0x21d2   : > { %v9060_v42 = vunpack.i.h.bf16 %v9058_v32  ;;  %v9059_v23 = vunpack.i.l.bf16 %v9058_v32 }
0x21d4   : > { %v8654_v0 = vpack.c.bf16 %v9060_v42, %v9059_v23 }
0x21d5   : > { %v9068_v40 = vpop.permute.xlu1 %9067 }
0x21d6   : > { %v9069_v46 = vunpack.i.l.bf16 %v9068_v40 }
0x21d8   : > { %v9255_v37 = vpop.eup %9254 }
0x21d9   : > { %v4431_v59 = vmul.f32 %v9255_v37, %v9253_v13  ;;  %v9070_v13 = vunpack.i.h.bf16 %v9068_v40  ;;  %v4538_v17 = vpop.permute.xlu1 %4537 }
0x21db   : > { %8070 = vmatmul.mubr.msk.f32.vlgmr.msra.gmra.mrb[44].mxu0 %vm1155_vm2, %v4431_v59  ;;  %v8662_v57 = vpack.c.bf16 %v9070_v13, %v9069_v46 }
0x21dc   : > { %8656 = vmatpush3.bf16.xpose.msk.msra.mxu0 %vm9716_vm4, %v8654_v0  ;;  %8088 = vmatprep.mubr.msk.f32.mxu0 %vm9314_vm1, %v9315_v18 }
0x21dd   : > { %8657 = vmatprep.subr.bf16.mxu0 %v9313_v10  ;;  %v9083_v2 = vpop.permute.xlu1 %9082 }
0x21de   : > { %v9085_v23 = vunpack.i.h.bf16 %v9083_v2  ;;  %v9084_v37 = vunpack.i.l.bf16 %v9083_v2 }
0x21e0   : > { %v8673_v25 = vpack.c.bf16 %v9085_v23, %v9084_v37 }
0x21e4   : > { %8660 = vmatpush3.bf16.xpose.msk.msra.mxu0 %vm9716_vm4, %v8658_v53  ;;  %v9093_v53 = vpop.permute.xlu1 %9092 }
0x21e5   : > { %8661 = vmatprep.subr.bf16.mxu0 %v9313_v10  ;;  %v9095_v46 = vunpack.i.h.bf16 %v9093_v53 }
0x21ec   : > { %8664 = vmatpush3.bf16.xpose.msk.msra.mxu0 %vm9716_vm4, %v8662_v57  ;;  %v9094_v57 = vunpack.i.l.bf16 %v9093_v53 }
0x21ed   : > { %8665 = vmatprep.subr.bf16.mxu0 %v9313_v10 }
0x21f4   : > { %8668 = vmatpush3.bf16.xpose.msk.msra.mxu0 %vm9716_vm4, %v8666_v61  ;;  %v8679_v61 = vpack.c.bf16 %v9095_v46, %v9094_v57 }
0x21f5   : > { %8697 = vmatprep.subr.bf16.mxu0 %v9313_v10 }
0x21fb   : > { %8089 = vmatmul.mubr.msk.f32.vlgmr.msra.gmra.mrb[46].mxu0 %vm1454_vm3, %v4538_v17 }
0x21fc   : > { %8145 = vmatprep.mubr.msk.f32.mxu0 %vm9314_vm1, %v9315_v18 }
0x22ae   : > { %v10431_v56 = vpop.f32.mrb[44].mxu0 }
0x22af   : > { %v8071_v49 = vpop.f32.mrb[45].mxu0 }
0x22ce   : > { %v4639_v51 = vpop.f32.mrb[46].mxu0 }
0x22cf   : > { %v4640_v62 = vadd.f32 %v4639_v51, %v10369_v8  ;;  %v8090_v6 = vpop.f32.mrb[47].mxu0 }
0x22d1   : > { %v4643_v48 = vsel %vm1155_vm2, %v4640_v62, -inf }
0x22d2   : > { %4644 = vmax.xlane.f32.xlu0 %v4643_v48 }
0x22e8   : > { %9077 = vrot.lane.b32.xlu0 %v10380_v36, %s10934_s27 }
0x22ec   : > { %9087 = vrot.lane.b32.xlu0 %v10386_v50, %s10934_s27 }
0x22f0   : > { %9097 = vrot.lane.b32.xlu0 %v10329_v7, %s10938_s26 }
0x22f4   : > { %9107 = vrot.lane.b32.xlu0 %v10345_v55, %s10938_s26 }
0x22f8   : > { %4751 = vrot.lane.b32.xlu0 %v10361_v45, %s10938_s26 }
0x22fc   : > { %9117 = vrot.lane.b32.xlu0 %v10380_v36, %s10935_s25 }
0x235f   : > { %v4645_v33 = vpop.xlane.xlu0 %4644 }
0x2360   : > { %v4646_v14 = vsub.f32 %v4640_v62, %v4645_v33 }
0x2362   : > { %v4647_v16 = vmul.f32 1.442695, %v4646_v14 }
0x2363   : > { %v9078_v21 = vpop.permute.xlu0 %9077 }
0x2364   : > { %9256 = vpow2.f32 %v4647_v16  ;;  %v9080_v32 = vunpack.i.h.bf16 %v9078_v21  ;;  %v9079_v42 = vunpack.i.l.bf16 %v9078_v21 }
0x2366   : > { %v8670_v59 = vpack.c.bf16 %v9080_v32, %v9079_v42 }
0x2367   : > { %v9088_v0 = vpop.permute.xlu0 %9087 }
0x2368   : > { %8671 = vmatpush3.bf16.msra.mxu1 %v8670_v59  ;;  %v9090_v28 = vunpack.i.h.bf16 %v9088_v0  ;;  %v9089_v34 = vunpack.i.l.bf16 %v9088_v0 }
0x2369   : > { %8672 = vmatprep.subr.bf16.mxu1 %v9313_v10 }
0x236a   : > { %v8676_v9 = vpack.c.bf16 %v9090_v28, %v9089_v34 }
0x236b   : > { %v9098_v40 = vpop.permute.xlu0 %9097 }
0x236c   : > { %8674 = vmatpush3.bf16.msra.mxu1 %v8673_v25  ;;  %v9100_v33 = vunpack.i.h.bf16 %v9098_v40  ;;  %v9099_v14 = vunpack.i.l.bf16 %v9098_v40 }
0x236d   : > { %8675 = vmatprep.subr.bf16.mxu1 %v9313_v10 }
0x236e   : > { %v9257_v13 = vpop.eup %9256  ;;  %v8682_v21 = vpack.c.bf16 %v9100_v33, %v9099_v14 }
0x236f   : > { %v9108_v30 = vpop.permute.xlu0 %9107  ;;  %v4649_v47 = vsel %vm1155_vm2, %v9257_v13, 0.0 }
0x2370   : > { %4650 = vadd.xlane.f32.xlu1 %v4649_v47  ;;  %8677 = vmatpush3.bf16.msra.mxu1 %v8676_v9  ;;  %v9110_v59 = vunpack.i.h.bf16 %v9108_v30  ;;  %v9109_v0 = vunpack.i.l.bf16 %v9108_v30 }
0x2371   : > { %8678 = vmatprep.subr.bf16.mxu1 %v9313_v10 }
0x2372   : > { %v8690_v25 = vpack.c.bf16 %v9110_v59, %v9109_v0 }
0x2373   : > { %v4752_v17 = vpop.permute.xlu0 %4751 }
0x2374   : > { %8680 = vmatpush3.bf16.msra.mxu1 %v8679_v61 }
0x2375   : > { %8681 = vmatprep.subr.bf16.mxu1 %v9313_v10 }
0x2377   : > { %v9118_v49 = vpop.permute.xlu0 %9117 }
0x2378   : > { %v9120_v51 = vunpack.i.h.bf16 %v9118_v49  ;;  %v9119_v62 = vunpack.i.l.bf16 %v9118_v49 }
0x237a   : > { %v8698_v6 = vpack.c.bf16 %v9120_v51, %v9119_v62 }
0x237c   : > { %8699 = vmatpush3.bf16.msra.mxu0 %v8698_v6 }
0x237d   : > { %8700 = vmatprep.subr.bf16.mxu0 %v9313_v10 }
0x2381   : > { %9102 = vrot.lane.b32.xlu1 %v10340_v44, %s10938_s26 }
0x2385   : > { %9112 = vrot.lane.b32.xlu1 %v10350_v27, %s10938_s26 }
0x23fd   : > { %v4651_v48 = vpop.xlane.xlu1 %4650 }
0x23fe   : > { %9258 = vrcp.f32 %v4651_v48 }
0x2401   : > { %v9103_v32 = vpop.permute.xlu1 %9102 }
0x2402   : > { %v9105_v42 = vunpack.i.h.bf16 %v9103_v32  ;;  %v9104_v23 = vunpack.i.l.bf16 %v9103_v32 }
0x2404   : > { %v8686_v37 = vpack.c.bf16 %v9105_v42, %v9104_v23 }
0x2405   : > { %v9113_v28 = vpop.permute.xlu1 %9112 }
0x2406   : > { %v9115_v34 = vunpack.i.h.bf16 %v9113_v28  ;;  %v9114_v53 = vunpack.i.l.bf16 %v9113_v28 }
0x2408   : > { %v9259_v16 = vpop.eup %9258  ;;  %v8694_v40 = vpack.c.bf16 %v9115_v34, %v9114_v53 }
0x2409   : > { %v4653_v2 = vmul.f32 %v9259_v16, %v9257_v13 }
0x240b   : > { %8108 = vmatmul.mubr.msk.f32.vlgmr.msra.gmra.mrb[42].mxu1 %vm1155_vm2, %v4653_v2 }
0x240c   : > { %8684 = vmatpush3.bf16.xpose.msk.msra.mxu1 %vm9716_vm4, %v8682_v21  ;;  %8126 = vmatprep.mubr.msk.f32.mxu1 %vm9314_vm1, %v9315_v18 }
0x240d   : > { %8685 = vmatprep.subr.bf16.mxu1 %v9313_v10 }
0x2414   : > { %8688 = vmatpush3.bf16.xpose.msk.msra.mxu1 %vm9716_vm4, %v8686_v37 }
0x2415   : > { %8689 = vmatprep.subr.bf16.mxu1 %v9313_v10 }
0x241c   : > { %8692 = vmatpush3.bf16.xpose.msk.msra.mxu1 %vm9716_vm4, %v8690_v25 }
0x241d   : > { %8693 = vmatprep.subr.bf16.mxu1 %v9313_v10 }
0x2424   : > { %8696 = vmatpush3.bf16.xpose.msk.msra.mxu1 %vm9716_vm4, %v8694_v40 }
0x2425   : > { %8725 = vmatprep.subr.bf16.mxu1 %v9313_v10 }
0x242b   : > { %8127 = vmatmul.mubr.msk.f32.vlgmr.msra.gmra.mrb[44].mxu1 %vm1454_vm3, %v4752_v17 }
0x242c   : > { %8183 = vmatprep.mubr.msk.f32.mxu1 %vm9314_vm1, %v9315_v18 }
0x24de   : > { %v10475_v13 = vpop.f32.mrb[42].mxu1 }
0x24df   : > { %v8109_v46 = vpop.f32.mrb[43].mxu1 }
0x24fe   : > { %v4853_v57 = vpop.f32.mrb[44].mxu1 }
0x24ff   : > { %v4854_v9 = vadd.f32 %v4853_v57, %v10369_v8  ;;  %v8128_v30 = vpop.f32.mrb[45].mxu1 }
0x2501   : > { %v4857_v47 = vsel %vm1155_vm2, %v4854_v9, -inf }
0x2502   : > { %4858 = vmax.xlane.f32.xlu1 %v4857_v47 }
0x2513   : > { %9122 = vrot.lane.b32.xlu1 %v10378_v63, %s10935_s25 }
0x2517   : > { %9127 = vrot.lane.b32.xlu1 %v10386_v50, %s10935_s25 }
0x251b   : > { %9137 = vrot.lane.b32.xlu1 %v10329_v7, %s10939_s19 }
0x251f   : > { %9147 = vrot.lane.b32.xlu1 %v10345_v55, %s10939_s19 }
0x2523   : > { %4965 = vrot.lane.b32.xlu1 %v10361_v45, %s10939_s19 }
0x2527   : > { %9162 = vrot.lane.b32.xlu1 %v10378_v63, %s10937_s0 }
0x258f   : > { %v4859_v61 = vpop.xlane.xlu1 %4858 }
0x2590   : > { %v4860_v17 = vsub.f32 %v4854_v9, %v4859_v61 }
0x2592   : > { %v4861_v49 = vmul.f32 1.442695, %v4860_v17 }
0x2593   : > { %v9123_v51 = vpop.permute.xlu1 %9122 }
0x2594   : > { %9260 = vpow2.f32 %v4861_v49  ;;  %v9125_v62 = vunpack.i.h.bf16 %v9123_v51  ;;  %v9124_v6 = vunpack.i.l.bf16 %v9123_v51 }
0x2596   : > { %v8701_v48 = vpack.c.bf16 %v9125_v62, %v9124_v6 }
0x2597   : > { %v9128_v33 = vpop.permute.xlu1 %9127 }
0x2598   : > { %v9130_v14 = vunpack.i.h.bf16 %v9128_v33  ;;  %v9129_v7 = vunpack.i.l.bf16 %v9128_v33  ;;  %8702 = vmatpush3.bf16.msra.mxu0 %v8701_v48 }
0x2599   : > { %8703 = vmatprep.subr.bf16.mxu0 %v9313_v10 }
0x259a   : > { %v8704_v55 = vpack.c.bf16 %v9130_v14, %v9129_v7 }
0x259b   : > { %v9138_v23 = vpop.permute.xlu1 %9137 }
0x259c   : > { %8705 = vmatpush3.bf16.msra.mxu0 %v8704_v55  ;;  %v9140_v59 = vunpack.i.h.bf16 %v9138_v23  ;;  %v9139_v0 = vunpack.i.l.bf16 %v9138_v23 }
0x259d   : > { %8706 = vmatprep.subr.bf16.mxu0 %v9313_v10 }
0x259e   : > { %v9261_v45 = vpop.eup %9260 }
0x259f   : > { %v4863_v63 = vsel %vm1155_vm2, %v9261_v45, 0.0  ;;  %v9148_v40 = vpop.permute.xlu1 %9147 }
0x25a0   : > { %4864 = vadd.xlane.f32.xlu0 %v4863_v63  ;;  %v9150_v46 = vunpack.i.h.bf16 %v9148_v40  ;;  %v9149_v57 = vunpack.i.l.bf16 %v9148_v40 }
0x25a2   : > { %v8718_v9 = vpack.c.bf16 %v9150_v46, %v9149_v57 }
0x25a3   : > { %v4966_v49 = vpop.permute.xlu1 %4965 }
0x25b6   : > { %9132 = vrot.lane.b32.xlu0 %v10382_v39, %s10935_s25 }
0x25ba   : > { %9142 = vrot.lane.b32.xlu0 %v10340_v44, %s10939_s19  ;;  %v8710_v44 = vpack.c.bf16 %v9140_v59, %v9139_v0 }
0x25be   : > { %9152 = vrot.lane.b32.xlu0 %v10350_v27, %s10939_s19 }
0x262d   : > { %v4865_v16 = vpop.xlane.xlu0 %4864 }
0x262e   : > { %9262 = vrcp.f32 %v4865_v16 }
0x2631   : > { %v9133_v2 = vpop.permute.xlu0 %9132 }
0x2632   : > { %v9135_v21 = vunpack.i.h.bf16 %v9133_v2  ;;  %v9134_v32 = vunpack.i.l.bf16 %v9133_v2 }
0x2634   : > { %v8707_v42 = vpack.c.bf16 %v9135_v21, %v9134_v32 }
0x2635   : > { %v9143_v27 = vpop.permute.xlu0 %9142 }
0x2636   : > { %8708 = vmatpush3.bf16.msra.mxu0 %v8707_v42  ;;  %v9145_v28 = vunpack.i.h.bf16 %v9143_v27  ;;  %v9144_v34 = vunpack.i.l.bf16 %v9143_v27 }
0x2637   : > { %8709 = vmatprep.subr.bf16.mxu0 %v9313_v10 }
0x2638   : > { %v9263_v37 = vpop.eup %9262  ;;  %v8714_v53 = vpack.c.bf16 %v9145_v28, %v9144_v34 }
0x2639   : > { %v4867_v25 = vmul.f32 %v9263_v37, %v9261_v45  ;;  %v9153_v30 = vpop.permute.xlu0 %9152 }
0x263a   : > { %v9155_v47 = vunpack.i.h.bf16 %v9153_v30  ;;  %v9154_v61 = vunpack.i.l.bf16 %v9153_v30 }
0x263b   : > { %8146 = vmatmul.mubr.msk.f32.vlgmr.msra.gmra.mrb[48].mxu0 %vm1155_vm2, %v4867_v25 }
0x263c   : > { %8164 = vmatprep.mubr.msk.f32.mxu0 %vm9314_vm1, %v9315_v18  ;;  %v8722_v17 = vpack.c.bf16 %v9155_v47, %v9154_v61 }
0x263f   : > { %8712 = vmatpush3.bf16.xpose.msk.msra.mxu0 %vm9716_vm4, %v8710_v44 }
0x2640   : > { %8713 = vmatprep.subr.bf16.mxu0 %v9313_v10 }
0x2647   : > { %8716 = vmatpush3.bf16.xpose.msk.msra.mxu0 %vm9716_vm4, %v8714_v53 }
0x2648   : > { %8717 = vmatprep.subr.bf16.mxu0 %v9313_v10 }
0x264f   : > { %8720 = vmatpush3.bf16.xpose.msk.msra.mxu0 %vm9716_vm4, %v8718_v9 }
0x2650   : > { %8721 = vmatprep.subr.bf16.mxu0 %v9313_v10 }
0x2657   : > { %8724 = vmatpush3.bf16.xpose.msk.msra.mxu0 %vm9716_vm4, %v8722_v17 }
0x2658   : > { %8743 = vmatprep.subr.bf16.mxu0 %v9313_v10 }
0x265e   : > { %8165 = vmatmul.mubr.msk.f32.vlgmr.msra.gmra.mrb[50].mxu0 %vm1454_vm3, %v4966_v49 }
0x265f   : > { %8205 = vmatprep.mubr.msk.f32.mxu0 %vm9314_vm1, %v9315_v18 }
0x270e   : > { %v4961_v51 = vpop.f32.mrb[48].mxu0 }
0x270f   : > { %v8147_v62 = vpop.f32.mrb[49].mxu0 }
0x2731   : > { %v5067_v6 = vpop.f32.mrb[50].mxu0 }
0x2732   : > { %v5068_v48 = vadd.f32 %v5067_v6, %v10369_v8  ;;  %v8166_v33 = vpop.f32.mrb[51].mxu0  ;;  %v9163_v8 = vpop.permute.xlu1 %9162 }
0x2733   : > { %v9165_v2 = vunpack.i.h.bf16 %v9163_v8  ;;  %v9164_v21 = vunpack.i.l.bf16 %v9163_v8  ;;  %v5197_v33 = vrot.slane %v10304_v60, %v9945_v52  ;;  %v7105_v60 = vld [vmem:[%s10944_s21 + $0x28] sm:$0xff] }
0x2734   : > { %v5071_v14 = vsel %vm1155_vm2, %v5068_v48, -inf }
0x2735   : > { %5072 = vmax.xlane.f32.xlu0 %v5071_v14 }
0x274b   : > { %9157 = vrot.lane.b32.xlu0 %v10380_v36, %s10937_s0 }
0x274f   : > { %9167 = vrot.lane.b32.xlu0 %v10386_v50, %s10937_s0  ;;  %v8729_v50 = vpack.c.bf16 %v9165_v2, %v9164_v21  ;;  %v7104_v21 = vld [vmem:[%s10944_s21 + $0x20] sm:$0xff] }
0x2753   : > { %9177 = vrot.lane.b32.xlu0 %v10252_v58, %s10931_s1 }
0x2757   : > { %5180 = vrot.lane.b32.xlu0 %v10475_v13, %s10940_s20 }
0x27c2   : > { %v5073_v12 = vpop.xlane.xlu0 %5072 }
0x27c3   : > { %v5074_v7 = vsub.f32 %v5068_v48, %v5073_v12 }
0x27c5   : > { %v5075_v55 = vmul.f32 1.442695, %v5074_v7 }
0x27c6   : > { %v9158_v45 = vpop.permute.xlu0 %9157 }
0x27c7   : > { %9264 = vpow2.f32 %v5075_v55  ;;  %v9160_v63 = vunpack.i.h.bf16 %v9158_v45  ;;  %v9159_v16 = vunpack.i.l.bf16 %v9158_v45 }
0x27c9   : > { %v8726_v36 = vpack.c.bf16 %v9160_v63, %v9159_v16 }
0x27ca   : > { %v9168_v32 = vpop.permute.xlu0 %9167 }
0x27cb   : > { %8727 = vmatpush3.bf16.msra.mxu1 %v8726_v36  ;;  %v9170_v58 = vunpack.i.h.bf16 %v9168_v32  ;;  %v9169_v42 = vunpack.i.l.bf16 %v9168_v32  ;;  %v8744_v36 = vpack.c.bf16 %v7105_v60, %v7104_v21  ;;  %v7107_v32 = vld [vmem:[%s10944_s21 + $0x38] sm:$0xff] }
0x27cc   : > { %8728 = vmatprep.subr.bf16.mxu1 %v9313_v10 }
0x27cd   : > { %v8732_v23 = vpack.c.bf16 %v9170_v58, %v9169_v42  ;;  %8745 = vmatpush3.bf16.msra.mxu0 %v8744_v36  ;;  %v10574_v58 = vld [vmem:[%s10945_s22 + $0x4] sm:$0xf]  ;;  %s10948_s22 = sld [smem:[#allocation4_spill]] }
0x27ce   : > { %v9178_v27 = vpop.permute.xlu0 %9177  ;;  %8746 = vmatprep.subr.bf16.mxu0 %v9313_v10  ;;  %v5389_v42 = vrot.slane %v10574_v58, %v9626_v4 }
0x27cf   : > { %8730 = vmatpush3.bf16.msra.mxu1 %v8729_v50  ;;  %v9180_v28 = vunpack.i.h.bf16 %v9178_v27  ;;  %v9179_v34 = vunpack.i.l.bf16 %v9178_v27 }
0x27d0   : > { %8731 = vmatprep.subr.bf16.mxu1 %v9313_v10 }
0x27d1   : > { %v9265_v13 = vpop.eup %9264 }
0x27d2   : > { %v5077_v37 = vsel %vm1155_vm2, %v9265_v13, 0.0  ;;  %v5181_v17 = vpop.permute.xlu0 %5180 }
0x27d3   : > { %5078 = vadd.xlane.f32.xlu1 %v5077_v37  ;;  %8733 = vmatpush3.bf16.msra.mxu1 %v8732_v23 }
0x27d4   : > { %8734 = vmatprep.subr.bf16.mxu1 %v9313_v10 }
0x27e4   : > { %9172 = vrot.lane.b32.xlu1 %v10382_v39, %s10937_s0  ;;  %v8738_v39 = vpack.c.bf16 %v9180_v28, %v9179_v34 }
0x27e8   : > { %9182 = vrot.lane.b32.xlu1 %v10254_v29, %s10931_s1 }
0x27ec   : > { %5184 = vrot.lane.b32.xlu1 %v4961_v51, %s10941_s4  ;;  %v5191_v51 = vsel %vm1454_vm3, %v10431_v56, %v5181_v17 }
0x2860   : > { %v5079_v59 = vpop.xlane.xlu1 %5078 }
0x2861   : > { %9266 = vrcp.f32 %v5079_v59  ;;  %v10582_v59 = vld [vmem:[%s10946_s3 + $0x4] sm:$0x7] }
0x2864   : > { %v9173_v0 = vpop.permute.xlu1 %9172 }
0x2865   : > { %v9175_v25 = vunpack.i.h.bf16 %v9173_v0  ;;  %v9174_v44 = vunpack.i.l.bf16 %v9173_v0  ;;  %v10587_v0 = vld [vmem:[%s10947_s8 + $0x4] sm:$0x7] }
0x2866   : > { %v5305_v28 = vrot.slane %v10587_v0, %v9557_v41 }
0x2867   : > { %v8735_v53 = vpack.c.bf16 %v9175_v25, %v9174_v44  ;;  %v5300_v25 = vrot.slane %v10582_v59, %v9557_v41 }
0x2868   : > { %v9183_v40 = vpop.permute.xlu1 %9182 }
0x2869   : > { %8736 = vmatpush3.bf16.msra.mxu1 %v8735_v53  ;;  %v9185_v57 = vunpack.i.h.bf16 %v9183_v40  ;;  %v9184_v9 = vunpack.i.l.bf16 %v9183_v40  ;;  %v9301_v40 = vld [vmem:[%s10948_s22] sm:$0xff] }
0x286a   : > { %8737 = vmatprep.subr.bf16.mxu1 %v9313_v10 }
0x286b   : > { %v9267_v46 = vpop.eup %9266  ;;  %v8741_v30 = vpack.c.bf16 %v9185_v57, %v9184_v9 }
0x286c   : > { %v5081_v29 = vmul.f32 %v9267_v46, %v9265_v13  ;;  %v5185_v49 = vpop.permute.xlu1 %5184 }
0x286d   : > { %v5192_v62 = vsel %vm2323_vm8, %v5191_v51, %v5185_v49 }
0x286e   : > { %8184 = vmatmul.mubr.msk.f32.vlgmr.msra.gmra.mrb[46].mxu1 %vm1155_vm2, %v5081_v29 }
0x286f   : > { %8739 = vmatpush3.bf16.msra.mxu1 %v8738_v39  ;;  %8194 = vmatprep.mubr.msk.f32.mxu1 %vm9314_vm1, %v9315_v18  ;;  %v5384_v39 = vrot.slane %v10574_v58, %v9557_v41  ;;  %v10613_v41 = vpack.i.bf16 %v7105_v60, %v7104_v21 }
0x2870   : > { %8740 = vmatprep.subr.bf16.mxu1 %v9313_v10 }
0x2873   : > { %8742 = vmatpush3.bf16.msra.mxu1 %v8741_v30 }
0x2874   : > { %8749 = vmatprep.subr.bf16.mxu1 %v9313_v10 }
0x2941   : > { %v5175_v47 = vpop.f32.mrb[46].mxu1 }
0x2942   : > { %5188 = vrot.lane.b32.xlu0 %v5175_v47, %s10943_s9  ;;  %v8185_v61 = vpop.f32.mrb[47].mxu1 }
0x29b4   : > { %v5189_v6 = vpop.permute.xlu0 %5188 }
0x29b5   : > { %v5193_v48 = vsel %vm2325_vm9, %v5192_v62, %v5189_v6 }
0x29b6   : > { %8195 = vmatmul.mubr.msk.f32.vlgmr.msra.gmra.mrb[48].mxu1 %vm743_vm0, %v5193_v48 }
0x29b7   : > { %8216 = vmatprep.mubr.msk.f32.mxu1 %vm9314_vm1, %v9315_v18 }
0x2a89   : > { %v5279_v14 = vpop.f32.mrb[48].mxu1 }
0x2a8a   : > { %v5280_v12 = vadd.f32 %v5279_v14, %v5197_v33  ;;  %v8196_v7 = vpop.f32.mrb[49].mxu1 }
0x2a8c   : > { %v5283_v55 = vadd.f32 %v5280_v12, %v10202_v22  ;;  %v7106_v22 = vld [vmem:[%s10944_s21 + $0x30] sm:$0xff] }
0x2a8d   : > { %v8747_v50 = vpack.c.bf16 %v7107_v32, %v7106_v22  ;;  %v10610_v17 = vpack.i.bf16 %v7107_v32, %v7106_v22 }
0x2a8e   : > { %v5284_v56 = vsel %vm743_vm0, %v5283_v55, 0.0 }
0x2a8f   : > { %5285 = vadd.xlane.f32.xlu1 %v5284_v56  ;;  %8748 = vmatpush3.bf16.msra.mxu0 %v8747_v50 }
0x2a90   : > { %8219 = vmatprep.subr.mxu0 %v9315_v18 }
0x2b1c   : > { %v5286_v8 = vpop.xlane.xlu1 %5285 }
0x2b1d   : > { %v5287_v45 = vmul.f32 0.03125, %v5286_v8 }
0x2b1f   : > { %v5288_v63 = vsub.f32 %v5283_v55, %v5287_v45 }
0x2b21   : > { %v5289_v16 = vmul.f32 %v5288_v63, %v5288_v63 }
0x2b23   : > { %v5290_v2 = vsel %vm743_vm0, %v5289_v16, 0.0 }
0x2b24   : > { %5291 = vadd.xlane.f32.xlu0 %v5290_v2 }
0x2b3a   : > { %5391 = vrot.lane.b32.xlu0 %v5389_v42, %s10931_s1 }
0x2bb1   : > { %v5292_v13 = vpop.xlane.xlu0 %5291 }
0x2bb2   : > { %v5293_v23 = vmul.f32 0.03125, %v5292_v13 }
0x2bb4   : > { %v5294_v37 = vadd.f32 1e-05, %v5293_v23 }
0x2bb5   : > { %v5392_v57 = vpop.permute.xlu0 %5391 }
0x2bb6   : > { %9268 = vrsqrt.f32 %v5294_v37 }
0x2bc0   : > { %v9269_v44 = vpop.eup %9268 }
0x2bc1   : > { %v5296_v27 = vmul.f32 %v9269_v44, %v5288_v63  ;;  %v5398_v44 = vrot.slane %v10574_v58, %v9646_v24 }
0x2bc3   : > { %v5301_v34 = vmul.f32 %v5300_v25, %v5296_v27 }
0x2bc5   : > { %v10593_v53 = vadd.f32 %v5305_v28, %v5301_v34 }
0x2bc7   : > { %v5307_v46 = vadd.f32 %v9301_v40, %v10593_v53 }
0x2bc9   : > { %8206 = vmatmul.mubr.msk.f32.vlgmr.msra.gmra.mrb[52].mxu0 %vm743_vm0, %v5307_v46 }
0x2bca   : > { %8221 = vmatprep.mubr.msk.f32.mxu0 %vm9314_vm1, %v9315_v18 }
0x2c9c   : > { %v5377_v9 = vpop.f32.mrb[52].mxu0 }
0x2c9d   : > { %v5385_v29 = vadd.f32 %v5384_v39, %v5377_v9  ;;  %v5394_v30 = vadd.f32 %v5392_v57, %v5377_v9  ;;  %v8207_v47 = vpop.f32.mrb[53].mxu0 }
0x2c9f   : > { %v5488_v61 = vmul.f32 0.35355338, %v5385_v29  ;;  %5490 = vrot.lane.b32.xlu1 %v5394_v30, %s10928_s23 }
0x2ca1   : > { %5651 = vrot.lane.b32.xlu0 %v5488_v61, %s10936_s2 }
0x2ca3   : > { %5653 = vrot.lane.b32.xlu1 %v5394_v30, %s10934_s27 }
0x2ca5   : > { %5817 = vrot.lane.b32.xlu0 %v5488_v61, %s10938_s26 }
0x2ca7   : > { %5819 = vrot.lane.b32.xlu1 %v5394_v30, %s10935_s25 }
0x2ca9   : > { %5982 = vrot.lane.b32.xlu0 %v5488_v61, %s10939_s19 }
0x2cab   : > { %5984 = vrot.lane.b32.xlu1 %v5394_v30, %s10937_s0 }
0x2cad   : > { %9192 = vrot.lane.b32.xlu0 %v10610_v17, %s10949_s24 }
0x2caf   : > { %9187 = vrot.lane.b32.xlu1 %v10613_v41, %s10949_s24 }
0x2d11   : > { %v5491_v49 = vpop.permute.xlu1 %5490 }
0x2d12   : > { %8220 = vmatpush3.xpose.msk.msra.mxu0 %vm1454_vm3, %v5491_v49 }
0x2d13   : > { %v5652_v51 = vpop.permute.xlu0 %5651  ;;  %8229 = vmatprep.subr.mxu0 %v9315_v18 }
0x2d15   : > { %8222 = vmatmul.mubr.msk.f32.vlgmr.msra.gmra.mrb[54].mxu0 %vm1454_vm3, %v5488_v61  ;;  %v5654_v62 = vpop.permute.xlu1 %5653 }
0x2d16   : > { %8230 = vmatpush3.xpose.msk.msra.mxu0 %vm1454_vm3, %v5654_v62  ;;  %8231 = vmatprep.mubr.msk.f32.mxu0 %vm9314_vm1, %v9315_v18 }
0x2d17   : > { %v5818_v6 = vpop.permute.xlu0 %5817  ;;  %8239 = vmatprep.subr.mxu0 %v9315_v18 }
0x2d19   : > { %v5820_v48 = vpop.permute.xlu1 %5819  ;;  %8232 = vmatmul.mubr.msk.f32.vlgmr.msra.gmra.mrb[56].mxu0 %vm1454_vm3, %v5652_v51 }
0x2d1a   : > { %8240 = vmatpush3.xpose.msk.msra.mxu0 %vm1454_vm3, %v5820_v48  ;;  %8241 = vmatprep.mubr.msk.f32.mxu0 %vm9314_vm1, %v9315_v18 }
0x2d1b   : > { %v5983_v33 = vpop.permute.xlu0 %5982  ;;  %8249 = vmatprep.subr.mxu0 %v9315_v18 }
0x2d1d   : > { %v5985_v14 = vpop.permute.xlu1 %5984  ;;  %8242 = vmatmul.mubr.msk.f32.vlgmr.msra.gmra.mrb[58].mxu0 %vm1454_vm3, %v5818_v6 }
0x2d1e   : > { %8250 = vmatpush3.xpose.msk.msra.mxu0 %vm1454_vm3, %v5985_v14  ;;  %8251 = vmatprep.mubr.msk.f32.mxu0 %vm9314_vm1, %v9315_v18 }
0x2d1f   : > { %v9193_v12 = vpop.permute.xlu0 %9192  ;;  %8755 = vmatprep.subr.bf16.mxu0 %v9313_v10 }
0x2d20   : > { %v9195_v8 = vunpack.i.h.bf16 %v9193_v12  ;;  %v9194_v45 = vunpack.i.l.bf16 %v9193_v12 }
0x2d21   : > { %v9188_v7 = vpop.permute.xlu1 %9187  ;;  %8252 = vmatmul.mubr.msk.f32.vlgmr.msra.gmra.mrb[60].mxu0 %vm1454_vm3, %v5983_v33 }
0x2d22   : > { %v9190_v55 = vunpack.i.h.bf16 %v9188_v7  ;;  %v9189_v56 = vunpack.i.l.bf16 %v9188_v7  ;;  %8267 = vmatprep.mubr.msk.f32.mxu0 %vm9314_vm1, %v9315_v18  ;;  %v8753_v16 = vpack.c.bf16 %v9195_v8, %v9194_v45 }
0x2d24   : > { %v8750_v63 = vpack.c.bf16 %v9190_v55, %v9189_v56 }
0x2d26   : > { %8751 = vmatpush3.bf16.msra.mxu1 %v8750_v63 }
0x2d27   : > { %8752 = vmatprep.subr.bf16.mxu1 %v9313_v10 }
0x2d2a   : > { %8754 = vmatpush3.bf16.msra.mxu1 %v8753_v16 }
0x2d2b   : > { %8224 = vmatprep.subr.mxu1 %v9315_v18 }
0x2d2d   : > { %8217 = vmatmul.mubr.msk.f32.vlgmr.msra.gmra.mrb[50].mxu1 %vm743_vm0, %v10593_v53 }
0x2d2e   : > { %8226 = vmatprep.mubr.msk.f32.mxu1 %vm9314_vm1, %v9315_v18 }
0x2de8   : > { %v5563_v2 = vpop.f32.mrb[54].mxu0 }
0x2de9   : > { %v8223_v21 = vpop.f32.mrb[55].mxu0  ;;  %v5567_v60 = vsel %vm1454_vm3, %v5563_v2, -inf }
0x2dea   : > { %5568 = vmax.xlane.f32.xlu1 %v5567_v60 }
0x2dec   : > { %v5725_v36 = vpop.f32.mrb[56].mxu0 }
0x2ded   : > { %v8233_v22 = vpop.f32.mrb[57].mxu0  ;;  %v5729_v32 = vsel %vm1454_vm3, %v5725_v36, -inf }
0x2dee   : > { %5730 = vmax.xlane.f32.xlu0 %v5729_v32 }
0x2df0   : > { %v5891_v50 = vpop.f32.mrb[58].mxu0 }
0x2df1   : > { %v8243_v42 = vpop.f32.mrb[59].mxu0  ;;  %v5895_v13 = vsel %vm1454_vm3, %v5891_v50, -inf }
0x2df2   : > { %5896 = vmax.xlane.f32.xlu0 %v5895_v13 }
0x2df4   : > { %v6056_v23 = vpop.f32.mrb[60].mxu0 }
0x2df5   : > { %v8253_v37 = vpop.f32.mrb[61].mxu0  ;;  %v6060_v25 = vsel %vm1454_vm3, %v6056_v23, -inf }
0x2df6   : > { %6061 = vmax.xlane.f32.xlu1 %v6060_v25 }
0x2e00   : > { %v5484_v27 = vpop.f32.mrb[50].mxu1 }
0x2e01   : > { %v5485_v28 = vadd.f32 %v5484_v27, %v5398_v44  ;;  %v8218_v34 = vpop.f32.mrb[51].mxu1 }
0x2e03   : > { %8225 = vmatpush3.msra.mxu1 %v5485_v28 }
0x2e04   : > { %8234 = vmatprep.subr.mxu1 %v9315_v18 }
0x2e77   : > { %v5569_v40 = vpop.xlane.xlu1 %5568 }
0x2e78   : > { %v5570_v46 = vsub.f32 %v5563_v2, %v5569_v40 }
0x2e7a   : > { %v5571_v39 = vmul.f32 1.442695, %v5570_v46 }
0x2e7b   : > { %v5731_v57 = vpop.xlane.xlu0 %5730 }
0x2e7c   : > { %9270 = vpow2.f32 %v5571_v39  ;;  %v5732_v9 = vsub.f32 %v5725_v36, %v5731_v57 }
0x2e7e   : > { %v5733_v29 = vmul.f32 1.442695, %v5732_v9 }
0x2e7f   : > { %v5897_v30 = vpop.xlane.xlu0 %5896 }
0x2e80   : > { %9272 = vpow2.f32 %v5733_v29  ;;  %v5898_v47 = vsub.f32 %v5891_v50, %v5897_v30 }
0x2e82   : > { %v5899_v61 = vmul.f32 1.442695, %v5898_v47 }
0x2e83   : > { %v6062_v14 = vpop.xlane.xlu1 %6061 }
0x2e84   : > { %9274 = vpow2.f32 %v5899_v61  ;;  %v6063_v12 = vsub.f32 %v6056_v23, %v6062_v14  ;;  %v6165_v14 = vrot.slane %v10574_v58, %v9945_v52  ;;  %v7177_v52 = vld [vmem:[%s10849_s11 + $0x28] sm:$0xff] }
0x2e86   : > { %v9271_v49 = vpop.eup %9270  ;;  %v6064_v7 = vmul.f32 1.442695, %v6063_v12 }
0x2e87   : > { %v5573_v51 = vsel %vm1454_vm3, %v9271_v49, 0.0 }
0x2e88   : > { %5574 = vadd.xlane.f32.xlu0 %v5573_v51  ;;  %9276 = vpow2.f32 %v6064_v7 }
0x2e8a   : > { %v9273_v62 = vpop.eup %9272 }
0x2e8b   : > { %v5735_v6 = vsel %vm1454_vm3, %v9273_v62, 0.0 }
0x2e8c   : > { %5736 = vadd.xlane.f32.xlu1 %v5735_v6 }
0x2e8e   : > { %v9275_v48 = vpop.eup %9274 }
0x2e8f   : > { %v5901_v33 = vsel %vm1454_vm3, %v9275_v48, 0.0 }
0x2e90   : > { %5902 = vadd.xlane.f32.xlu0 %v5901_v33 }
0x2e92   : > { %v9277_v55 = vpop.eup %9276 }
0x2e93   : > { %v6066_v56 = vsel %vm1454_vm3, %v9277_v55, 0.0 }
0x2e9d   : > { %5906 = vrot.lane.b32.xlu1 %v5485_v28, %s10938_s26 }
0x2ea6   : > { %5741 = vrot.lane.b32.xlu0 %v5485_v28, %s10936_s2 }
0x2eaa   : > { %9197 = vrot.lane.b32.xlu0 %v10613_v41, %s10931_s1 }
0x2ec1   : > { %6067 = vadd.xlane.f32.xlu1 %v6066_v56 }
0x2ed2   : > { %6071 = vrot.lane.b32.xlu1 %v5485_v28, %s10939_s19 }
0x2ed6   : > { %9202 = vrot.lane.b32.xlu1 %v10610_v17, %s10931_s1 }
0x2f15   : > { %v5575_v8 = vpop.xlane.xlu0 %5574 }
0x2f16   : > { %9278 = vrcp.f32 %v5575_v8 }
0x2f19   : > { %v5737_v45 = vpop.xlane.xlu1 %5736 }
0x2f1a   : > { %9280 = vrcp.f32 %v5737_v45 }
0x2f1d   : > { %v5903_v63 = vpop.xlane.xlu0 %5902  ;;  %v5907_v22 = vpop.permute.xlu1 %5906 }
0x2f1e   : > { %9282 = vrcp.f32 %v5903_v63 }
0x2f20   : > { %v9279_v16 = vpop.eup %9278 }
0x2f21   : > { %v5577_v2 = vmul.f32 %v9279_v16, %v9271_v49  ;;  %v5742_v21 = vpop.permute.xlu0 %5741 }
0x2f23   : > { %8227 = vmatmul.mubr.msk.f32.vlgmr.msra.gmra.mrb[52].mxu1 %vm1454_vm3, %v5577_v2 }
0x2f24   : > { %v9281_v60 = vpop.eup %9280  ;;  %8235 = vmatpush3.msra.mxu1 %v5742_v21  ;;  %8236 = vmatprep.mubr.msk.f32.mxu1 %vm9314_vm1, %v9315_v18 }
0x2f25   : > { %v5739_v36 = vmul.f32 %v9281_v60, %v9273_v62  ;;  %8244 = vmatprep.subr.mxu1 %v9315_v18  ;;  %v9198_v25 = vpop.permute.xlu0 %9197  ;;  %v7176_v60 = vld [vmem:[%s10849_s11 + $0x20] sm:$0xff] }
0x2f26   : > { %v9200_v44 = vunpack.i.h.bf16 %v9198_v25  ;;  %v9199_v27 = vunpack.i.l.bf16 %v9198_v25  ;;  %v8762_v58 = vpack.c.bf16 %v7177_v52, %v7176_v60  ;;  %v6273_v25 = vrot.slane %v10587_v0, %v9626_v4 }
0x2f27   : > { %8237 = vmatmul.mubr.msk.f32.vlgmr.msra.gmra.mrb[54].mxu1 %vm1454_vm3, %v5739_v36  ;;  %v7179_v36 = vld [vmem:[%s10849_s11 + $0x38] sm:$0xff] }
0x2f28   : > { %v9283_v32 = vpop.eup %9282  ;;  %8245 = vmatpush3.msra.mxu1 %v5907_v22  ;;  %8246 = vmatprep.mubr.msk.f32.mxu1 %vm9314_vm1, %v9315_v18  ;;  %v8756_v28 = vpack.c.bf16 %v9200_v44, %v9199_v27 }
0x2f29   : > { %v5905_v50 = vmul.f32 %v9283_v32, %v9275_v48  ;;  %8254 = vmatprep.subr.mxu1 %v9315_v18 }
0x2f2a   : > { %8757 = vmatpush3.bf16.msra.mxu0 %v8756_v28  ;;  %v7184_v28 = vld [vmem:[%s10851_s13 + $0x88] sm:$0xff] }
0x2f2b   : > { %8247 = vmatmul.mubr.msk.f32.vlgmr.msra.gmra.mrb[56].mxu1 %vm1454_vm3, %v5905_v50  ;;  %8758 = vmatprep.subr.bf16.mxu0 %v9313_v10 }
0x2f2c   : > { %8256 = vmatprep.mubr.msk.f32.mxu1 %vm9314_vm1, %v9315_v18 }
0x2f4e   : > { %v6068_v42 = vpop.xlane.xlu1 %6067 }
0x2f4f   : > { %9284 = vrcp.f32 %v6068_v42 }
0x2f52   : > { %v6072_v13 = vpop.permute.xlu1 %6071 }
0x2f53   : > { %8255 = vmatpush3.msra.mxu1 %v6072_v13  ;;  %v6268_v13 = vrot.slane %v10582_v59, %v9626_v4  ;;  %v7183_v4 = vld [vmem:[%s10851_s13 + $0x80] sm:$0xff] }
0x2f54   : > { %8761 = vmatprep.subr.bf16.mxu1 %v9313_v10 }
0x2f56   : > { %v9203_v34 = vpop.permute.xlu1 %9202 }
0x2f57   : > { %v9205_v40 = vunpack.i.h.bf16 %v9203_v34  ;;  %v9204_v46 = vunpack.i.l.bf16 %v9203_v34  ;;  %v8768_v34 = vpack.c.bf16 %v7184_v28, %v7183_v4 }
0x2f59   : > { %v9285_v23 = vpop.eup %9284  ;;  %v8759_v39 = vpack.c.bf16 %v9205_v40, %v9204_v46  ;;  %v7187_v46 = vld [vmem:[%s10851_s13 + $0xa0] sm:$0xff] }
0x2f5a   : > { %v6070_v37 = vmul.f32 %v9285_v23, %v9277_v55 }
0x2f5b   : > { %8760 = vmatpush3.bf16.msra.mxu0 %v8759_v39  ;;  %v7188_v39 = vld [vmem:[%s10851_s13 + $0xa8] sm:$0xff] }
0x2f5c   : > { %8257 = vmatmul.mubr.msk.f32.vlgmr.msra.gmra.mrb[58].mxu1 %vm1454_vm3, %v6070_v37  ;;  %8767 = vmatprep.subr.bf16.mxu0 %v9313_v10 }
0x2f5d   : > { %8278 = vmatprep.mubr.msk.f32.mxu1 %vm9314_vm1, %v9315_v18  ;;  %8763 = vmatpush3.bf16.msra.mxu1 %v8762_v58 }
0x2f5e   : > { %8764 = vmatprep.subr.bf16.mxu1 %v9313_v10 }
0x2ff6   : > { %v5647_v57 = vpop.f32.mrb[52].mxu1 }
0x2ff7   : > { %v8228_v9 = vpop.f32.mrb[53].mxu1 }
0x2ff8   : > { %v7189_v9 = vld [vmem:[%s10851_s13 + $0xb0] sm:$0xff] }
0x2ffa   : > { %v5813_v41 = vpop.f32.mrb[54].mxu1 }
0x2ffb   : > { %6148 = vrot.lane.b32.xlu0 %v5813_v41, %s10940_s20  ;;  %v8238_v17 = vpop.f32.mrb[55].mxu1  ;;  %v7190_v41 = vld [vmem:[%s10851_s13 + $0xb8] sm:$0xff] }
0x2ffc   : > { %v8777_v17 = vpack.c.bf16 %v7190_v41, %v7189_v9 }
0x2ffe   : > { %v5978_v29 = vpop.f32.mrb[56].mxu1 }
0x2fff   : > { %6152 = vrot.lane.b32.xlu1 %v5978_v29, %s10941_s4  ;;  %v8248_v30 = vpop.f32.mrb[57].mxu1  ;;  %v7191_v29 = vld [vmem:[%s10851_s13 + $0xc0] sm:$0xff] }
0x3000   : > { %v7192_v30 = vld [vmem:[%s10851_s13 + $0xc8] sm:$0xff] }
0x302f   : > { %v6143_v47 = vpop.f32.mrb[58].mxu1 }
0x3030   : > { %6156 = vrot.lane.b32.xlu0 %v6143_v47, %s10943_s9  ;;  %v8258_v61 = vpop.f32.mrb[59].mxu1  ;;  %v8780_v47 = vpack.c.bf16 %v7192_v30, %v7191_v29 }
0x3031   : > { %v7193_v61 = vld [vmem:[%s10851_s13 + $0xd0] sm:$0xff] }
0x306d   : > { %v6149_v49 = vpop.permute.xlu0 %6148 }
0x306e   : > { %v6159_v62 = vsel %vm1454_vm3, %v5647_v57, %v6149_v49  ;;  %v8774_v57 = vpack.c.bf16 %v7188_v39, %v7187_v46  ;;  %v7194_v49 = vld [vmem:[%s10851_s13 + $0xd8] sm:$0xff]  ;;  %v7200_v46 = vld [vmem:[%s10852_s14 + $0x1] ss:$0 sm:$0xff] }
0x3071   : > { %v6153_v51 = vpop.permute.xlu1 %6152 }
0x3072   : > { %v6160_v6 = vsel %vm2323_vm8, %v6159_v62, %v6153_v51  ;;  %v8783_v51 = vpack.c.bf16 %v7194_v49, %v7193_v61  ;;  %v7195_v62 = vld [vmem:[%s10851_s13 + $0xe0] sm:$0xff] }
0x30a2   : > { %v6157_v48 = vpop.permute.xlu0 %6156 }
0x30a3   : > { %v6161_v33 = vsel %vm2325_vm9, %v6160_v6, %v6157_v48  ;;  %v7196_v6 = vld [vmem:[%s10851_s13 + $0xe8] sm:$0xff] }
0x30a4   : > { %8268 = vmatmul.mubr.msk.f32.vlgmr.msra.gmra.mrb[62].mxu0 %vm743_vm0, %v6161_v33  ;;  %v8786_v48 = vpack.c.bf16 %v7196_v6, %v7195_v62  ;;  %v7197_v33 = vld [vmem:[%s10851_s13 + $0xf0] sm:$0xff]  ;;  %v6500_v62 = vrot.slane %v10582_v59, %v9646_v24 }
0x30a5   : > { %8313 = vmatprep.mubr.msk.f32.mxu0 %vm9314_vm1, %v9315_v18  ;;  %8769 = vmatpush3.bf16.msra.mxu0 %v8768_v34 }
0x30a6   : > { %8770 = vmatprep.subr.bf16.mxu0 %v9313_v10 }
0x3177   : > { %v6247_v12 = vpop.f32.mrb[62].mxu0 }
0x3178   : > { %v6248_v7 = vadd.f32 %v6247_v12, %v6165_v14  ;;  %v8269_v55 = vpop.f32.mrb[63].mxu0  ;;  %v7198_v14 = vld [vmem:[%s10851_s13 + $0xf8] sm:$0xff] }
0x3179   : > { %v8789_v12 = vpack.c.bf16 %v7198_v14, %v7197_v33 }
0x317a   : > { %v6251_v56 = vadd.f32 %v6248_v7, %v10593_v53  ;;  %v7178_v53 = vld [vmem:[%s10849_s11 + $0x30] sm:$0xff]  ;;  %v7181_v7 = vld [vmem:[%s10850_s12 + $0x1] ss:$0 sm:$0xff] }
0x317b   : > { %v8765_v22 = vpack.c.bf16 %v7179_v36, %v7178_v53 }
0x317c   : > { %v6252_v8 = vsel %vm743_vm0, %v6251_v56, 0.0 }
0x317d   : > { %6253 = vadd.xlane.f32.xlu1 %v6252_v8  ;;  %8766 = vmatpush3.bf16.msra.mxu1 %v8765_v22 }
0x317e   : > { %8791 = vmatprep.subr.bf16.mxu1 %v9313_v10 }
0x320a   : > { %v6254_v45 = vpop.xlane.xlu1 %6253 }
0x320b   : > { %v6255_v63 = vmul.f32 0.03125, %v6254_v45 }
0x320d   : > { %v6256_v16 = vsub.f32 %v6251_v56, %v6255_v63 }
0x320f   : > { %v6257_v2 = vmul.f32 %v6256_v16, %v6256_v16 }
0x3211   : > { %v6258_v21 = vsel %vm743_vm0, %v6257_v2, 0.0 }
0x3212   : > { %6259 = vadd.xlane.f32.xlu0 %v6258_v21 }
0x329f   : > { %v6260_v32 = vpop.xlane.xlu0 %6259 }
0x32a0   : > { %v6261_v50 = vmul.f32 0.03125, %v6260_v32 }
0x32a2   : > { %v6262_v42 = vadd.f32 1e-05, %v6261_v50 }
0x32a4   : > { %9286 = vrsqrt.f32 %v6262_v42 }
0x32ae   : > { %v9287_v23 = vpop.eup %9286 }
0x32af   : > { %v6264_v37 = vmul.f32 %v9287_v23, %v6256_v16 }
0x32b1   : > { %v6269_v44 = vmul.f32 %v6268_v13, %v6264_v37 }
0x32b3   : > { %v10712_v27 = vadd.f32 %v6273_v25, %v6269_v44 }
0x32b5   : > { %8279 = vmatmul.mubr.msk.f32.vlgmr.msra.gmra.mrb[60].mxu1 %vm743_vm0, %v10712_v27 }
0x32b6   : > { %8793 = vmatpush3.bf16.msra.mxu1 %v9471_v11  ;;  %8324 = vmatprep.mubr.msk.f32.mxu1 %vm9314_vm1, %v9315_v18  ;;  %v7185_v11 = vld [vmem:[%s10851_s13 + $0x90] sm:$0xff] }
0x32b7   : > { %8794 = vmatprep.subr.bf16.mxu1 %v9313_v10 }
0x32ba   : > { %8796 = vmatpush3.bf16.msra.mxu1 %v9495_v19  ;;  %v7186_v19 = vld [vmem:[%s10851_s13 + $0x98] sm:$0xff] }
0x32bb   : > { %8797 = vmatprep.subr.bf16.mxu1 %v9313_v10  ;;  %v8771_v40 = vpack.c.bf16 %v7186_v19, %v7185_v11 }
0x32bd   : > { %8772 = vmatpush3.bf16.msra.mxu0 %v8771_v40 }
0x32be   : > { %8773 = vmatprep.subr.bf16.mxu0 %v9313_v10 }
0x32c1   : > { %8775 = vmatpush3.bf16.msra.mxu0 %v8774_v57 }
0x32c2   : > { %8776 = vmatprep.subr.bf16.mxu0 %v9313_v10 }
0x32c5   : > { %8778 = vmatpush3.bf16.msra.mxu0 %v8777_v17 }
0x32c6   : > { %8779 = vmatprep.subr.bf16.mxu0 %v9313_v10 }
0x32c9   : > { %8781 = vmatpush3.bf16.msra.mxu0 %v8780_v47 }
0x32ca   : > { %8782 = vmatprep.subr.bf16.mxu0 %v9313_v10 }
0x32cd   : > { %8784 = vmatpush3.bf16.msra.mxu0 %v8783_v51 }
0x32ce   : > { %8785 = vmatprep.subr.bf16.mxu0 %v9313_v10 }
0x32d1   : > { %8787 = vmatpush3.bf16.msra.mxu0 %v8786_v48 }
0x32d2   : > { %8788 = vmatprep.subr.bf16.mxu0 %v9313_v10 }
0x32d5   : > { %8790 = vmatpush3.bf16.msra.mxu0 %v8789_v12 }
0x32d6   : > { %8815 = vmatprep.subr.bf16.mxu0 %v9313_v10 }
0x3388   : > { %v6357_v55 = vpop.f32.mrb[60].mxu1 }
0x3389   : > { %v6358_v56 = vadd.f32 %v7181_v7, %v6357_v55  ;;  %v8280_v8 = vpop.f32.mrb[61].mxu1 }
0x338b   : > { %v6362_v45 = vmul.f32 0.70710677, %v6358_v56  ;;  %v6361_v11 = vmul.f32 0.5, %v6358_v56 }
0x338d   : > { %v6363_v63 = vand.u32 2147483647, %v6362_v45  ;;  %vm6383_vm14 = vcmp.lt.f32.partialorder %v6362_v45, 0.0 }
0x338f   : > { %v6364_v16 = vmul.f32 0.3275911, %v6363_v63  ;;  %v6377_v21 = vsub.f32 0.0, %v6363_v63 }
0x3391   : > { %v6365_v2 = vadd.f32 1.0, %v6364_v16  ;;  %v6378_v52 = vmul.f32 %v6377_v21, %v6363_v63 }
0x3393   : > { %9288 = vrcp.f32 %v6365_v2  ;;  %v6379_v36 = vmul.f32 1.442695, %v6378_v52 }
0x3395   : > { %9290 = vpow2.f32 %v6379_v36 }
0x339d   : > { %v9289_v60 = vpop.eup %9288 }
0x339e   : > { %v6368_v58 = vmul.f32 1.0614054, %v9289_v60 }
0x339f   : > { %v9291_v25 = vpop.eup %9290 }
0x33a0   : > { %v6369_v53 = vadd.f32 -1.4531521, %v6368_v58 }
0x33a2   : > { %v6370_v22 = vmul.f32 %v9289_v60, %v6369_v53 }
0x33a4   : > { %v6371_v32 = vadd.f32 1.4214138, %v6370_v22 }
0x33a6   : > { %v6372_v50 = vmul.f32 %v9289_v60, %v6371_v32 }
0x33a8   : > { %v6373_v42 = vadd.f32 -0.28449672, %v6372_v50 }
0x33aa   : > { %v6374_v13 = vmul.f32 %v9289_v60, %v6373_v42 }
0x33ac   : > { %v6375_v23 = vadd.f32 0.2548296, %v6374_v13 }
0x33ae   : > { %v6376_v37 = vmul.f32 %v9289_v60, %v6375_v23  ;;  %v9303_v60 = vld [vmem:[%s10854_s16] ss:$0 sm:$0xff] }
0x33b0   : > { %v6381_v44 = vmul.f32 %v9291_v25, %v6376_v37 }
0x33b2   : > { %v6382_v4 = vsub.f32 1.0, %v6381_v44 }
0x33b4   : > { %v6384_v28 = vsub.f32 0.0, %v6382_v4 }
0x33b6   : > { %v6385_v34 = vsel %vm6383_vm14, %v6384_v28, %v6382_v4 }
0x33b7   : > { %v6386_v19 = vadd.f32 1.0, %v6385_v34 }
0x33b9   : > { %v6387_v40 = vmul.f32 %v6386_v19, %v6361_v11 }
0x33bb   : > { %8314 = vmatmul.mubr.f32.vlgmr.msra.gmra.mrb[64].mxu0 %v6387_v40 }
0x33bc   : > { %8817 = vmatpush3.bf16.msra.mxu0 %v9616_v1  ;;  %8368 = vmatprep.mubr.msk.f32.mxu0 %vm9314_vm1, %v9315_v18 }
0x33bd   : > { %8818 = vmatprep.subr.bf16.mxu0 %v9313_v10 }
0x33c0   : > { %8820 = vmatpush3.bf16.msra.mxu0 %v9619_v3 }
0x348e   : > { %v6479_v39 = vpop.f32.mrb[64].mxu0 }
0x348f   : > { %v6480_v57 = vadd.f32 %v7200_v46, %v6479_v39  ;;  %v8315_v9 = vpop.f32.mrb[65].mxu0 }
0x3491   : > { %v6483_v41 = vadd.f32 %v6480_v57, %v10712_v27  ;;  %v6505_v27 = vrot.slane %v10587_v0, %v9646_v24  ;;  %v9302_v24 = vld [vmem:[%s10853_s15] ss:$0 sm:$0xff] }
0x3493   : > { %v6484_v17 = vsel %vm743_vm0, %v6483_v41, 0.0 }
0x3494   : > { %6485 = vadd.xlane.f32.xlu0 %v6484_v17 }
0x3521   : > { %v6486_v1 = vpop.xlane.xlu0 %6485 }
0x3522   : > { %v6487_v29 = vmul.f32 0.03125, %v6486_v1 }
0x3524   : > { %v6488_v30 = vsub.f32 %v6483_v41, %v6487_v29 }
0x3526   : > { %v6489_v47 = vmul.f32 %v6488_v30, %v6488_v30 }
0x3528   : > { %v6490_v61 = vsel %vm743_vm0, %v6489_v47, 0.0 }
0x3529   : > { %6491 = vadd.xlane.f32.xlu1 %v6490_v61 }
0x35b6   : > { %v6492_v3 = vpop.xlane.xlu1 %6491 }
0x35b7   : > { %v6493_v49 = vmul.f32 0.03125, %v6492_v3 }
0x35b9   : > { %v6494_v51 = vadd.f32 1e-05, %v6493_v49 }
0x35bb   : > { %9292 = vrsqrt.f32 %v6494_v51 }
0x35c5   : > { %v9293_v6 = vpop.eup %9292 }
0x35c6   : > { %v6496_v48 = vmul.f32 %v9293_v6, %v6488_v30 }
0x35c8   : > { %v6501_v33 = vmul.f32 %v6500_v62, %v6496_v48 }
0x35ca   : > { %v6506_v14 = vadd.f32 %v6505_v27, %v6501_v33 }
0x35cc   : > { %v6507_v12 = vsel %vm743_vm0, %v6506_v14, 0.0 }
0x35cd   : > { %6508 = vadd.xlane.f32.xlu0 %v6507_v12 }
0x365a   : > { %v6509_v7 = vpop.xlane.xlu0 %6508 }
0x365b   : > { %v6510_v55 = vmul.f32 0.03125, %v6509_v7 }
0x365d   : > { %v6511_v56 = vsub.f32 %v6506_v14, %v6510_v55 }
0x365f   : > { %v6512_v8 = vmul.f32 %v6511_v56, %v6511_v56 }
0x3661   : > { %v6513_v45 = vsel %vm743_vm0, %v6512_v8, 0.0 }
0x3662   : > { %6514 = vadd.xlane.f32.xlu1 %v6513_v45 }
0x36ef   : > { %v6515_v63 = vpop.xlane.xlu1 %6514 }
0x36f0   : > { %v6516_v16 = vmul.f32 0.03125, %v6515_v63 }
0x36f2   : > { %v6517_v59 = vadd.f32 1e-05, %v6516_v16 }
0x36f4   : > { %9294 = vrsqrt.f32 %v6517_v59 }
0x36fe   : > { %v9295_v2 = vpop.eup %9294 }
0x36ff   : > { %v6519_v21 = vmul.f32 %v9295_v2, %v6511_v56 }
0x3701   : > { %v6520_v0 = vmul.f32 %v9302_v24, %v6519_v21 }
0x3703   : > { %v6521_v52 = vadd.f32 %v9303_v60, %v6520_v0 }
0x3705   : > { %8325 = vmatmul.mubr.msk.f32.vlgmr.msra.gmra.mrb[62].mxu1 %vm743_vm0, %v6521_v52 }
0x3706   : > { %8799 = vmatpush3.bf16.msra.mxu1 %v9482_v15  ;;  %8335 = vmatprep.mubr.msk.f32.mxu1 %vm9314_vm1, %v9315_v18 }
0x3707   : > { %8800 = vmatprep.subr.bf16.mxu1 %v9313_v10 }
0x370a   : > { %8802 = vmatpush3.bf16.msra.mxu1 %v9499_v20  ;;  %v9304_v20 = vld [vmem:[%s10856_s18] ss:$0 sm:$0xff] }
0x370b   : > { %8803 = vmatprep.subr.bf16.mxu1 %v9313_v10 }
0x370d   : > { %8336 = vmatmul.mubr.msk.f32.vlgmr.msra.gmra.mrb[64].mxu1 %vm743_vm0, %v6521_v52 }
0x370e   : > { %8805 = vmatpush3.bf16.msra.mxu1 %v9518_v31  ;;  %8346 = vmatprep.mubr.msk.f32.mxu1 %vm9314_vm1, %v9315_v18 }
0x370f   : > { %8806 = vmatprep.subr.bf16.mxu1 %v9313_v10 }
0x3712   : > { %8808 = vmatpush3.bf16.msra.mxu1 %v9534_v35 }
0x3713   : > { %8809 = vmatprep.subr.bf16.mxu1 %v9313_v10 }
0x37d8   : > { %v6591_v15 = vpop.f32.mrb[62].mxu1 }
0x37d9   : > { %v6592_v58 = vadd.f32 %v9304_v20, %v6591_v15  ;;  %v8326_v53 = vpop.f32.mrb[63].mxu1 }
0x37db   : > { %7202 = vst [vmem:[%s9577_s5 + $0x10] sm:$0xff] %v6592_v58 }
0x37e0   : > { %v6663_v36 = vpop.f32.mrb[64].mxu1 }
0x37e1   : > { %v6664_v31 = vadd.f32 %v6663_v36, %v9567_v43  ;;  %v8337_v22 = vpop.f32.mrb[65].mxu1 }
0x37e3   : > { %v6667_v32 = vmax.f32 %v6664_v31, 0.0 }
0x37e5   : > { %8347 = vmatmul.mubr.msk.f32.vlgmr.msra.gmra.mrb[66].mxu1 %vm743_vm0, %v6667_v32 }
0x37e6   : > { %8811 = vmatpush3.bf16.msra.mxu1 %v9544_v38  ;;  %8357 = vmatprep.mubr.msk.f32.mxu1 %vm9314_vm1, %v9315_v18 }
0x37e7   : > { %8812 = vmatprep.subr.bf16.mxu1 %v9313_v10 }
0x37ea   : > { %8814 = vmatpush3.bf16.msra.mxu1 %v9590_v54 }
0x38b8   : > { %v6737_v35 = vpop.f32.mrb[66].mxu1 }
0x38b9   : > { %v6738_v50 = vadd.f32 %v6737_v35, %v9630_v5  ;;  %v8348_v42 = vpop.f32.mrb[67].mxu1 }
0x38bb   : > { %v6741_v13 = vmax.f32 %v6738_v50, 0.0 }
0x38bd   : > { %8358 = vmatmul.mubr.msk.f32.vlgmr.msra.gmra.mrb[68].mxu1 %vm743_vm0, %v6741_v13 }
0x3990   : > { %v6811_v43 = vpop.f32.mrb[68].mxu1 }
0x3991   : > { %v6812_v23 = vadd.f32 %v6811_v43, %v9651_v26  ;;  %v8359_v37 = vpop.f32.mrb[69].mxu1 }
0x3993   : > { %8369 = vmatmul.mubr.msk.f32.vlgmr.msra.gmra.mrb[66].mxu0 %vm743_vm0, %v6812_v23 }
0x3a66   : > { %v6884_v38 = vpop.f32.mrb[66].mxu0 }
0x3a67   : > { %7207 = vst.msk [vmem:[%s9686_s17 + $0x10] sm:$0xff] %vm1155_vm2, %v6884_v38  ;;  %v8370_v18 = vpop.f32.mrb[67].mxu0 }
0x3a68 PF: > { %s10950_s5 = sld [smem:[#allocation2_spill]] }
0x3a6e   : > { %s33_s3 = sadd.s32 1, %s10950_s5  }
0x3a6f   : > { %p30_p4 = scmp.ge.s32.totalorder %s33_s3, 4  }
0x3a71   :  { %32 = sbr.rel (!%p30_p4) target bundleno = 17 (0x11), region = 165 }

</bundles_post_ra>
